<compile_context>
chip_gen: v7x
topology: tpu7x:2x2x1
jax: 0.10.0
libtpu: 0.0.40
codegen_flags: <defaults>
</compile_context>

<pallas_src>
import functools

import jax
import jax.numpy as jnp
from jax import lax
from jax.experimental import pallas as pl
from jax.experimental.pallas import tpu as pltpu


def _phase_conv(x_ref, w_ref, ph, pw, *, R, Wq, rows):
    """Conv output of pooling phase (ph, pw) as 9 MXU matmuls of shifted bf16 slices.

    x_ref: (1, 4*R, Cin_p) bf16 -- 4 parity images (R rows each) of the padded input.
    w_ref: (9, Cin_p, Cpad) bf16 -- one (Cin_p, Cpad) matrix per 3x3 tap.
    Returns a (rows, Cpad) f32 accumulator.  Column wo == Wq-1 of each logical
    (Ho, Wq) block is junk (padded-width wrap); it is masked in pass 1 and sliced
    off in the wrapper after pass 2.
    """
    acc = None
    for kh in range(3):
        for kw in range(3):
            u, v = ph + kh, pw + kw
            pp = 2 * (u % 2) + (v % 2)                 # which parity image
            start = pp * R + (u // 2) * Wq + (v // 2)  # static row shift in that image
            xs = x_ref[0, start:start + rows, :]       # (rows, Cin_p) bf16 slice
            t = jnp.dot(xs, w_ref[3 * kh + kw], preferred_element_type=jnp.float32)
            acc = t if acc is None else acc + t
    return acc


def _conv_stats_kernel(x_ref, w_ref, ssum_ref, ssq_ref, *, R, Wq, rows, Cpad):
    """Pass 1: conv for one batch element + per-channel partial sum / sum-of-squares."""
    ridx = lax.broadcasted_iota(jnp.int32, (rows, Cpad), 0)
    msk = (ridx % Wq != Wq - 1).astype(jnp.float32)     # 0.0 on the junk column rows
    s = jnp.zeros((1, Cpad), jnp.float32)
    ss = jnp.zeros((1, Cpad), jnp.float32)
    for ph in range(2):
        for pw in range(2):
            acc = _phase_conv(x_ref, w_ref, ph, pw, R=R, Wq=Wq, rows=rows)
            am = acc * msk
            s = s + jnp.sum(am, axis=0, keepdims=True)        # masked XLU column-sums
            ss = ss + jnp.sum(am * acc, axis=0, keepdims=True)
    # 8 replicated rows so the output block keeps a (8, 128)-aligned shape; the
    # replication factor is divided out via inv_count in the wrapper.
    ssum_ref[...] = jnp.broadcast_to(s, (8, Cpad))
    ssq_ref[...] = jnp.broadcast_to(ss, (8, Cpad))


def _bn_relu_pool_kernel(scale_ref, shift_ref, x_ref, w_ref, o_ref, *, R, Wq, rows, Cpad):
    """Pass 2: recompute conv, apply folded BN scale/shift, ReLU, 2x2 max-pool."""
    scale = jnp.broadcast_to(scale_ref[...], (rows, Cpad))    # hoisted out of the loop
    shift = jnp.broadcast_to(shift_ref[...], (rows, Cpad))
    out = None
    for ph in range(2):
        for pw in range(2):
            acc = _phase_conv(x_ref, w_ref, ph, pw, R=R, Wq=Wq, rows=rows)
            z = jnp.maximum(acc * scale + shift, 0.0)         # folded BN + ReLU
            out = z if out is None else jnp.maximum(out, z)   # max-pool over 4 phases
    o_ref[0] = out.astype(o_ref.dtype)                        # bf16 writeback


def conv_block_forward(x, weight, bias, gamma, beta, *, eps=1e-5,
                       kernel_size=3, padding=1, stride=1, maxpool_kernel=2):
    """x: NCHW f32, weight: (Cout, Cin, 3, 3), bias/gamma/beta: (Cout,)."""
    assert kernel_size == 3 and padding == 1 and stride == 1 and maxpool_kernel == 2
    # Conv bias is exactly cancelled by the training-mode BatchNorm mean subtraction,
    # so it is intentionally unused.  Restore it if this forward is ever reused with
    # eval-mode / running-stats BN.
    del bias

    N, Cin, H, W = x.shape
    Cout = weight.shape[0]
    assert H % 2 == 0 and W % 2 == 0, "spatial dims must be even for MaxPool2d(2)"
    Ho, Wo = H // 2, W // 2
    Hq, Wq = Ho + 1, Wo + 1
    R = (Hq + 1) * Wq                       # rows per parity image (+1 zero guard row)
    rows = Ho * Wq                          # per-phase rows (incl. 1 junk column)
    Cpad = ((Cout + 127) // 128) * 128      # lane-dense output channels
    Cin_p = ((Cin + 7) // 8) * 8
    inv_count = 1.0 / (8.0 * N * H * W)     # stats rows are replicated 8x per step

    # ---- layout plumbing only (~1x data, no HBM im2col), all in bf16:
    # NCHW -> NHWC, one fused pad (halo + guard rows + channel pad), 2x2 parity split,
    # flatten each parity image to (R, Cin_p) rows.
    xb = jnp.transpose(x.astype(jnp.bfloat16), (0, 2, 3, 1))          # (N, H, W, Cin)
    xp = jnp.pad(xb, ((0, 0), (padding, padding + 2), (padding, padding),
                      (0, Cin_p - Cin)))                              # (N, 2(Hq+1), 2Wq, Cin_p)
    xq = xp.reshape(N, Hq + 1, 2, Wq, 2, Cin_p).transpose(0, 2, 4, 1, 3, 5)
    X = xq.reshape(N, 4 * R, Cin_p)

    # weights: (Cout, Cin, 3, 3) -> (9 taps, Cin_p, Cpad) bf16
    wt = jnp.transpose(weight, (2, 3, 1, 0)).astype(jnp.bfloat16)     # (3, 3, Cin, Cout)
    wt = jnp.pad(wt, ((0, 0), (0, 0), (0, Cin_p - Cin), (0, Cpad - Cout)))
    Wall = wt.reshape(9, Cin_p, Cpad)

    # ---- VMEM budget from the tile sizes; cap per generation (64 MiB v7x, 128 MiB v5e/v6e)
    def _rup(v, m):
        return -(-v // m) * m

    vmem_need = (2 * _rup(4 * R, 16) * _rup(Cin_p, 128) * 2    # X tile, double-buffered bf16
                 + 2 * 9 * _rup(Cin_p, 16) * Cpad * 2          # per-tap weights (2 buffers)
                 + 2 * _rup(rows, 16) * Cpad * 2               # out tile, double-buffered bf16
                 + 8 * _rup(rows, 8) * Cpad * 4                # live f32 accumulators/temps
                 + 2 * 2 * 8 * Cpad * 4                        # stats blocks
                 + (4 << 20))                                  # headroom
    try:
        vmem_cap = int(getattr(pltpu.get_tpu_info(), "vmem_capacity_bytes", 64 << 20))
    except Exception:
        vmem_cap = 64 << 20
    vmem_limit = int(min(max(vmem_need, 32 << 20), vmem_cap * 3 // 4))
    cparams = pltpu.CompilerParams(dimension_semantics=("parallel",),
                                   vmem_limit_bytes=vmem_limit)

    matmul_flops = int(2 * N * 4 * 9 * rows * Cin_p * Cpad)
    x_bytes, w_bytes = int(X.size) * 2, int(Wall.size) * 2
    ce1 = pl.CostEstimate(flops=matmul_flops, transcendentals=0,
                          bytes_accessed=x_bytes + w_bytes + 2 * 8 * N * Cpad * 4)
    ce2 = pl.CostEstimate(flops=matmul_flops, transcendentals=0,
                          bytes_accessed=x_bytes + w_bytes + N * rows * Cpad * 2)

    # ---- pass 1: conv + partial BN statistics (per batch element) ----
    kern1 = functools.partial(_conv_stats_kernel, R=R, Wq=Wq, rows=rows, Cpad=Cpad)
    stats_shape = jax.ShapeDtypeStruct((8 * N, Cpad), jnp.float32)
    ssum, ssq = pl.pallas_call(
        kern1,
        out_shape=(stats_shape, stats_shape),
        grid_spec=pltpu.PrefetchScalarGridSpec(
            num_scalar_prefetch=0,
            grid=(N,),
            in_specs=[
                pl.BlockSpec((1, 4 * R, Cin_p), lambda n: (n, 0, 0)),
                pl.BlockSpec((9, Cin_p, Cpad), lambda n: (0, 0, 0)),
            ],
            out_specs=[
                pl.BlockSpec((8, Cpad), lambda n: (n, 0)),
                pl.BlockSpec((8, Cpad), lambda n: (n, 0)),
            ],
        ),
        compiler_params=cparams,
        cost_estimate=ce1,
    )(X, Wall)

    # ---- fold BN into per-channel scale/shift in plain jnp (tiny, outside the kernel)
    s = jnp.sum(ssum, axis=0)
    ss = jnp.sum(ssq, axis=0)
    mean = s * inv_count
    var = jnp.maximum(ss * inv_count - mean * mean, 0.0)   # biased batch variance
    g = jnp.pad(gamma.astype(jnp.float32), (0, Cpad - Cout))
    b = jnp.pad(beta.astype(jnp.float32), (0, Cpad - Cout))
    scale = g * lax.rsqrt(var + eps)
    shift = b - mean * scale
    scale = scale.reshape(1, Cpad)
    shift = shift.reshape(1, Cpad)

    # ---- pass 2: conv (recomputed) + folded BN + ReLU + 2x2 max-pool ----
    kern2 = functools.partial(_bn_relu_pool_kernel, R=R, Wq=Wq, rows=rows, Cpad=Cpad)
    out_flat = pl.pallas_call(
        kern2,
        out_shape=jax.ShapeDtypeStruct((N, rows, Cpad), jnp.bfloat16),
        grid_spec=pltpu.PrefetchScalarGridSpec(
            num_scalar_prefetch=0,
            grid=(N,),
            in_specs=[
                pl.BlockSpec((1, Cpad), lambda n: (0, 0)),
                pl.BlockSpec((1, Cpad), lambda n: (0, 0)),
                pl.BlockSpec((1, 4 * R, Cin_p), lambda n: (n, 0, 0)),
                pl.BlockSpec((9, Cin_p, Cpad), lambda n: (0, 0, 0)),
            ],
            out_specs=pl.BlockSpec((1, rows, Cpad), lambda n: (n, 0, 0)),
        ),
        compiler_params=cparams,
        cost_estimate=ce2,
    )(scale, shift, X, Wall)

    # drop the junk column and the channel padding, back to NCHW f32
    out = out_flat.reshape(N, Ho, Wq, Cpad)[:, :, :Wo, :Cout]
    return jnp.transpose(out, (0, 3, 1, 2)).astype(jnp.float32)


def _reference(x, weight, bias, gamma, beta, eps=1e-5):
    y = lax.conv_general_dilated(
        x, weight, window_strides=(1, 1), padding=((1, 1), (1, 1)),
        dimension_numbers=("NCHW", "OIHW", "NCHW"),
        precision=lax.Precision.HIGHEST)
    y = y + bias[None, :, None, None]
    mean = y.mean(axis=(0, 2, 3), keepdims=True)
    var = ((y - mean) ** 2).mean(axis=(0, 2, 3), keepdims=True)
    y = (y - mean) * lax.rsqrt(var + eps)
    y = y * gamma[None, :, None, None] + beta[None, :, None, None]
    y = jnp.maximum(y, 0.0)
    n, c, h, w = y.shape
    return y.reshape(n, c, h // 2, 2, w // 2, 2).max(axis=(3, 5))


if __name__ == "__main__":
    key = jax.random.PRNGKey(0)
    k_x, k_w, k_b = jax.random.split(key, 3)

    N, Cin, Cout, H, W = 2, 4, 8, 16, 16
    x = jax.random.normal(k_x, (N, Cin, H, W), dtype=jnp.float32)

    # deterministic parameter init (shapes per nn.Conv2d / nn.BatchNorm2d defaults)
    fan_in = Cin * 3 * 3
    bound = 1.0 / (fan_in ** 0.5)
    weight = jax.random.uniform(k_w, (Cout, Cin, 3, 3), jnp.float32, -bound, bound)
    bias = jax.random.uniform(k_b, (Cout,), jnp.float32, -bound, bound)
    gamma = jnp.ones((Cout,), jnp.float32)
    beta = jnp.zeros((Cout,), jnp.float32)

    fwd = jax.jit(conv_block_forward)
    out = jax.block_until_ready(fwd(x, weight, bias, gamma, beta))

    ref = _reference(x, weight, bias, gamma, beta)
    assert out.shape == (N, Cout, H // 2, W // 2), out.shape
    # bf16 MXU operands + bf16 output store -> bf16-appropriate tolerance
    max_err = float(jnp.max(jnp.abs(out - ref)))
    assert jnp.allclose(out, ref, rtol=2e-2, atol=2e-2), f"mismatch, max err {max_err}"

    print("KERNEL_OK")
</pallas_src>

<mosaic_0001>
module attributes {stable_mosaic.version = 11 : i64} {
  func.func @_conv_stats_kernel(%arg0: i32, %arg1: memref<1x360x8xbf16, #tpu.memory_space<vmem>>, %arg2: memref<9x8x128xbf16, #tpu.memory_space<vmem>>, %arg3: memref<8x128xf32, #tpu.memory_space<vmem>>, %arg4: memref<8x128xf32, #tpu.memory_space<vmem>>) attributes {dimension_semantics = [#tpu.dimension_semantics<parallel>], iteration_bounds = array<i64: 2>, scalar_prefetch = 0 : i64, scratch_operands = 0 : i64, tpu.core_type = #tpu.core_type<tc>, window_params = [{transform_indices = @transform_0, window_bounds = array<i64: 1, 360, 8>}, {pipeline_mode = #tpu.pipeline_mode<synchronous>, transform_indices = @transform_1, window_bounds = array<i64: 9, 8, 128>}, {transform_indices = @transform_2, window_bounds = array<i64: 8, 128>}, {transform_indices = @transform_3, window_bounds = array<i64: 8, 128>}]} {
    %0 = tpu.iota {dimensions = array<i32: 0>} : vector<72x128xi32>
    %c9_i32 = arith.constant 9 : i32
    %c0_i32 = arith.constant 0 : i32
    %1 = arith.cmpi eq, %c9_i32, %c0_i32 : i32
    %c1_i32 = arith.constant 1 : i32
    %2 = arith.select %1, %c1_i32, %c9_i32 : i32
    %3 = vector.broadcast %2 : i32 to vector<72x128xi32>
    %4 = arith.remsi %0, %3 : vector<72x128xi32>
    %c0_i32_0 = arith.constant 0 : i32
    %5 = vector.broadcast %c0_i32_0 : i32 to vector<72x128xi32>
    %6 = arith.cmpi ne, %4, %5 : vector<72x128xi32>
    %c0_i32_1 = arith.constant 0 : i32
    %7 = vector.broadcast %c0_i32_1 : i32 to vector<72x128xi32>
    %8 = arith.cmpi slt, %4, %7 : vector<72x128xi32>
    %c0_i32_2 = arith.constant 0 : i32
    %9 = arith.cmpi slt, %2, %c0_i32_2 : i32
    %10 = vector.broadcast %9 : i1 to vector<72x128xi1>
    %11 = vector.broadcast %10 : vector<72x128xi1> to vector<72x128xi1>
    %12 = arith.xori %8, %11 : vector<72x128xi1>
    %13 = arith.andi %12, %6 : vector<72x128xi1>
    %14 = vector.broadcast %2 : i32 to vector<72x128xi32>
    %15 = arith.addi %4, %14 : vector<72x128xi32>
    %16 = arith.select %13, %15, %4 : vector<72x128xi1>, vector<72x128xi32>
    %c8_i32 = arith.constant 8 : i32
    %17 = vector.broadcast %c8_i32 : i32 to vector<72x128xi32>
    %18 = arith.cmpi ne, %16, %17 : vector<72x128xi32>
    %19 = arith.extui %18 : vector<72x128xi1> to vector<72x128xi32>
    %20 = arith.sitofp %19 : vector<72x128xi32> to vector<72x128xf32>
    %cst = arith.constant 0.000000e+00 : f32
    %21 = vector.broadcast %cst : f32 to vector<1x128xf32>
    %cst_3 = arith.constant 0.000000e+00 : f32
    %22 = vector.broadcast %cst_3 : f32 to vector<1x128xf32>
    %c0 = arith.constant 0 : index
    %c0_4 = arith.constant 0 : index
    %c0_5 = arith.constant 0 : index
    %23 = vector.load %arg1[%c0, %c0_4, %c0_5] : memref<1x360x8xbf16, #tpu.memory_space<vmem>>, vector<1x72x8xbf16>
    %24 = vector.shape_cast %23 : vector<1x72x8xbf16> to vector<72x8xbf16>
    %c0_6 = arith.constant 0 : index
    %c0_7 = arith.constant 0 : index
    %c0_8 = arith.constant 0 : index
    %25 = vector.load %arg2[%c0_6, %c0_7, %c0_8] : memref<9x8x128xbf16, #tpu.memory_space<vmem>>, vector<1x8x128xbf16>
    %26 = vector.shape_cast %25 : vector<1x8x128xbf16> to vector<8x128xbf16>
    %cst_9 = arith.constant dense<0.000000e+00> : vector<72x128xf32>
    %27 = tpu.matmul %24, %26, %cst_9 {dimension_numbers = #tpu.dot_dimension_numbers<[1], [0], [0], [1], [0, 0, 1, 1], [], []>} : vector<72x8xbf16>, vector<8x128xbf16>, vector<72x128xf32> -> vector<72x128xf32>
    %c0_10 = arith.constant 0 : index
    %c90 = arith.constant 90 : index
    %c0_11 = arith.constant 0 : index
    %28 = vector.load %arg1[%c0_10, %c90, %c0_11] : memref<1x360x8xbf16, #tpu.memory_space<vmem>>, vector<1x72x8xbf16>
    %29 = vector.shape_cast %28 : vector<1x72x8xbf16> to vector<72x8xbf16>
    %c1 = arith.constant 1 : index
    %c0_12 = arith.constant 0 : index
    %c0_13 = arith.constant 0 : index
    %30 = vector.load %arg2[%c1, %c0_12, %c0_13] : memref<9x8x128xbf16, #tpu.memory_space<vmem>>, vector<1x8x128xbf16>
    %31 = vector.shape_cast %30 : vector<1x8x128xbf16> to vector<8x128xbf16>
    %cst_14 = arith.constant dense<0.000000e+00> : vector<72x128xf32>
    %32 = tpu.matmul %29, %31, %cst_14 {dimension_numbers = #tpu.dot_dimension_numbers<[1], [0], [0], [1], [0, 0, 1, 1], [], []>} : vector<72x8xbf16>, vector<8x128xbf16>, vector<72x128xf32> -> vector<72x128xf32>
    %33 = arith.addf %27, %32 : vector<72x128xf32>
    %c0_15 = arith.constant 0 : index
    %c1_16 = arith.constant 1 : index
    %c0_17 = arith.constant 0 : index
    %34 = vector.load %arg1[%c0_15, %c1_16, %c0_17] : memref<1x360x8xbf16, #tpu.memory_space<vmem>>, vector<1x72x8xbf16>
    %35 = vector.shape_cast %34 : vector<1x72x8xbf16> to vector<72x8xbf16>
    %c2 = arith.constant 2 : index
    %c0_18 = arith.constant 0 : index
    %c0_19 = arith.constant 0 : index
    %36 = vector.load %arg2[%c2, %c0_18, %c0_19] : memref<9x8x128xbf16, #tpu.memory_space<vmem>>, vector<1x8x128xbf16>
    %37 = vector.shape_cast %36 : vector<1x8x128xbf16> to vector<8x128xbf16>
    %cst_20 = arith.constant dense<0.000000e+00> : vector<72x128xf32>
    %38 = tpu.matmul %35, %37, %cst_20 {dimension_numbers = #tpu.dot_dimension_numbers<[1], [0], [0], [1], [0, 0, 1, 1], [], []>} : vector<72x8xbf16>, vector<8x128xbf16>, vector<72x128xf32> -> vector<72x128xf32>
    %39 = arith.addf %33, %38 : vector<72x128xf32>
    %c0_21 = arith.constant 0 : index
    %c180 = arith.constant 180 : index
    %c0_22 = arith.constant 0 : index
    %40 = vector.load %arg1[%c0_21, %c180, %c0_22] : memref<1x360x8xbf16, #tpu.memory_space<vmem>>, vector<1x72x8xbf16>
    %41 = vector.shape_cast %40 : vector<1x72x8xbf16> to vector<72x8xbf16>
    %c3 = arith.constant 3 : index
    %c0_23 = arith.constant 0 : index
    %c0_24 = arith.constant 0 : index
    %42 = vector.load %arg2[%c3, %c0_23, %c0_24] : memref<9x8x128xbf16, #tpu.memory_space<vmem>>, vector<1x8x128xbf16>
    %43 = vector.shape_cast %42 : vector<1x8x128xbf16> to vector<8x128xbf16>
    %cst_25 = arith.constant dense<0.000000e+00> : vector<72x128xf32>
    %44 = tpu.matmul %41, %43, %cst_25 {dimension_numbers = #tpu.dot_dimension_numbers<[1], [0], [0], [1], [0, 0, 1, 1], [], []>} : vector<72x8xbf16>, vector<8x128xbf16>, vector<72x128xf32> -> vector<72x128xf32>
    %45 = arith.addf %39, %44 : vector<72x128xf32>
    %c0_26 = arith.constant 0 : index
    %c270 = arith.constant 270 : index
    %c0_27 = arith.constant 0 : index
    %46 = vector.load %arg1[%c0_26, %c270, %c0_27] : memref<1x360x8xbf16, #tpu.memory_space<vmem>>, vector<1x72x8xbf16>
    %47 = vector.shape_cast %46 : vector<1x72x8xbf16> to vector<72x8xbf16>
    %c4 = arith.constant 4 : index
    %c0_28 = arith.constant 0 : index
    %c0_29 = arith.constant 0 : index
    %48 = vector.load %arg2[%c4, %c0_28, %c0_29] : memref<9x8x128xbf16, #tpu.memory_space<vmem>>, vector<1x8x128xbf16>
    %49 = vector.shape_cast %48 : vector<1x8x128xbf16> to vector<8x128xbf16>
    %cst_30 = arith.constant dense<0.000000e+00> : vector<72x128xf32>
    %50 = tpu.matmul %47, %49, %cst_30 {dimension_numbers = #tpu.dot_dimension_numbers<[1], [0], [0], [1], [0, 0, 1, 1], [], []>} : vector<72x8xbf16>, vector<8x128xbf16>, vector<72x128xf32> -> vector<72x128xf32>
    %51 = arith.addf %45, %50 : vector<72x128xf32>
    %c0_31 = arith.constant 0 : index
    %c181 = arith.constant 181 : index
    %c0_32 = arith.constant 0 : index
    %52 = vector.load %arg1[%c0_31, %c181, %c0_32] : memref<1x360x8xbf16, #tpu.memory_space<vmem>>, vector<1x72x8xbf16>
    %53 = vector.shape_cast %52 : vector<1x72x8xbf16> to vector<72x8xbf16>
    %c5 = arith.constant 5 : index
    %c0_33 = arith.constant 0 : index
    %c0_34 = arith.constant 0 : index
    %54 = vector.load %arg2[%c5, %c0_33, %c0_34] : memref<9x8x128xbf16, #tpu.memory_space<vmem>>, vector<1x8x128xbf16>
    %55 = vector.shape_cast %54 : vector<1x8x128xbf16> to vector<8x128xbf16>
    %cst_35 = arith.constant dense<0.000000e+00> : vector<72x128xf32>
    %56 = tpu.matmul %53, %55, %cst_35 {dimension_numbers = #tpu.dot_dimension_numbers<[1], [0], [0], [1], [0, 0, 1, 1], [], []>} : vector<72x8xbf16>, vector<8x128xbf16>, vector<72x128xf32> -> vector<72x128xf32>
    %57 = arith.addf %51, %56 : vector<72x128xf32>
    %c0_36 = arith.constant 0 : index
    %c9 = arith.constant 9 : index
    %c0_37 = arith.constant 0 : index
    %58 = vector.load %arg1[%c0_36, %c9, %c0_37] : memref<1x360x8xbf16, #tpu.memory_space<vmem>>, vector<1x72x8xbf16>
    %59 = vector.shape_cast %58 : vector<1x72x8xbf16> to vector<72x8xbf16>
    %c6 = arith.constant 6 : index
    %c0_38 = arith.constant 0 : index
    %c0_39 = arith.constant 0 : index
    %60 = vector.load %arg2[%c6, %c0_38, %c0_39] : memref<9x8x128xbf16, #tpu.memory_space<vmem>>, vector<1x8x128xbf16>
    %61 = vector.shape_cast %60 : vector<1x8x128xbf16> to vector<8x128xbf16>
    %cst_40 = arith.constant dense<0.000000e+00> : vector<72x128xf32>
    %62 = tpu.matmul %59, %61, %cst_40 {dimension_numbers = #tpu.dot_dimension_numbers<[1], [0], [0], [1], [0, 0, 1, 1], [], []>} : vector<72x8xbf16>, vector<8x128xbf16>, vector<72x128xf32> -> vector<72x128xf32>
    %63 = arith.addf %57, %62 : vector<72x128xf32>
    %c0_41 = arith.constant 0 : index
    %c99 = arith.constant 99 : index
    %c0_42 = arith.constant 0 : index
    %64 = vector.load %arg1[%c0_41, %c99, %c0_42] : memref<1x360x8xbf16, #tpu.memory_space<vmem>>, vector<1x72x8xbf16>
    %65 = vector.shape_cast %64 : vector<1x72x8xbf16> to vector<72x8xbf16>
    %c7 = arith.constant 7 : index
    %c0_43 = arith.constant 0 : index
    %c0_44 = arith.constant 0 : index
    %66 = vector.load %arg2[%c7, %c0_43, %c0_44] : memref<9x8x128xbf16, #tpu.memory_space<vmem>>, vector<1x8x128xbf16>
    %67 = vector.shape_cast %66 : vector<1x8x128xbf16> to vector<8x128xbf16>
    %cst_45 = arith.constant dense<0.000000e+00> : vector<72x128xf32>
    %68 = tpu.matmul %65, %67, %cst_45 {dimension_numbers = #tpu.dot_dimension_numbers<[1], [0], [0], [1], [0, 0, 1, 1], [], []>} : vector<72x8xbf16>, vector<8x128xbf16>, vector<72x128xf32> -> vector<72x128xf32>
    %69 = arith.addf %63, %68 : vector<72x128xf32>
    %c0_46 = arith.constant 0 : index
    %c10 = arith.constant 10 : index
    %c0_47 = arith.constant 0 : index
    %70 = vector.load %arg1[%c0_46, %c10, %c0_47] : memref<1x360x8xbf16, #tpu.memory_space<vmem>>, vector<1x72x8xbf16>
    %71 = vector.shape_cast %70 : vector<1x72x8xbf16> to vector<72x8xbf16>
    %c8 = arith.constant 8 : index
    %c0_48 = arith.constant 0 : index
    %c0_49 = arith.constant 0 : index
    %72 = vector.load %arg2[%c8, %c0_48, %c0_49] : memref<9x8x128xbf16, #tpu.memory_space<vmem>>, vector<1x8x128xbf16>
    %73 = vector.shape_cast %72 : vector<1x8x128xbf16> to vector<8x128xbf16>
    %cst_50 = arith.constant dense<0.000000e+00> : vector<72x128xf32>
    %74 = tpu.matmul %71, %73, %cst_50 {dimension_numbers = #tpu.dot_dimension_numbers<[1], [0], [0], [1], [0, 0, 1, 1], [], []>} : vector<72x8xbf16>, vector<8x128xbf16>, vector<72x128xf32> -> vector<72x128xf32>
    %75 = arith.addf %69, %74 : vector<72x128xf32>
    %76 = arith.mulf %75, %20 : vector<72x128xf32>
    %cst_51 = arith.constant dense<0.000000e+00> : vector<128xf32>
    %77 = vector.multi_reduction <add>, %76, %cst_51 [0] : vector<72x128xf32> to vector<128xf32>
    %78 = vector.shape_cast %77 : vector<128xf32> to vector<1x128xf32>
    %79 = arith.addf %21, %78 : vector<1x128xf32>
    %80 = arith.mulf %76, %75 : vector<72x128xf32>
    %cst_52 = arith.constant dense<0.000000e+00> : vector<128xf32>
    %81 = vector.multi_reduction <add>, %80, %cst_52 [0] : vector<72x128xf32> to vector<128xf32>
    %82 = vector.shape_cast %81 : vector<128xf32> to vector<1x128xf32>
    %83 = arith.addf %22, %82 : vector<1x128xf32>
    %c0_53 = arith.constant 0 : index
    %c90_54 = arith.constant 90 : index
    %c0_55 = arith.constant 0 : index
    %84 = vector.load %arg1[%c0_53, %c90_54, %c0_55] : memref<1x360x8xbf16, #tpu.memory_space<vmem>>, vector<1x72x8xbf16>
    %85 = vector.shape_cast %84 : vector<1x72x8xbf16> to vector<72x8xbf16>
    %c0_56 = arith.constant 0 : index
    %c0_57 = arith.constant 0 : index
    %c0_58 = arith.constant 0 : index
    %86 = vector.load %arg2[%c0_56, %c0_57, %c0_58] : memref<9x8x128xbf16, #tpu.memory_space<vmem>>, vector<1x8x128xbf16>
    %87 = vector.shape_cast %86 : vector<1x8x128xbf16> to vector<8x128xbf16>
    %cst_59 = arith.constant dense<0.000000e+00> : vector<72x128xf32>
    %88 = tpu.matmul %85, %87, %cst_59 {dimension_numbers = #tpu.dot_dimension_numbers<[1], [0], [0], [1], [0, 0, 1, 1], [], []>} : vector<72x8xbf16>, vector<8x128xbf16>, vector<72x128xf32> -> vector<72x128xf32>
    %c0_60 = arith.constant 0 : index
    %c1_61 = arith.constant 1 : index
    %c0_62 = arith.constant 0 : index
    %89 = vector.load %arg1[%c0_60, %c1_61, %c0_62] : memref<1x360x8xbf16, #tpu.memory_space<vmem>>, vector<1x72x8xbf16>
    %90 = vector.shape_cast %89 : vector<1x72x8xbf16> to vector<72x8xbf16>
    %c1_63 = arith.constant 1 : index
    %c0_64 = arith.constant 0 : index
    %c0_65 = arith.constant 0 : index
    %91 = vector.load %arg2[%c1_63, %c0_64, %c0_65] : memref<9x8x128xbf16, #tpu.memory_space<vmem>>, vector<1x8x128xbf16>
    %92 = vector.shape_cast %91 : vector<1x8x128xbf16> to vector<8x128xbf16>
    %cst_66 = arith.constant dense<0.000000e+00> : vector<72x128xf32>
    %93 = tpu.matmul %90, %92, %cst_66 {dimension_numbers = #tpu.dot_dimension_numbers<[1], [0], [0], [1], [0, 0, 1, 1], [], []>} : vector<72x8xbf16>, vector<8x128xbf16>, vector<72x128xf32> -> vector<72x128xf32>
    %94 = arith.addf %88, %93 : vector<72x128xf32>
    %c0_67 = arith.constant 0 : index
    %c91 = arith.constant 91 : index
    %c0_68 = arith.constant 0 : index
    %95 = vector.load %arg1[%c0_67, %c91, %c0_68] : memref<1x360x8xbf16, #tpu.memory_space<vmem>>, vector<1x72x8xbf16>
    %96 = vector.shape_cast %95 : vector<1x72x8xbf16> to vector<72x8xbf16>
    %c2_69 = arith.constant 2 : index
    %c0_70 = arith.constant 0 : index
    %c0_71 = arith.constant 0 : index
    %97 = vector.load %arg2[%c2_69, %c0_70, %c0_71] : memref<9x8x128xbf16, #tpu.memory_space<vmem>>, vector<1x8x128xbf16>
    %98 = vector.shape_cast %97 : vector<1x8x128xbf16> to vector<8x128xbf16>
    %cst_72 = arith.constant dense<0.000000e+00> : vector<72x128xf32>
    %99 = tpu.matmul %96, %98, %cst_72 {dimension_numbers = #tpu.dot_dimension_numbers<[1], [0], [0], [1], [0, 0, 1, 1], [], []>} : vector<72x8xbf16>, vector<8x128xbf16>, vector<72x128xf32> -> vector<72x128xf32>
    %100 = arith.addf %94, %99 : vector<72x128xf32>
    %c0_73 = arith.constant 0 : index
    %c270_74 = arith.constant 270 : index
    %c0_75 = arith.constant 0 : index
    %101 = vector.load %arg1[%c0_73, %c270_74, %c0_75] : memref<1x360x8xbf16, #tpu.memory_space<vmem>>, vector<1x72x8xbf16>
    %102 = vector.shape_cast %101 : vector<1x72x8xbf16> to vector<72x8xbf16>
    %c3_76 = arith.constant 3 : index
    %c0_77 = arith.constant 0 : index
    %c0_78 = arith.constant 0 : index
    %103 = vector.load %arg2[%c3_76, %c0_77, %c0_78] : memref<9x8x128xbf16, #tpu.memory_space<vmem>>, vector<1x8x128xbf16>
    %104 = vector.shape_cast %103 : vector<1x8x128xbf16> to vector<8x128xbf16>
    %cst_79 = arith.constant dense<0.000000e+00> : vector<72x128xf32>
    %105 = tpu.matmul %102, %104, %cst_79 {dimension_numbers = #tpu.dot_dimension_numbers<[1], [0], [0], [1], [0, 0, 1, 1], [], []>} : vector<72x8xbf16>, vector<8x128xbf16>, vector<72x128xf32> -> vector<72x128xf32>
    %106 = arith.addf %100, %105 : vector<72x128xf32>
    %c0_80 = arith.constant 0 : index
    %c181_81 = arith.constant 181 : index
    %c0_82 = arith.constant 0 : index
    %107 = vector.load %arg1[%c0_80, %c181_81, %c0_82] : memref<1x360x8xbf16, #tpu.memory_space<vmem>>, vector<1x72x8xbf16>
    %108 = vector.shape_cast %107 : vector<1x72x8xbf16> to vector<72x8xbf16>
    %c4_83 = arith.constant 4 : index
    %c0_84 = arith.constant 0 : index
    %c0_85 = arith.constant 0 : index
    %109 = vector.load %arg2[%c4_83, %c0_84, %c0_85] : memref<9x8x128xbf16, #tpu.memory_space<vmem>>, vector<1x8x128xbf16>
    %110 = vector.shape_cast %109 : vector<1x8x128xbf16> to vector<8x128xbf16>
    %cst_86 = arith.constant dense<0.000000e+00> : vector<72x128xf32>
    %111 = tpu.matmul %108, %110, %cst_86 {dimension_numbers = #tpu.dot_dimension_numbers<[1], [0], [0], [1], [0, 0, 1, 1], [], []>} : vector<72x8xbf16>, vector<8x128xbf16>, vector<72x128xf32> -> vector<72x128xf32>
    %112 = arith.addf %106, %111 : vector<72x128xf32>
    %c0_87 = arith.constant 0 : index
    %c271 = arith.constant 271 : index
    %c0_88 = arith.constant 0 : index
    %113 = vector.load %arg1[%c0_87, %c271, %c0_88] : memref<1x360x8xbf16, #tpu.memory_space<vmem>>, vector<1x72x8xbf16>
    %114 = vector.shape_cast %113 : vector<1x72x8xbf16> to vector<72x8xbf16>
    %c5_89 = arith.constant 5 : index
    %c0_90 = arith.constant 0 : index
    %c0_91 = arith.constant 0 : index
    %115 = vector.load %arg2[%c5_89, %c0_90, %c0_91] : memref<9x8x128xbf16, #tpu.memory_space<vmem>>, vector<1x8x128xbf16>
    %116 = vector.shape_cast %115 : vector<1x8x128xbf16> to vector<8x128xbf16>
    %cst_92 = arith.constant dense<0.000000e+00> : vector<72x128xf32>
    %117 = tpu.matmul %114, %116, %cst_92 {dimension_numbers = #tpu.dot_dimension_numbers<[1], [0], [0], [1], [0, 0, 1, 1], [], []>} : vector<72x8xbf16>, vector<8x128xbf16>, vector<72x128xf32> -> vector<72x128xf32>
    %118 = arith.addf %112, %117 : vector<72x128xf32>
    %c0_93 = arith.constant 0 : index
    %c99_94 = arith.constant 99 : index
    %c0_95 = arith.constant 0 : index
    %119 = vector.load %arg1[%c0_93, %c99_94, %c0_95] : memref<1x360x8xbf16, #tpu.memory_space<vmem>>, vector<1x72x8xbf16>
    %120 = vector.shape_cast %119 : vector<1x72x8xbf16> to vector<72x8xbf16>
    %c6_96 = arith.constant 6 : index
    %c0_97 = arith.constant 0 : index
    %c0_98 = arith.constant 0 : index
    %121 = vector.load %arg2[%c6_96, %c0_97, %c0_98] : memref<9x8x128xbf16, #tpu.memory_space<vmem>>, vector<1x8x128xbf16>
    %122 = vector.shape_cast %121 : vector<1x8x128xbf16> to vector<8x128xbf16>
    %cst_99 = arith.constant dense<0.000000e+00> : vector<72x128xf32>
    %123 = tpu.matmul %120, %122, %cst_99 {dimension_numbers = #tpu.dot_dimension_numbers<[1], [0], [0], [1], [0, 0, 1, 1], [], []>} : vector<72x8xbf16>, vector<8x128xbf16>, vector<72x128xf32> -> vector<72x128xf32>
    %124 = arith.addf %118, %123 : vector<72x128xf32>
    %c0_100 = arith.constant 0 : index
    %c10_101 = arith.constant 10 : index
    %c0_102 = arith.constant 0 : index
    %125 = vector.load %arg1[%c0_100, %c10_101, %c0_102] : memref<1x360x8xbf16, #tpu.memory_space<vmem>>, vector<1x72x8xbf16>
    %126 = vector.shape_cast %125 : vector<1x72x8xbf16> to vector<72x8xbf16>
    %c7_103 = arith.constant 7 : index
    %c0_104 = arith.constant 0 : index
    %c0_105 = arith.constant 0 : index
    %127 = vector.load %arg2[%c7_103, %c0_104, %c0_105] : memref<9x8x128xbf16, #tpu.memory_space<vmem>>, vector<1x8x128xbf16>
    %128 = vector.shape_cast %127 : vector<1x8x128xbf16> to vector<8x128xbf16>
    %cst_106 = arith.constant dense<0.000000e+00> : vector<72x128xf32>
    %129 = tpu.matmul %126, %128, %cst_106 {dimension_numbers = #tpu.dot_dimension_numbers<[1], [0], [0], [1], [0, 0, 1, 1], [], []>} : vector<72x8xbf16>, vector<8x128xbf16>, vector<72x128xf32> -> vector<72x128xf32>
    %130 = arith.addf %124, %129 : vector<72x128xf32>
    %c0_107 = arith.constant 0 : index
    %c100 = arith.constant 100 : index
    %c0_108 = arith.constant 0 : index
    %131 = vector.load %arg1[%c0_107, %c100, %c0_108] : memref<1x360x8xbf16, #tpu.memory_space<vmem>>, vector<1x72x8xbf16>
    %132 = vector.shape_cast %131 : vector<1x72x8xbf16> to vector<72x8xbf16>
    %c8_109 = arith.constant 8 : index
    %c0_110 = arith.constant 0 : index
    %c0_111 = arith.constant 0 : index
    %133 = vector.load %arg2[%c8_109, %c0_110, %c0_111] : memref<9x8x128xbf16, #tpu.memory_space<vmem>>, vector<1x8x128xbf16>
    %134 = vector.shape_cast %133 : vector<1x8x128xbf16> to vector<8x128xbf16>
    %cst_112 = arith.constant dense<0.000000e+00> : vector<72x128xf32>
    %135 = tpu.matmul %132, %134, %cst_112 {dimension_numbers = #tpu.dot_dimension_numbers<[1], [0], [0], [1], [0, 0, 1, 1], [], []>} : vector<72x8xbf16>, vector<8x128xbf16>, vector<72x128xf32> -> vector<72x128xf32>
    %136 = arith.addf %130, %135 : vector<72x128xf32>
    %137 = arith.mulf %136, %20 : vector<72x128xf32>
    %cst_113 = arith.constant dense<0.000000e+00> : vector<128xf32>
    %138 = vector.multi_reduction <add>, %137, %cst_113 [0] : vector<72x128xf32> to vector<128xf32>
    %139 = vector.shape_cast %138 : vector<128xf32> to vector<1x128xf32>
    %140 = arith.addf %79, %139 : vector<1x128xf32>
    %141 = arith.mulf %137, %136 : vector<72x128xf32>
    %cst_114 = arith.constant dense<0.000000e+00> : vector<128xf32>
    %142 = vector.multi_reduction <add>, %141, %cst_114 [0] : vector<72x128xf32> to vector<128xf32>
    %143 = vector.shape_cast %142 : vector<128xf32> to vector<1x128xf32>
    %144 = arith.addf %83, %143 : vector<1x128xf32>
    %c0_115 = arith.constant 0 : index
    %c180_116 = arith.constant 180 : index
    %c0_117 = arith.constant 0 : index
    %145 = vector.load %arg1[%c0_115, %c180_116, %c0_117] : memref<1x360x8xbf16, #tpu.memory_space<vmem>>, vector<1x72x8xbf16>
    %146 = vector.shape_cast %145 : vector<1x72x8xbf16> to vector<72x8xbf16>
    %c0_118 = arith.constant 0 : index
    %c0_119 = arith.constant 0 : index
    %c0_120 = arith.constant 0 : index
    %147 = vector.load %arg2[%c0_118, %c0_119, %c0_120] : memref<9x8x128xbf16, #tpu.memory_space<vmem>>, vector<1x8x128xbf16>
    %148 = vector.shape_cast %147 : vector<1x8x128xbf16> to vector<8x128xbf16>
    %cst_121 = arith.constant dense<0.000000e+00> : vector<72x128xf32>
    %149 = tpu.matmul %146, %148, %cst_121 {dimension_numbers = #tpu.dot_dimension_numbers<[1], [0], [0], [1], [0, 0, 1, 1], [], []>} : vector<72x8xbf16>, vector<8x128xbf16>, vector<72x128xf32> -> vector<72x128xf32>
    %c0_122 = arith.constant 0 : index
    %c270_123 = arith.constant 270 : index
    %c0_124 = arith.constant 0 : index
    %150 = vector.load %arg1[%c0_122, %c270_123, %c0_124] : memref<1x360x8xbf16, #tpu.memory_space<vmem>>, vector<1x72x8xbf16>
    %151 = vector.shape_cast %150 : vector<1x72x8xbf16> to vector<72x8xbf16>
    %c1_125 = arith.constant 1 : index
    %c0_126 = arith.constant 0 : index
    %c0_127 = arith.constant 0 : index
    %152 = vector.load %arg2[%c1_125, %c0_126, %c0_127] : memref<9x8x128xbf16, #tpu.memory_space<vmem>>, vector<1x8x128xbf16>
    %153 = vector.shape_cast %152 : vector<1x8x128xbf16> to vector<8x128xbf16>
    %cst_128 = arith.constant dense<0.000000e+00> : vector<72x128xf32>
    %154 = tpu.matmul %151, %153, %cst_128 {dimension_numbers = #tpu.dot_dimension_numbers<[1], [0], [0], [1], [0, 0, 1, 1], [], []>} : vector<72x8xbf16>, vector<8x128xbf16>, vector<72x128xf32> -> vector<72x128xf32>
    %155 = arith.addf %149, %154 : vector<72x128xf32>
    %c0_129 = arith.constant 0 : index
    %c181_130 = arith.constant 181 : index
    %c0_131 = arith.constant 0 : index
    %156 = vector.load %arg1[%c0_129, %c181_130, %c0_131] : memref<1x360x8xbf16, #tpu.memory_space<vmem>>, vector<1x72x8xbf16>
    %157 = vector.shape_cast %156 : vector<1x72x8xbf16> to vector<72x8xbf16>
    %c2_132 = arith.constant 2 : index
    %c0_133 = arith.constant 0 : index
    %c0_134 = arith.constant 0 : index
    %158 = vector.load %arg2[%c2_132, %c0_133, %c0_134] : memref<9x8x128xbf16, #tpu.memory_space<vmem>>, vector<1x8x128xbf16>
    %159 = vector.shape_cast %158 : vector<1x8x128xbf16> to vector<8x128xbf16>
    %cst_135 = arith.constant dense<0.000000e+00> : vector<72x128xf32>
    %160 = tpu.matmul %157, %159, %cst_135 {dimension_numbers = #tpu.dot_dimension_numbers<[1], [0], [0], [1], [0, 0, 1, 1], [], []>} : vector<72x8xbf16>, vector<8x128xbf16>, vector<72x128xf32> -> vector<72x128xf32>
    %161 = arith.addf %155, %160 : vector<72x128xf32>
    %c0_136 = arith.constant 0 : index
    %c9_137 = arith.constant 9 : index
    %c0_138 = arith.constant 0 : index
    %162 = vector.load %arg1[%c0_136, %c9_137, %c0_138] : memref<1x360x8xbf16, #tpu.memory_space<vmem>>, vector<1x72x8xbf16>
    %163 = vector.shape_cast %162 : vector<1x72x8xbf16> to vector<72x8xbf16>
    %c3_139 = arith.constant 3 : index
    %c0_140 = arith.constant 0 : index
    %c0_141 = arith.constant 0 : index
    %164 = vector.load %arg2[%c3_139, %c0_140, %c0_141] : memref<9x8x128xbf16, #tpu.memory_space<vmem>>, vector<1x8x128xbf16>
    %165 = vector.shape_cast %164 : vector<1x8x128xbf16> to vector<8x128xbf16>
    %cst_142 = arith.constant dense<0.000000e+00> : vector<72x128xf32>
    %166 = tpu.matmul %163, %165, %cst_142 {dimension_numbers = #tpu.dot_dimension_numbers<[1], [0], [0], [1], [0, 0, 1, 1], [], []>} : vector<72x8xbf16>, vector<8x128xbf16>, vector<72x128xf32> -> vector<72x128xf32>
    %167 = arith.addf %161, %166 : vector<72x128xf32>
    %c0_143 = arith.constant 0 : index
    %c99_144 = arith.constant 99 : index
    %c0_145 = arith.constant 0 : index
    %168 = vector.load %arg1[%c0_143, %c99_144, %c0_145] : memref<1x360x8xbf16, #tpu.memory_space<vmem>>, vector<1x72x8xbf16>
    %169 = vector.shape_cast %168 : vector<1x72x8xbf16> to vector<72x8xbf16>
    %c4_146 = arith.constant 4 : index
    %c0_147 = arith.constant 0 : index
    %c0_148 = arith.constant 0 : index
    %170 = vector.load %arg2[%c4_146, %c0_147, %c0_148] : memref<9x8x128xbf16, #tpu.memory_space<vmem>>, vector<1x8x128xbf16>
    %171 = vector.shape_cast %170 : vector<1x8x128xbf16> to vector<8x128xbf16>
    %cst_149 = arith.constant dense<0.000000e+00> : vector<72x128xf32>
    %172 = tpu.matmul %169, %171, %cst_149 {dimension_numbers = #tpu.dot_dimension_numbers<[1], [0], [0], [1], [0, 0, 1, 1], [], []>} : vector<72x8xbf16>, vector<8x128xbf16>, vector<72x128xf32> -> vector<72x128xf32>
    %173 = arith.addf %167, %172 : vector<72x128xf32>
    %c0_150 = arith.constant 0 : index
    %c10_151 = arith.constant 10 : index
    %c0_152 = arith.constant 0 : index
    %174 = vector.load %arg1[%c0_150, %c10_151, %c0_152] : memref<1x360x8xbf16, #tpu.memory_space<vmem>>, vector<1x72x8xbf16>
    %175 = vector.shape_cast %174 : vector<1x72x8xbf16> to vector<72x8xbf16>
    %c5_153 = arith.constant 5 : index
    %c0_154 = arith.constant 0 : index
    %c0_155 = arith.constant 0 : index
    %176 = vector.load %arg2[%c5_153, %c0_154, %c0_155] : memref<9x8x128xbf16, #tpu.memory_space<vmem>>, vector<1x8x128xbf16>
    %177 = vector.shape_cast %176 : vector<1x8x128xbf16> to vector<8x128xbf16>
    %cst_156 = arith.constant dense<0.000000e+00> : vector<72x128xf32>
    %178 = tpu.matmul %175, %177, %cst_156 {dimension_numbers = #tpu.dot_dimension_numbers<[1], [0], [0], [1], [0, 0, 1, 1], [], []>} : vector<72x8xbf16>, vector<8x128xbf16>, vector<72x128xf32> -> vector<72x128xf32>
    %179 = arith.addf %173, %178 : vector<72x128xf32>
    %c0_157 = arith.constant 0 : index
    %c189 = arith.constant 189 : index
    %c0_158 = arith.constant 0 : index
    %180 = vector.load %arg1[%c0_157, %c189, %c0_158] : memref<1x360x8xbf16, #tpu.memory_space<vmem>>, vector<1x72x8xbf16>
    %181 = vector.shape_cast %180 : vector<1x72x8xbf16> to vector<72x8xbf16>
    %c6_159 = arith.constant 6 : index
    %c0_160 = arith.constant 0 : index
    %c0_161 = arith.constant 0 : index
    %182 = vector.load %arg2[%c6_159, %c0_160, %c0_161] : memref<9x8x128xbf16, #tpu.memory_space<vmem>>, vector<1x8x128xbf16>
    %183 = vector.shape_cast %182 : vector<1x8x128xbf16> to vector<8x128xbf16>
    %cst_162 = arith.constant dense<0.000000e+00> : vector<72x128xf32>
    %184 = tpu.matmul %181, %183, %cst_162 {dimension_numbers = #tpu.dot_dimension_numbers<[1], [0], [0], [1], [0, 0, 1, 1], [], []>} : vector<72x8xbf16>, vector<8x128xbf16>, vector<72x128xf32> -> vector<72x128xf32>
    %185 = arith.addf %179, %184 : vector<72x128xf32>
    %c0_163 = arith.constant 0 : index
    %c279 = arith.constant 279 : index
    %c0_164 = arith.constant 0 : index
    %186 = vector.load %arg1[%c0_163, %c279, %c0_164] : memref<1x360x8xbf16, #tpu.memory_space<vmem>>, vector<1x72x8xbf16>
    %187 = vector.shape_cast %186 : vector<1x72x8xbf16> to vector<72x8xbf16>
    %c7_165 = arith.constant 7 : index
    %c0_166 = arith.constant 0 : index
    %c0_167 = arith.constant 0 : index
    %188 = vector.load %arg2[%c7_165, %c0_166, %c0_167] : memref<9x8x128xbf16, #tpu.memory_space<vmem>>, vector<1x8x128xbf16>
    %189 = vector.shape_cast %188 : vector<1x8x128xbf16> to vector<8x128xbf16>
    %cst_168 = arith.constant dense<0.000000e+00> : vector<72x128xf32>
    %190 = tpu.matmul %187, %189, %cst_168 {dimension_numbers = #tpu.dot_dimension_numbers<[1], [0], [0], [1], [0, 0, 1, 1], [], []>} : vector<72x8xbf16>, vector<8x128xbf16>, vector<72x128xf32> -> vector<72x128xf32>
    %191 = arith.addf %185, %190 : vector<72x128xf32>
    %c0_169 = arith.constant 0 : index
    %c190 = arith.constant 190 : index
    %c0_170 = arith.constant 0 : index
    %192 = vector.load %arg1[%c0_169, %c190, %c0_170] : memref<1x360x8xbf16, #tpu.memory_space<vmem>>, vector<1x72x8xbf16>
    %193 = vector.shape_cast %192 : vector<1x72x8xbf16> to vector<72x8xbf16>
    %c8_171 = arith.constant 8 : index
    %c0_172 = arith.constant 0 : index
    %c0_173 = arith.constant 0 : index
    %194 = vector.load %arg2[%c8_171, %c0_172, %c0_173] : memref<9x8x128xbf16, #tpu.memory_space<vmem>>, vector<1x8x128xbf16>
    %195 = vector.shape_cast %194 : vector<1x8x128xbf16> to vector<8x128xbf16>
    %cst_174 = arith.constant dense<0.000000e+00> : vector<72x128xf32>
    %196 = tpu.matmul %193, %195, %cst_174 {dimension_numbers = #tpu.dot_dimension_numbers<[1], [0], [0], [1], [0, 0, 1, 1], [], []>} : vector<72x8xbf16>, vector<8x128xbf16>, vector<72x128xf32> -> vector<72x128xf32>
    %197 = arith.addf %191, %196 : vector<72x128xf32>
    %198 = arith.mulf %197, %20 : vector<72x128xf32>
    %cst_175 = arith.constant dense<0.000000e+00> : vector<128xf32>
    %199 = vector.multi_reduction <add>, %198, %cst_175 [0] : vector<72x128xf32> to vector<128xf32>
    %200 = vector.shape_cast %199 : vector<128xf32> to vector<1x128xf32>
    %201 = arith.addf %140, %200 : vector<1x128xf32>
    %202 = arith.mulf %198, %197 : vector<72x128xf32>
    %cst_176 = arith.constant dense<0.000000e+00> : vector<128xf32>
    %203 = vector.multi_reduction <add>, %202, %cst_176 [0] : vector<72x128xf32> to vector<128xf32>
    %204 = vector.shape_cast %203 : vector<128xf32> to vector<1x128xf32>
    %205 = arith.addf %144, %204 : vector<1x128xf32>
    %c0_177 = arith.constant 0 : index
    %c270_178 = arith.constant 270 : index
    %c0_179 = arith.constant 0 : index
    %206 = vector.load %arg1[%c0_177, %c270_178, %c0_179] : memref<1x360x8xbf16, #tpu.memory_space<vmem>>, vector<1x72x8xbf16>
    %207 = vector.shape_cast %206 : vector<1x72x8xbf16> to vector<72x8xbf16>
    %c0_180 = arith.constant 0 : index
    %c0_181 = arith.constant 0 : index
    %c0_182 = arith.constant 0 : index
    %208 = vector.load %arg2[%c0_180, %c0_181, %c0_182] : memref<9x8x128xbf16, #tpu.memory_space<vmem>>, vector<1x8x128xbf16>
    %209 = vector.shape_cast %208 : vector<1x8x128xbf16> to vector<8x128xbf16>
    %cst_183 = arith.constant dense<0.000000e+00> : vector<72x128xf32>
    %210 = tpu.matmul %207, %209, %cst_183 {dimension_numbers = #tpu.dot_dimension_numbers<[1], [0], [0], [1], [0, 0, 1, 1], [], []>} : vector<72x8xbf16>, vector<8x128xbf16>, vector<72x128xf32> -> vector<72x128xf32>
    %c0_184 = arith.constant 0 : index
    %c181_185 = arith.constant 181 : index
    %c0_186 = arith.constant 0 : index
    %211 = vector.load %arg1[%c0_184, %c181_185, %c0_186] : memref<1x360x8xbf16, #tpu.memory_space<vmem>>, vector<1x72x8xbf16>
    %212 = vector.shape_cast %211 : vector<1x72x8xbf16> to vector<72x8xbf16>
    %c1_187 = arith.constant 1 : index
    %c0_188 = arith.constant 0 : index
    %c0_189 = arith.constant 0 : index
    %213 = vector.load %arg2[%c1_187, %c0_188, %c0_189] : memref<9x8x128xbf16, #tpu.memory_space<vmem>>, vector<1x8x128xbf16>
    %214 = vector.shape_cast %213 : vector<1x8x128xbf16> to vector<8x128xbf16>
    %cst_190 = arith.constant dense<0.000000e+00> : vector<72x128xf32>
    %215 = tpu.matmul %212, %214, %cst_190 {dimension_numbers = #tpu.dot_dimension_numbers<[1], [0], [0], [1], [0, 0, 1, 1], [], []>} : vector<72x8xbf16>, vector<8x128xbf16>, vector<72x128xf32> -> vector<72x128xf32>
    %216 = arith.addf %210, %215 : vector<72x128xf32>
    %c0_191 = arith.constant 0 : index
    %c271_192 = arith.constant 271 : index
    %c0_193 = arith.constant 0 : index
    %217 = vector.load %arg1[%c0_191, %c271_192, %c0_193] : memref<1x360x8xbf16, #tpu.memory_space<vmem>>, vector<1x72x8xbf16>
    %218 = vector.shape_cast %217 : vector<1x72x8xbf16> to vector<72x8xbf16>
    %c2_194 = arith.constant 2 : index
    %c0_195 = arith.constant 0 : index
    %c0_196 = arith.constant 0 : index
    %219 = vector.load %arg2[%c2_194, %c0_195, %c0_196] : memref<9x8x128xbf16, #tpu.memory_space<vmem>>, vector<1x8x128xbf16>
    %220 = vector.shape_cast %219 : vector<1x8x128xbf16> to vector<8x128xbf16>
    %cst_197 = arith.constant dense<0.000000e+00> : vector<72x128xf32>
    %221 = tpu.matmul %218, %220, %cst_197 {dimension_numbers = #tpu.dot_dimension_numbers<[1], [0], [0], [1], [0, 0, 1, 1], [], []>} : vector<72x8xbf16>, vector<8x128xbf16>, vector<72x128xf32> -> vector<72x128xf32>
    %222 = arith.addf %216, %221 : vector<72x128xf32>
    %c0_198 = arith.constant 0 : index
    %c99_199 = arith.constant 99 : index
    %c0_200 = arith.constant 0 : index
    %223 = vector.load %arg1[%c0_198, %c99_199, %c0_200] : memref<1x360x8xbf16, #tpu.memory_space<vmem>>, vector<1x72x8xbf16>
    %224 = vector.shape_cast %223 : vector<1x72x8xbf16> to vector<72x8xbf16>
    %c3_201 = arith.constant 3 : index
    %c0_202 = arith.constant 0 : index
    %c0_203 = arith.constant 0 : index
    %225 = vector.load %arg2[%c3_201, %c0_202, %c0_203] : memref<9x8x128xbf16, #tpu.memory_space<vmem>>, vector<1x8x128xbf16>
    %226 = vector.shape_cast %225 : vector<1x8x128xbf16> to vector<8x128xbf16>
    %cst_204 = arith.constant dense<0.000000e+00> : vector<72x128xf32>
    %227 = tpu.matmul %224, %226, %cst_204 {dimension_numbers = #tpu.dot_dimension_numbers<[1], [0], [0], [1], [0, 0, 1, 1], [], []>} : vector<72x8xbf16>, vector<8x128xbf16>, vector<72x128xf32> -> vector<72x128xf32>
    %228 = arith.addf %222, %227 : vector<72x128xf32>
    %c0_205 = arith.constant 0 : index
    %c10_206 = arith.constant 10 : index
    %c0_207 = arith.constant 0 : index
    %229 = vector.load %arg1[%c0_205, %c10_206, %c0_207] : memref<1x360x8xbf16, #tpu.memory_space<vmem>>, vector<1x72x8xbf16>
    %230 = vector.shape_cast %229 : vector<1x72x8xbf16> to vector<72x8xbf16>
    %c4_208 = arith.constant 4 : index
    %c0_209 = arith.constant 0 : index
    %c0_210 = arith.constant 0 : index
    %231 = vector.load %arg2[%c4_208, %c0_209, %c0_210] : memref<9x8x128xbf16, #tpu.memory_space<vmem>>, vector<1x8x128xbf16>
    %232 = vector.shape_cast %231 : vector<1x8x128xbf16> to vector<8x128xbf16>
    %cst_211 = arith.constant dense<0.000000e+00> : vector<72x128xf32>
    %233 = tpu.matmul %230, %232, %cst_211 {dimension_numbers = #tpu.dot_dimension_numbers<[1], [0], [0], [1], [0, 0, 1, 1], [], []>} : vector<72x8xbf16>, vector<8x128xbf16>, vector<72x128xf32> -> vector<72x128xf32>
    %234 = arith.addf %228, %233 : vector<72x128xf32>
    %c0_212 = arith.constant 0 : index
    %c100_213 = arith.constant 100 : index
    %c0_214 = arith.constant 0 : index
    %235 = vector.load %arg1[%c0_212, %c100_213, %c0_214] : memref<1x360x8xbf16, #tpu.memory_space<vmem>>, vector<1x72x8xbf16>
    %236 = vector.shape_cast %235 : vector<1x72x8xbf16> to vector<72x8xbf16>
    %c5_215 = arith.constant 5 : index
    %c0_216 = arith.constant 0 : index
    %c0_217 = arith.constant 0 : index
    %237 = vector.load %arg2[%c5_215, %c0_216, %c0_217] : memref<9x8x128xbf16, #tpu.memory_space<vmem>>, vector<1x8x128xbf16>
    %238 = vector.shape_cast %237 : vector<1x8x128xbf16> to vector<8x128xbf16>
    %cst_218 = arith.constant dense<0.000000e+00> : vector<72x128xf32>
    %239 = tpu.matmul %236, %238, %cst_218 {dimension_numbers = #tpu.dot_dimension_numbers<[1], [0], [0], [1], [0, 0, 1, 1], [], []>} : vector<72x8xbf16>, vector<8x128xbf16>, vector<72x128xf32> -> vector<72x128xf32>
    %240 = arith.addf %234, %239 : vector<72x128xf32>
    %c0_219 = arith.constant 0 : index
    %c279_220 = arith.constant 279 : index
    %c0_221 = arith.constant 0 : index
    %241 = vector.load %arg1[%c0_219, %c279_220, %c0_221] : memref<1x360x8xbf16, #tpu.memory_space<vmem>>, vector<1x72x8xbf16>
    %242 = vector.shape_cast %241 : vector<1x72x8xbf16> to vector<72x8xbf16>
    %c6_222 = arith.constant 6 : index
    %c0_223 = arith.constant 0 : index
    %c0_224 = arith.constant 0 : index
    %243 = vector.load %arg2[%c6_222, %c0_223, %c0_224] : memref<9x8x128xbf16, #tpu.memory_space<vmem>>, vector<1x8x128xbf16>
    %244 = vector.shape_cast %243 : vector<1x8x128xbf16> to vector<8x128xbf16>
    %cst_225 = arith.constant dense<0.000000e+00> : vector<72x128xf32>
    %245 = tpu.matmul %242, %244, %cst_225 {dimension_numbers = #tpu.dot_dimension_numbers<[1], [0], [0], [1], [0, 0, 1, 1], [], []>} : vector<72x8xbf16>, vector<8x128xbf16>, vector<72x128xf32> -> vector<72x128xf32>
    %246 = arith.addf %240, %245 : vector<72x128xf32>
    %c0_226 = arith.constant 0 : index
    %c190_227 = arith.constant 190 : index
    %c0_228 = arith.constant 0 : index
    %247 = vector.load %arg1[%c0_226, %c190_227, %c0_228] : memref<1x360x8xbf16, #tpu.memory_space<vmem>>, vector<1x72x8xbf16>
    %248 = vector.shape_cast %247 : vector<1x72x8xbf16> to vector<72x8xbf16>
    %c7_229 = arith.constant 7 : index
    %c0_230 = arith.constant 0 : index
    %c0_231 = arith.constant 0 : index
    %249 = vector.load %arg2[%c7_229, %c0_230, %c0_231] : memref<9x8x128xbf16, #tpu.memory_space<vmem>>, vector<1x8x128xbf16>
    %250 = vector.shape_cast %249 : vector<1x8x128xbf16> to vector<8x128xbf16>
    %cst_232 = arith.constant dense<0.000000e+00> : vector<72x128xf32>
    %251 = tpu.matmul %248, %250, %cst_232 {dimension_numbers = #tpu.dot_dimension_numbers<[1], [0], [0], [1], [0, 0, 1, 1], [], []>} : vector<72x8xbf16>, vector<8x128xbf16>, vector<72x128xf32> -> vector<72x128xf32>
    %252 = arith.addf %246, %251 : vector<72x128xf32>
    %c0_233 = arith.constant 0 : index
    %c280 = arith.constant 280 : index
    %c0_234 = arith.constant 0 : index
    %253 = vector.load %arg1[%c0_233, %c280, %c0_234] : memref<1x360x8xbf16, #tpu.memory_space<vmem>>, vector<1x72x8xbf16>
    %254 = vector.shape_cast %253 : vector<1x72x8xbf16> to vector<72x8xbf16>
    %c8_235 = arith.constant 8 : index
    %c0_236 = arith.constant 0 : index
    %c0_237 = arith.constant 0 : index
    %255 = vector.load %arg2[%c8_235, %c0_236, %c0_237] : memref<9x8x128xbf16, #tpu.memory_space<vmem>>, vector<1x8x128xbf16>
    %256 = vector.shape_cast %255 : vector<1x8x128xbf16> to vector<8x128xbf16>
    %cst_238 = arith.constant dense<0.000000e+00> : vector<72x128xf32>
    %257 = tpu.matmul %254, %256, %cst_238 {dimension_numbers = #tpu.dot_dimension_numbers<[1], [0], [0], [1], [0, 0, 1, 1], [], []>} : vector<72x8xbf16>, vector<8x128xbf16>, vector<72x128xf32> -> vector<72x128xf32>
    %258 = arith.addf %252, %257 : vector<72x128xf32>
    %259 = arith.mulf %258, %20 : vector<72x128xf32>
    %cst_239 = arith.constant dense<0.000000e+00> : vector<128xf32>
    %260 = vector.multi_reduction <add>, %259, %cst_239 [0] : vector<72x128xf32> to vector<128xf32>
    %261 = vector.shape_cast %260 : vector<128xf32> to vector<1x128xf32>
    %262 = arith.addf %201, %261 : vector<1x128xf32>
    %263 = arith.mulf %259, %258 : vector<72x128xf32>
    %cst_240 = arith.constant dense<0.000000e+00> : vector<128xf32>
    %264 = vector.multi_reduction <add>, %263, %cst_240 [0] : vector<72x128xf32> to vector<128xf32>
    %265 = vector.shape_cast %264 : vector<128xf32> to vector<1x128xf32>
    %266 = arith.addf %205, %265 : vector<1x128xf32>
    %267 = vector.shape_cast %262 : vector<1x128xf32> to vector<1x128xf32>
    %268 = vector.broadcast %267 : vector<1x128xf32> to vector<8x128xf32>
    %c0_241 = arith.constant 0 : index
    %c0_242 = arith.constant 0 : index
    %269 = vector.load %arg3[%c0_241, %c0_242] : memref<8x128xf32, #tpu.memory_space<vmem>>, vector<8x128xf32>
    tpu.vector_store %arg3[%c0_241, %c0_242], %268 {strides = array<i32>} : memref<8x128xf32, #tpu.memory_space<vmem>>, vector<8x128xf32>,
    %270 = vector.shape_cast %266 : vector<1x128xf32> to vector<1x128xf32>
    %271 = vector.broadcast %270 : vector<1x128xf32> to vector<8x128xf32>
    %c0_243 = arith.constant 0 : index
    %c0_244 = arith.constant 0 : index
    %272 = vector.load %arg4[%c0_243, %c0_244] : memref<8x128xf32, #tpu.memory_space<vmem>>, vector<8x128xf32>
    tpu.vector_store %arg4[%c0_243, %c0_244], %271 {strides = array<i32>} : memref<8x128xf32, #tpu.memory_space<vmem>>, vector<8x128xf32>,
    return
  }
  func.func @transform_0(%arg0: i32) -> (i32, i32, i32) {
    %c0_i32 = arith.constant 0 : i32
    %c0_i32_0 = arith.constant 0 : i32
    %c0_i32_1 = arith.constant 0 : i32
    return %arg0, %c0_i32, %c0_i32_0 : i32, i32, i32
  }
  func.func @transform_1(%arg0: i32) -> (i32, i32, i32) {
    %c0_i32 = arith.constant 0 : i32
    %c0_i32_0 = arith.constant 0 : i32
    %c0_i32_1 = arith.constant 0 : i32
    %c0_i32_2 = arith.constant 0 : i32
    return %c0_i32, %c0_i32_0, %c0_i32_1 : i32, i32, i32
  }
  func.func @transform_2(%arg0: i32) -> (i32, i32) {
    %c0_i32 = arith.constant 0 : i32
    %c0_i32_0 = arith.constant 0 : i32
    return %arg0, %c0_i32 : i32, i32
  }
  func.func @transform_3(%arg0: i32) -> (i32, i32) {
    %c0_i32 = arith.constant 0 : i32
    %c0_i32_0 = arith.constant 0 : i32
    return %arg0, %c0_i32 : i32, i32
  }
}

module attributes {stable_mosaic.version = 11 : i64} {
  func.func @_bn_relu_pool_kernel(%arg0: i32, %arg1: memref<1x128xf32, #tpu.memory_space<vmem>>, %arg2: memref<1x128xf32, #tpu.memory_space<vmem>>, %arg3: memref<1x360x8xbf16, #tpu.memory_space<vmem>>, %arg4: memref<9x8x128xbf16, #tpu.memory_space<vmem>>, %arg5: memref<1x72x128xbf16, #tpu.memory_space<vmem>>) attributes {dimension_semantics = [#tpu.dimension_semantics<parallel>], iteration_bounds = array<i64: 2>, scalar_prefetch = 0 : i64, scratch_operands = 0 : i64, tpu.core_type = #tpu.core_type<tc>, window_params = [{pipeline_mode = #tpu.pipeline_mode<synchronous>, transform_indices = @transform_0, window_bounds = array<i64: 1, 128>}, {pipeline_mode = #tpu.pipeline_mode<synchronous>, transform_indices = @transform_1, window_bounds = array<i64: 1, 128>}, {transform_indices = @transform_2, window_bounds = array<i64: 1, 360, 8>}, {pipeline_mode = #tpu.pipeline_mode<synchronous>, transform_indices = @transform_3, window_bounds = array<i64: 9, 8, 128>}, {transform_indices = @transform_4, window_bounds = array<i64: 1, 72, 128>}]} {
    %c0 = arith.constant 0 : index
    %c0_0 = arith.constant 0 : index
    %0 = vector.load %arg1[%c0, %c0_0] : memref<1x128xf32, #tpu.memory_space<vmem>>, vector<1x128xf32>
    %1 = vector.shape_cast %0 : vector<1x128xf32> to vector<1x128xf32>
    %2 = vector.broadcast %1 : vector<1x128xf32> to vector<72x128xf32>
    %c0_1 = arith.constant 0 : index
    %c0_2 = arith.constant 0 : index
    %3 = vector.load %arg2[%c0_1, %c0_2] : memref<1x128xf32, #tpu.memory_space<vmem>>, vector<1x128xf32>
    %4 = vector.shape_cast %3 : vector<1x128xf32> to vector<1x128xf32>
    %5 = vector.broadcast %4 : vector<1x128xf32> to vector<72x128xf32>
    %c0_3 = arith.constant 0 : index
    %c0_4 = arith.constant 0 : index
    %c0_5 = arith.constant 0 : index
    %6 = vector.load %arg3[%c0_3, %c0_4, %c0_5] : memref<1x360x8xbf16, #tpu.memory_space<vmem>>, vector<1x72x8xbf16>
    %7 = vector.shape_cast %6 : vector<1x72x8xbf16> to vector<72x8xbf16>
    %c0_6 = arith.constant 0 : index
    %c0_7 = arith.constant 0 : index
    %c0_8 = arith.constant 0 : index
    %8 = vector.load %arg4[%c0_6, %c0_7, %c0_8] : memref<9x8x128xbf16, #tpu.memory_space<vmem>>, vector<1x8x128xbf16>
    %9 = vector.shape_cast %8 : vector<1x8x128xbf16> to vector<8x128xbf16>
    %cst = arith.constant dense<0.000000e+00> : vector<72x128xf32>
    %10 = tpu.matmul %7, %9, %cst {dimension_numbers = #tpu.dot_dimension_numbers<[1], [0], [0], [1], [0, 0, 1, 1], [], []>} : vector<72x8xbf16>, vector<8x128xbf16>, vector<72x128xf32> -> vector<72x128xf32>
    %c0_9 = arith.constant 0 : index
    %c90 = arith.constant 90 : index
    %c0_10 = arith.constant 0 : index
    %11 = vector.load %arg3[%c0_9, %c90, %c0_10] : memref<1x360x8xbf16, #tpu.memory_space<vmem>>, vector<1x72x8xbf16>
    %12 = vector.shape_cast %11 : vector<1x72x8xbf16> to vector<72x8xbf16>
    %c1 = arith.constant 1 : index
    %c0_11 = arith.constant 0 : index
    %c0_12 = arith.constant 0 : index
    %13 = vector.load %arg4[%c1, %c0_11, %c0_12] : memref<9x8x128xbf16, #tpu.memory_space<vmem>>, vector<1x8x128xbf16>
    %14 = vector.shape_cast %13 : vector<1x8x128xbf16> to vector<8x128xbf16>
    %cst_13 = arith.constant dense<0.000000e+00> : vector<72x128xf32>
    %15 = tpu.matmul %12, %14, %cst_13 {dimension_numbers = #tpu.dot_dimension_numbers<[1], [0], [0], [1], [0, 0, 1, 1], [], []>} : vector<72x8xbf16>, vector<8x128xbf16>, vector<72x128xf32> -> vector<72x128xf32>
    %16 = arith.addf %10, %15 : vector<72x128xf32>
    %c0_14 = arith.constant 0 : index
    %c1_15 = arith.constant 1 : index
    %c0_16 = arith.constant 0 : index
    %17 = vector.load %arg3[%c0_14, %c1_15, %c0_16] : memref<1x360x8xbf16, #tpu.memory_space<vmem>>, vector<1x72x8xbf16>
    %18 = vector.shape_cast %17 : vector<1x72x8xbf16> to vector<72x8xbf16>
    %c2 = arith.constant 2 : index
    %c0_17 = arith.constant 0 : index
    %c0_18 = arith.constant 0 : index
    %19 = vector.load %arg4[%c2, %c0_17, %c0_18] : memref<9x8x128xbf16, #tpu.memory_space<vmem>>, vector<1x8x128xbf16>
    %20 = vector.shape_cast %19 : vector<1x8x128xbf16> to vector<8x128xbf16>
    %cst_19 = arith.constant dense<0.000000e+00> : vector<72x128xf32>
    %21 = tpu.matmul %18, %20, %cst_19 {dimension_numbers = #tpu.dot_dimension_numbers<[1], [0], [0], [1], [0, 0, 1, 1], [], []>} : vector<72x8xbf16>, vector<8x128xbf16>, vector<72x128xf32> -> vector<72x128xf32>
    %22 = arith.addf %16, %21 : vector<72x128xf32>
    %c0_20 = arith.constant 0 : index
    %c180 = arith.constant 180 : index
    %c0_21 = arith.constant 0 : index
    %23 = vector.load %arg3[%c0_20, %c180, %c0_21] : memref<1x360x8xbf16, #tpu.memory_space<vmem>>, vector<1x72x8xbf16>
    %24 = vector.shape_cast %23 : vector<1x72x8xbf16> to vector<72x8xbf16>
    %c3 = arith.constant 3 : index
    %c0_22 = arith.constant 0 : index
    %c0_23 = arith.constant 0 : index
    %25 = vector.load %arg4[%c3, %c0_22, %c0_23] : memref<9x8x128xbf16, #tpu.memory_space<vmem>>, vector<1x8x128xbf16>
    %26 = vector.shape_cast %25 : vector<1x8x128xbf16> to vector<8x128xbf16>
    %cst_24 = arith.constant dense<0.000000e+00> : vector<72x128xf32>
    %27 = tpu.matmul %24, %26, %cst_24 {dimension_numbers = #tpu.dot_dimension_numbers<[1], [0], [0], [1], [0, 0, 1, 1], [], []>} : vector<72x8xbf16>, vector<8x128xbf16>, vector<72x128xf32> -> vector<72x128xf32>
    %28 = arith.addf %22, %27 : vector<72x128xf32>
    %c0_25 = arith.constant 0 : index
    %c270 = arith.constant 270 : index
    %c0_26 = arith.constant 0 : index
    %29 = vector.load %arg3[%c0_25, %c270, %c0_26] : memref<1x360x8xbf16, #tpu.memory_space<vmem>>, vector<1x72x8xbf16>
    %30 = vector.shape_cast %29 : vector<1x72x8xbf16> to vector<72x8xbf16>
    %c4 = arith.constant 4 : index
    %c0_27 = arith.constant 0 : index
    %c0_28 = arith.constant 0 : index
    %31 = vector.load %arg4[%c4, %c0_27, %c0_28] : memref<9x8x128xbf16, #tpu.memory_space<vmem>>, vector<1x8x128xbf16>
    %32 = vector.shape_cast %31 : vector<1x8x128xbf16> to vector<8x128xbf16>
    %cst_29 = arith.constant dense<0.000000e+00> : vector<72x128xf32>
    %33 = tpu.matmul %30, %32, %cst_29 {dimension_numbers = #tpu.dot_dimension_numbers<[1], [0], [0], [1], [0, 0, 1, 1], [], []>} : vector<72x8xbf16>, vector<8x128xbf16>, vector<72x128xf32> -> vector<72x128xf32>
    %34 = arith.addf %28, %33 : vector<72x128xf32>
    %c0_30 = arith.constant 0 : index
    %c181 = arith.constant 181 : index
    %c0_31 = arith.constant 0 : index
    %35 = vector.load %arg3[%c0_30, %c181, %c0_31] : memref<1x360x8xbf16, #tpu.memory_space<vmem>>, vector<1x72x8xbf16>
    %36 = vector.shape_cast %35 : vector<1x72x8xbf16> to vector<72x8xbf16>
    %c5 = arith.constant 5 : index
    %c0_32 = arith.constant 0 : index
    %c0_33 = arith.constant 0 : index
    %37 = vector.load %arg4[%c5, %c0_32, %c0_33] : memref<9x8x128xbf16, #tpu.memory_space<vmem>>, vector<1x8x128xbf16>
    %38 = vector.shape_cast %37 : vector<1x8x128xbf16> to vector<8x128xbf16>
    %cst_34 = arith.constant dense<0.000000e+00> : vector<72x128xf32>
    %39 = tpu.matmul %36, %38, %cst_34 {dimension_numbers = #tpu.dot_dimension_numbers<[1], [0], [0], [1], [0, 0, 1, 1], [], []>} : vector<72x8xbf16>, vector<8x128xbf16>, vector<72x128xf32> -> vector<72x128xf32>
    %40 = arith.addf %34, %39 : vector<72x128xf32>
    %c0_35 = arith.constant 0 : index
    %c9 = arith.constant 9 : index
    %c0_36 = arith.constant 0 : index
    %41 = vector.load %arg3[%c0_35, %c9, %c0_36] : memref<1x360x8xbf16, #tpu.memory_space<vmem>>, vector<1x72x8xbf16>
    %42 = vector.shape_cast %41 : vector<1x72x8xbf16> to vector<72x8xbf16>
    %c6 = arith.constant 6 : index
    %c0_37 = arith.constant 0 : index
    %c0_38 = arith.constant 0 : index
    %43 = vector.load %arg4[%c6, %c0_37, %c0_38] : memref<9x8x128xbf16, #tpu.memory_space<vmem>>, vector<1x8x128xbf16>
    %44 = vector.shape_cast %43 : vector<1x8x128xbf16> to vector<8x128xbf16>
    %cst_39 = arith.constant dense<0.000000e+00> : vector<72x128xf32>
    %45 = tpu.matmul %42, %44, %cst_39 {dimension_numbers = #tpu.dot_dimension_numbers<[1], [0], [0], [1], [0, 0, 1, 1], [], []>} : vector<72x8xbf16>, vector<8x128xbf16>, vector<72x128xf32> -> vector<72x128xf32>
    %46 = arith.addf %40, %45 : vector<72x128xf32>
    %c0_40 = arith.constant 0 : index
    %c99 = arith.constant 99 : index
    %c0_41 = arith.constant 0 : index
    %47 = vector.load %arg3[%c0_40, %c99, %c0_41] : memref<1x360x8xbf16, #tpu.memory_space<vmem>>, vector<1x72x8xbf16>
    %48 = vector.shape_cast %47 : vector<1x72x8xbf16> to vector<72x8xbf16>
    %c7 = arith.constant 7 : index
    %c0_42 = arith.constant 0 : index
    %c0_43 = arith.constant 0 : index
    %49 = vector.load %arg4[%c7, %c0_42, %c0_43] : memref<9x8x128xbf16, #tpu.memory_space<vmem>>, vector<1x8x128xbf16>
    %50 = vector.shape_cast %49 : vector<1x8x128xbf16> to vector<8x128xbf16>
    %cst_44 = arith.constant dense<0.000000e+00> : vector<72x128xf32>
    %51 = tpu.matmul %48, %50, %cst_44 {dimension_numbers = #tpu.dot_dimension_numbers<[1], [0], [0], [1], [0, 0, 1, 1], [], []>} : vector<72x8xbf16>, vector<8x128xbf16>, vector<72x128xf32> -> vector<72x128xf32>
    %52 = arith.addf %46, %51 : vector<72x128xf32>
    %c0_45 = arith.constant 0 : index
    %c10 = arith.constant 10 : index
    %c0_46 = arith.constant 0 : index
    %53 = vector.load %arg3[%c0_45, %c10, %c0_46] : memref<1x360x8xbf16, #tpu.memory_space<vmem>>, vector<1x72x8xbf16>
    %54 = vector.shape_cast %53 : vector<1x72x8xbf16> to vector<72x8xbf16>
    %c8 = arith.constant 8 : index
    %c0_47 = arith.constant 0 : index
    %c0_48 = arith.constant 0 : index
    %55 = vector.load %arg4[%c8, %c0_47, %c0_48] : memref<9x8x128xbf16, #tpu.memory_space<vmem>>, vector<1x8x128xbf16>
    %56 = vector.shape_cast %55 : vector<1x8x128xbf16> to vector<8x128xbf16>
    %cst_49 = arith.constant dense<0.000000e+00> : vector<72x128xf32>
    %57 = tpu.matmul %54, %56, %cst_49 {dimension_numbers = #tpu.dot_dimension_numbers<[1], [0], [0], [1], [0, 0, 1, 1], [], []>} : vector<72x8xbf16>, vector<8x128xbf16>, vector<72x128xf32> -> vector<72x128xf32>
    %58 = arith.addf %52, %57 : vector<72x128xf32>
    %59 = arith.mulf %58, %2 : vector<72x128xf32>
    %60 = arith.addf %59, %5 : vector<72x128xf32>
    %cst_50 = arith.constant 0.000000e+00 : f32
    %61 = vector.broadcast %cst_50 : f32 to vector<72x128xf32>
    %62 = arith.maximumf %60, %61 : vector<72x128xf32>
    %c0_51 = arith.constant 0 : index
    %c90_52 = arith.constant 90 : index
    %c0_53 = arith.constant 0 : index
    %63 = vector.load %arg3[%c0_51, %c90_52, %c0_53] : memref<1x360x8xbf16, #tpu.memory_space<vmem>>, vector<1x72x8xbf16>
    %64 = vector.shape_cast %63 : vector<1x72x8xbf16> to vector<72x8xbf16>
    %c0_54 = arith.constant 0 : index
    %c0_55 = arith.constant 0 : index
    %c0_56 = arith.constant 0 : index
    %65 = vector.load %arg4[%c0_54, %c0_55, %c0_56] : memref<9x8x128xbf16, #tpu.memory_space<vmem>>, vector<1x8x128xbf16>
    %66 = vector.shape_cast %65 : vector<1x8x128xbf16> to vector<8x128xbf16>
    %cst_57 = arith.constant dense<0.000000e+00> : vector<72x128xf32>
    %67 = tpu.matmul %64, %66, %cst_57 {dimension_numbers = #tpu.dot_dimension_numbers<[1], [0], [0], [1], [0, 0, 1, 1], [], []>} : vector<72x8xbf16>, vector<8x128xbf16>, vector<72x128xf32> -> vector<72x128xf32>
    %c0_58 = arith.constant 0 : index
    %c1_59 = arith.constant 1 : index
    %c0_60 = arith.constant 0 : index
    %68 = vector.load %arg3[%c0_58, %c1_59, %c0_60] : memref<1x360x8xbf16, #tpu.memory_space<vmem>>, vector<1x72x8xbf16>
    %69 = vector.shape_cast %68 : vector<1x72x8xbf16> to vector<72x8xbf16>
    %c1_61 = arith.constant 1 : index
    %c0_62 = arith.constant 0 : index
    %c0_63 = arith.constant 0 : index
    %70 = vector.load %arg4[%c1_61, %c0_62, %c0_63] : memref<9x8x128xbf16, #tpu.memory_space<vmem>>, vector<1x8x128xbf16>
    %71 = vector.shape_cast %70 : vector<1x8x128xbf16> to vector<8x128xbf16>
    %cst_64 = arith.constant dense<0.000000e+00> : vector<72x128xf32>
    %72 = tpu.matmul %69, %71, %cst_64 {dimension_numbers = #tpu.dot_dimension_numbers<[1], [0], [0], [1], [0, 0, 1, 1], [], []>} : vector<72x8xbf16>, vector<8x128xbf16>, vector<72x128xf32> -> vector<72x128xf32>
    %73 = arith.addf %67, %72 : vector<72x128xf32>
    %c0_65 = arith.constant 0 : index
    %c91 = arith.constant 91 : index
    %c0_66 = arith.constant 0 : index
    %74 = vector.load %arg3[%c0_65, %c91, %c0_66] : memref<1x360x8xbf16, #tpu.memory_space<vmem>>, vector<1x72x8xbf16>
    %75 = vector.shape_cast %74 : vector<1x72x8xbf16> to vector<72x8xbf16>
    %c2_67 = arith.constant 2 : index
    %c0_68 = arith.constant 0 : index
    %c0_69 = arith.constant 0 : index
    %76 = vector.load %arg4[%c2_67, %c0_68, %c0_69] : memref<9x8x128xbf16, #tpu.memory_space<vmem>>, vector<1x8x128xbf16>
    %77 = vector.shape_cast %76 : vector<1x8x128xbf16> to vector<8x128xbf16>
    %cst_70 = arith.constant dense<0.000000e+00> : vector<72x128xf32>
    %78 = tpu.matmul %75, %77, %cst_70 {dimension_numbers = #tpu.dot_dimension_numbers<[1], [0], [0], [1], [0, 0, 1, 1], [], []>} : vector<72x8xbf16>, vector<8x128xbf16>, vector<72x128xf32> -> vector<72x128xf32>
    %79 = arith.addf %73, %78 : vector<72x128xf32>
    %c0_71 = arith.constant 0 : index
    %c270_72 = arith.constant 270 : index
    %c0_73 = arith.constant 0 : index
    %80 = vector.load %arg3[%c0_71, %c270_72, %c0_73] : memref<1x360x8xbf16, #tpu.memory_space<vmem>>, vector<1x72x8xbf16>
    %81 = vector.shape_cast %80 : vector<1x72x8xbf16> to vector<72x8xbf16>
    %c3_74 = arith.constant 3 : index
    %c0_75 = arith.constant 0 : index
    %c0_76 = arith.constant 0 : index
    %82 = vector.load %arg4[%c3_74, %c0_75, %c0_76] : memref<9x8x128xbf16, #tpu.memory_space<vmem>>, vector<1x8x128xbf16>
    %83 = vector.shape_cast %82 : vector<1x8x128xbf16> to vector<8x128xbf16>
    %cst_77 = arith.constant dense<0.000000e+00> : vector<72x128xf32>
    %84 = tpu.matmul %81, %83, %cst_77 {dimension_numbers = #tpu.dot_dimension_numbers<[1], [0], [0], [1], [0, 0, 1, 1], [], []>} : vector<72x8xbf16>, vector<8x128xbf16>, vector<72x128xf32> -> vector<72x128xf32>
    %85 = arith.addf %79, %84 : vector<72x128xf32>
    %c0_78 = arith.constant 0 : index
    %c181_79 = arith.constant 181 : index
    %c0_80 = arith.constant 0 : index
    %86 = vector.load %arg3[%c0_78, %c181_79, %c0_80] : memref<1x360x8xbf16, #tpu.memory_space<vmem>>, vector<1x72x8xbf16>
    %87 = vector.shape_cast %86 : vector<1x72x8xbf16> to vector<72x8xbf16>
    %c4_81 = arith.constant 4 : index
    %c0_82 = arith.constant 0 : index
    %c0_83 = arith.constant 0 : index
    %88 = vector.load %arg4[%c4_81, %c0_82, %c0_83] : memref<9x8x128xbf16, #tpu.memory_space<vmem>>, vector<1x8x128xbf16>
    %89 = vector.shape_cast %88 : vector<1x8x128xbf16> to vector<8x128xbf16>
    %cst_84 = arith.constant dense<0.000000e+00> : vector<72x128xf32>
    %90 = tpu.matmul %87, %89, %cst_84 {dimension_numbers = #tpu.dot_dimension_numbers<[1], [0], [0], [1], [0, 0, 1, 1], [], []>} : vector<72x8xbf16>, vector<8x128xbf16>, vector<72x128xf32> -> vector<72x128xf32>
    %91 = arith.addf %85, %90 : vector<72x128xf32>
    %c0_85 = arith.constant 0 : index
    %c271 = arith.constant 271 : index
    %c0_86 = arith.constant 0 : index
    %92 = vector.load %arg3[%c0_85, %c271, %c0_86] : memref<1x360x8xbf16, #tpu.memory_space<vmem>>, vector<1x72x8xbf16>
    %93 = vector.shape_cast %92 : vector<1x72x8xbf16> to vector<72x8xbf16>
    %c5_87 = arith.constant 5 : index
    %c0_88 = arith.constant 0 : index
    %c0_89 = arith.constant 0 : index
    %94 = vector.load %arg4[%c5_87, %c0_88, %c0_89] : memref<9x8x128xbf16, #tpu.memory_space<vmem>>, vector<1x8x128xbf16>
    %95 = vector.shape_cast %94 : vector<1x8x128xbf16> to vector<8x128xbf16>
    %cst_90 = arith.constant dense<0.000000e+00> : vector<72x128xf32>
    %96 = tpu.matmul %93, %95, %cst_90 {dimension_numbers = #tpu.dot_dimension_numbers<[1], [0], [0], [1], [0, 0, 1, 1], [], []>} : vector<72x8xbf16>, vector<8x128xbf16>, vector<72x128xf32> -> vector<72x128xf32>
    %97 = arith.addf %91, %96 : vector<72x128xf32>
    %c0_91 = arith.constant 0 : index
    %c99_92 = arith.constant 99 : index
    %c0_93 = arith.constant 0 : index
    %98 = vector.load %arg3[%c0_91, %c99_92, %c0_93] : memref<1x360x8xbf16, #tpu.memory_space<vmem>>, vector<1x72x8xbf16>
    %99 = vector.shape_cast %98 : vector<1x72x8xbf16> to vector<72x8xbf16>
    %c6_94 = arith.constant 6 : index
    %c0_95 = arith.constant 0 : index
    %c0_96 = arith.constant 0 : index
    %100 = vector.load %arg4[%c6_94, %c0_95, %c0_96] : memref<9x8x128xbf16, #tpu.memory_space<vmem>>, vector<1x8x128xbf16>
    %101 = vector.shape_cast %100 : vector<1x8x128xbf16> to vector<8x128xbf16>
    %cst_97 = arith.constant dense<0.000000e+00> : vector<72x128xf32>
    %102 = tpu.matmul %99, %101, %cst_97 {dimension_numbers = #tpu.dot_dimension_numbers<[1], [0], [0], [1], [0, 0, 1, 1], [], []>} : vector<72x8xbf16>, vector<8x128xbf16>, vector<72x128xf32> -> vector<72x128xf32>
    %103 = arith.addf %97, %102 : vector<72x128xf32>
    %c0_98 = arith.constant 0 : index
    %c10_99 = arith.constant 10 : index
    %c0_100 = arith.constant 0 : index
    %104 = vector.load %arg3[%c0_98, %c10_99, %c0_100] : memref<1x360x8xbf16, #tpu.memory_space<vmem>>, vector<1x72x8xbf16>
    %105 = vector.shape_cast %104 : vector<1x72x8xbf16> to vector<72x8xbf16>
    %c7_101 = arith.constant 7 : index
    %c0_102 = arith.constant 0 : index
    %c0_103 = arith.constant 0 : index
    %106 = vector.load %arg4[%c7_101, %c0_102, %c0_103] : memref<9x8x128xbf16, #tpu.memory_space<vmem>>, vector<1x8x128xbf16>
    %107 = vector.shape_cast %106 : vector<1x8x128xbf16> to vector<8x128xbf16>
    %cst_104 = arith.constant dense<0.000000e+00> : vector<72x128xf32>
    %108 = tpu.matmul %105, %107, %cst_104 {dimension_numbers = #tpu.dot_dimension_numbers<[1], [0], [0], [1], [0, 0, 1, 1], [], []>} : vector<72x8xbf16>, vector<8x128xbf16>, vector<72x128xf32> -> vector<72x128xf32>
    %109 = arith.addf %103, %108 : vector<72x128xf32>
    %c0_105 = arith.constant 0 : index
    %c100 = arith.constant 100 : index
    %c0_106 = arith.constant 0 : index
    %110 = vector.load %arg3[%c0_105, %c100, %c0_106] : memref<1x360x8xbf16, #tpu.memory_space<vmem>>, vector<1x72x8xbf16>
    %111 = vector.shape_cast %110 : vector<1x72x8xbf16> to vector<72x8xbf16>
    %c8_107 = arith.constant 8 : index
    %c0_108 = arith.constant 0 : index
    %c0_109 = arith.constant 0 : index
    %112 = vector.load %arg4[%c8_107, %c0_108, %c0_109] : memref<9x8x128xbf16, #tpu.memory_space<vmem>>, vector<1x8x128xbf16>
    %113 = vector.shape_cast %112 : vector<1x8x128xbf16> to vector<8x128xbf16>
    %cst_110 = arith.constant dense<0.000000e+00> : vector<72x128xf32>
    %114 = tpu.matmul %111, %113, %cst_110 {dimension_numbers = #tpu.dot_dimension_numbers<[1], [0], [0], [1], [0, 0, 1, 1], [], []>} : vector<72x8xbf16>, vector<8x128xbf16>, vector<72x128xf32> -> vector<72x128xf32>
    %115 = arith.addf %109, %114 : vector<72x128xf32>
    %116 = arith.mulf %115, %2 : vector<72x128xf32>
    %117 = arith.addf %116, %5 : vector<72x128xf32>
    %cst_111 = arith.constant 0.000000e+00 : f32
    %118 = vector.broadcast %cst_111 : f32 to vector<72x128xf32>
    %119 = arith.maximumf %117, %118 : vector<72x128xf32>
    %120 = arith.maximumf %62, %119 : vector<72x128xf32>
    %c0_112 = arith.constant 0 : index
    %c180_113 = arith.constant 180 : index
    %c0_114 = arith.constant 0 : index
    %121 = vector.load %arg3[%c0_112, %c180_113, %c0_114] : memref<1x360x8xbf16, #tpu.memory_space<vmem>>, vector<1x72x8xbf16>
    %122 = vector.shape_cast %121 : vector<1x72x8xbf16> to vector<72x8xbf16>
    %c0_115 = arith.constant 0 : index
    %c0_116 = arith.constant 0 : index
    %c0_117 = arith.constant 0 : index
    %123 = vector.load %arg4[%c0_115, %c0_116, %c0_117] : memref<9x8x128xbf16, #tpu.memory_space<vmem>>, vector<1x8x128xbf16>
    %124 = vector.shape_cast %123 : vector<1x8x128xbf16> to vector<8x128xbf16>
    %cst_118 = arith.constant dense<0.000000e+00> : vector<72x128xf32>
    %125 = tpu.matmul %122, %124, %cst_118 {dimension_numbers = #tpu.dot_dimension_numbers<[1], [0], [0], [1], [0, 0, 1, 1], [], []>} : vector<72x8xbf16>, vector<8x128xbf16>, vector<72x128xf32> -> vector<72x128xf32>
    %c0_119 = arith.constant 0 : index
    %c270_120 = arith.constant 270 : index
    %c0_121 = arith.constant 0 : index
    %126 = vector.load %arg3[%c0_119, %c270_120, %c0_121] : memref<1x360x8xbf16, #tpu.memory_space<vmem>>, vector<1x72x8xbf16>
    %127 = vector.shape_cast %126 : vector<1x72x8xbf16> to vector<72x8xbf16>
    %c1_122 = arith.constant 1 : index
    %c0_123 = arith.constant 0 : index
    %c0_124 = arith.constant 0 : index
    %128 = vector.load %arg4[%c1_122, %c0_123, %c0_124] : memref<9x8x128xbf16, #tpu.memory_space<vmem>>, vector<1x8x128xbf16>
    %129 = vector.shape_cast %128 : vector<1x8x128xbf16> to vector<8x128xbf16>
    %cst_125 = arith.constant dense<0.000000e+00> : vector<72x128xf32>
    %130 = tpu.matmul %127, %129, %cst_125 {dimension_numbers = #tpu.dot_dimension_numbers<[1], [0], [0], [1], [0, 0, 1, 1], [], []>} : vector<72x8xbf16>, vector<8x128xbf16>, vector<72x128xf32> -> vector<72x128xf32>
    %131 = arith.addf %125, %130 : vector<72x128xf32>
    %c0_126 = arith.constant 0 : index
    %c181_127 = arith.constant 181 : index
    %c0_128 = arith.constant 0 : index
    %132 = vector.load %arg3[%c0_126, %c181_127, %c0_128] : memref<1x360x8xbf16, #tpu.memory_space<vmem>>, vector<1x72x8xbf16>
    %133 = vector.shape_cast %132 : vector<1x72x8xbf16> to vector<72x8xbf16>
    %c2_129 = arith.constant 2 : index
    %c0_130 = arith.constant 0 : index
    %c0_131 = arith.constant 0 : index
    %134 = vector.load %arg4[%c2_129, %c0_130, %c0_131] : memref<9x8x128xbf16, #tpu.memory_space<vmem>>, vector<1x8x128xbf16>
    %135 = vector.shape_cast %134 : vector<1x8x128xbf16> to vector<8x128xbf16>
    %cst_132 = arith.constant dense<0.000000e+00> : vector<72x128xf32>
    %136 = tpu.matmul %133, %135, %cst_132 {dimension_numbers = #tpu.dot_dimension_numbers<[1], [0], [0], [1], [0, 0, 1, 1], [], []>} : vector<72x8xbf16>, vector<8x128xbf16>, vector<72x128xf32> -> vector<72x128xf32>
    %137 = arith.addf %131, %136 : vector<72x128xf32>
    %c0_133 = arith.constant 0 : index
    %c9_134 = arith.constant 9 : index
    %c0_135 = arith.constant 0 : index
    %138 = vector.load %arg3[%c0_133, %c9_134, %c0_135] : memref<1x360x8xbf16, #tpu.memory_space<vmem>>, vector<1x72x8xbf16>
    %139 = vector.shape_cast %138 : vector<1x72x8xbf16> to vector<72x8xbf16>
    %c3_136 = arith.constant 3 : index
    %c0_137 = arith.constant 0 : index
    %c0_138 = arith.constant 0 : index
    %140 = vector.load %arg4[%c3_136, %c0_137, %c0_138] : memref<9x8x128xbf16, #tpu.memory_space<vmem>>, vector<1x8x128xbf16>
    %141 = vector.shape_cast %140 : vector<1x8x128xbf16> to vector<8x128xbf16>
    %cst_139 = arith.constant dense<0.000000e+00> : vector<72x128xf32>
    %142 = tpu.matmul %139, %141, %cst_139 {dimension_numbers = #tpu.dot_dimension_numbers<[1], [0], [0], [1], [0, 0, 1, 1], [], []>} : vector<72x8xbf16>, vector<8x128xbf16>, vector<72x128xf32> -> vector<72x128xf32>
    %143 = arith.addf %137, %142 : vector<72x128xf32>
    %c0_140 = arith.constant 0 : index
    %c99_141 = arith.constant 99 : index
    %c0_142 = arith.constant 0 : index
    %144 = vector.load %arg3[%c0_140, %c99_141, %c0_142] : memref<1x360x8xbf16, #tpu.memory_space<vmem>>, vector<1x72x8xbf16>
    %145 = vector.shape_cast %144 : vector<1x72x8xbf16> to vector<72x8xbf16>
    %c4_143 = arith.constant 4 : index
    %c0_144 = arith.constant 0 : index
    %c0_145 = arith.constant 0 : index
    %146 = vector.load %arg4[%c4_143, %c0_144, %c0_145] : memref<9x8x128xbf16, #tpu.memory_space<vmem>>, vector<1x8x128xbf16>
    %147 = vector.shape_cast %146 : vector<1x8x128xbf16> to vector<8x128xbf16>
    %cst_146 = arith.constant dense<0.000000e+00> : vector<72x128xf32>
    %148 = tpu.matmul %145, %147, %cst_146 {dimension_numbers = #tpu.dot_dimension_numbers<[1], [0], [0], [1], [0, 0, 1, 1], [], []>} : vector<72x8xbf16>, vector<8x128xbf16>, vector<72x128xf32> -> vector<72x128xf32>
    %149 = arith.addf %143, %148 : vector<72x128xf32>
    %c0_147 = arith.constant 0 : index
    %c10_148 = arith.constant 10 : index
    %c0_149 = arith.constant 0 : index
    %150 = vector.load %arg3[%c0_147, %c10_148, %c0_149] : memref<1x360x8xbf16, #tpu.memory_space<vmem>>, vector<1x72x8xbf16>
    %151 = vector.shape_cast %150 : vector<1x72x8xbf16> to vector<72x8xbf16>
    %c5_150 = arith.constant 5 : index
    %c0_151 = arith.constant 0 : index
    %c0_152 = arith.constant 0 : index
    %152 = vector.load %arg4[%c5_150, %c0_151, %c0_152] : memref<9x8x128xbf16, #tpu.memory_space<vmem>>, vector<1x8x128xbf16>
    %153 = vector.shape_cast %152 : vector<1x8x128xbf16> to vector<8x128xbf16>
    %cst_153 = arith.constant dense<0.000000e+00> : vector<72x128xf32>
    %154 = tpu.matmul %151, %153, %cst_153 {dimension_numbers = #tpu.dot_dimension_numbers<[1], [0], [0], [1], [0, 0, 1, 1], [], []>} : vector<72x8xbf16>, vector<8x128xbf16>, vector<72x128xf32> -> vector<72x128xf32>
    %155 = arith.addf %149, %154 : vector<72x128xf32>
    %c0_154 = arith.constant 0 : index
    %c189 = arith.constant 189 : index
    %c0_155 = arith.constant 0 : index
    %156 = vector.load %arg3[%c0_154, %c189, %c0_155] : memref<1x360x8xbf16, #tpu.memory_space<vmem>>, vector<1x72x8xbf16>
    %157 = vector.shape_cast %156 : vector<1x72x8xbf16> to vector<72x8xbf16>
    %c6_156 = arith.constant 6 : index
    %c0_157 = arith.constant 0 : index
    %c0_158 = arith.constant 0 : index
    %158 = vector.load %arg4[%c6_156, %c0_157, %c0_158] : memref<9x8x128xbf16, #tpu.memory_space<vmem>>, vector<1x8x128xbf16>
    %159 = vector.shape_cast %158 : vector<1x8x128xbf16> to vector<8x128xbf16>
    %cst_159 = arith.constant dense<0.000000e+00> : vector<72x128xf32>
    %160 = tpu.matmul %157, %159, %cst_159 {dimension_numbers = #tpu.dot_dimension_numbers<[1], [0], [0], [1], [0, 0, 1, 1], [], []>} : vector<72x8xbf16>, vector<8x128xbf16>, vector<72x128xf32> -> vector<72x128xf32>
    %161 = arith.addf %155, %160 : vector<72x128xf32>
    %c0_160 = arith.constant 0 : index
    %c279 = arith.constant 279 : index
    %c0_161 = arith.constant 0 : index
    %162 = vector.load %arg3[%c0_160, %c279, %c0_161] : memref<1x360x8xbf16, #tpu.memory_space<vmem>>, vector<1x72x8xbf16>
    %163 = vector.shape_cast %162 : vector<1x72x8xbf16> to vector<72x8xbf16>
    %c7_162 = arith.constant 7 : index
    %c0_163 = arith.constant 0 : index
    %c0_164 = arith.constant 0 : index
    %164 = vector.load %arg4[%c7_162, %c0_163, %c0_164] : memref<9x8x128xbf16, #tpu.memory_space<vmem>>, vector<1x8x128xbf16>
    %165 = vector.shape_cast %164 : vector<1x8x128xbf16> to vector<8x128xbf16>
    %cst_165 = arith.constant dense<0.000000e+00> : vector<72x128xf32>
    %166 = tpu.matmul %163, %165, %cst_165 {dimension_numbers = #tpu.dot_dimension_numbers<[1], [0], [0], [1], [0, 0, 1, 1], [], []>} : vector<72x8xbf16>, vector<8x128xbf16>, vector<72x128xf32> -> vector<72x128xf32>
    %167 = arith.addf %161, %166 : vector<72x128xf32>
    %c0_166 = arith.constant 0 : index
    %c190 = arith.constant 190 : index
    %c0_167 = arith.constant 0 : index
    %168 = vector.load %arg3[%c0_166, %c190, %c0_167] : memref<1x360x8xbf16, #tpu.memory_space<vmem>>, vector<1x72x8xbf16>
    %169 = vector.shape_cast %168 : vector<1x72x8xbf16> to vector<72x8xbf16>
    %c8_168 = arith.constant 8 : index
    %c0_169 = arith.constant 0 : index
    %c0_170 = arith.constant 0 : index
    %170 = vector.load %arg4[%c8_168, %c0_169, %c0_170] : memref<9x8x128xbf16, #tpu.memory_space<vmem>>, vector<1x8x128xbf16>
    %171 = vector.shape_cast %170 : vector<1x8x128xbf16> to vector<8x128xbf16>
    %cst_171 = arith.constant dense<0.000000e+00> : vector<72x128xf32>
    %172 = tpu.matmul %169, %171, %cst_171 {dimension_numbers = #tpu.dot_dimension_numbers<[1], [0], [0], [1], [0, 0, 1, 1], [], []>} : vector<72x8xbf16>, vector<8x128xbf16>, vector<72x128xf32> -> vector<72x128xf32>
    %173 = arith.addf %167, %172 : vector<72x128xf32>
    %174 = arith.mulf %173, %2 : vector<72x128xf32>
    %175 = arith.addf %174, %5 : vector<72x128xf32>
    %cst_172 = arith.constant 0.000000e+00 : f32
    %176 = vector.broadcast %cst_172 : f32 to vector<72x128xf32>
    %177 = arith.maximumf %175, %176 : vector<72x128xf32>
    %178 = arith.maximumf %120, %177 : vector<72x128xf32>
    %c0_173 = arith.constant 0 : index
    %c270_174 = arith.constant 270 : index
    %c0_175 = arith.constant 0 : index
    %179 = vector.load %arg3[%c0_173, %c270_174, %c0_175] : memref<1x360x8xbf16, #tpu.memory_space<vmem>>, vector<1x72x8xbf16>
    %180 = vector.shape_cast %179 : vector<1x72x8xbf16> to vector<72x8xbf16>
    %c0_176 = arith.constant 0 : index
    %c0_177 = arith.constant 0 : index
    %c0_178 = arith.constant 0 : index
    %181 = vector.load %arg4[%c0_176, %c0_177, %c0_178] : memref<9x8x128xbf16, #tpu.memory_space<vmem>>, vector<1x8x128xbf16>
    %182 = vector.shape_cast %181 : vector<1x8x128xbf16> to vector<8x128xbf16>
    %cst_179 = arith.constant dense<0.000000e+00> : vector<72x128xf32>
    %183 = tpu.matmul %180, %182, %cst_179 {dimension_numbers = #tpu.dot_dimension_numbers<[1], [0], [0], [1], [0, 0, 1, 1], [], []>} : vector<72x8xbf16>, vector<8x128xbf16>, vector<72x128xf32> -> vector<72x128xf32>
    %c0_180 = arith.constant 0 : index
    %c181_181 = arith.constant 181 : index
    %c0_182 = arith.constant 0 : index
    %184 = vector.load %arg3[%c0_180, %c181_181, %c0_182] : memref<1x360x8xbf16, #tpu.memory_space<vmem>>, vector<1x72x8xbf16>
    %185 = vector.shape_cast %184 : vector<1x72x8xbf16> to vector<72x8xbf16>
    %c1_183 = arith.constant 1 : index
    %c0_184 = arith.constant 0 : index
    %c0_185 = arith.constant 0 : index
    %186 = vector.load %arg4[%c1_183, %c0_184, %c0_185] : memref<9x8x128xbf16, #tpu.memory_space<vmem>>, vector<1x8x128xbf16>
    %187 = vector.shape_cast %186 : vector<1x8x128xbf16> to vector<8x128xbf16>
    %cst_186 = arith.constant dense<0.000000e+00> : vector<72x128xf32>
    %188 = tpu.matmul %185, %187, %cst_186 {dimension_numbers = #tpu.dot_dimension_numbers<[1], [0], [0], [1], [0, 0, 1, 1], [], []>} : vector<72x8xbf16>, vector<8x128xbf16>, vector<72x128xf32> -> vector<72x128xf32>
    %189 = arith.addf %183, %188 : vector<72x128xf32>
    %c0_187 = arith.constant 0 : index
    %c271_188 = arith.constant 271 : index
    %c0_189 = arith.constant 0 : index
    %190 = vector.load %arg3[%c0_187, %c271_188, %c0_189] : memref<1x360x8xbf16, #tpu.memory_space<vmem>>, vector<1x72x8xbf16>
    %191 = vector.shape_cast %190 : vector<1x72x8xbf16> to vector<72x8xbf16>
    %c2_190 = arith.constant 2 : index
    %c0_191 = arith.constant 0 : index
    %c0_192 = arith.constant 0 : index
    %192 = vector.load %arg4[%c2_190, %c0_191, %c0_192] : memref<9x8x128xbf16, #tpu.memory_space<vmem>>, vector<1x8x128xbf16>
    %193 = vector.shape_cast %192 : vector<1x8x128xbf16> to vector<8x128xbf16>
    %cst_193 = arith.constant dense<0.000000e+00> : vector<72x128xf32>
    %194 = tpu.matmul %191, %193, %cst_193 {dimension_numbers = #tpu.dot_dimension_numbers<[1], [0], [0], [1], [0, 0, 1, 1], [], []>} : vector<72x8xbf16>, vector<8x128xbf16>, vector<72x128xf32> -> vector<72x128xf32>
    %195 = arith.addf %189, %194 : vector<72x128xf32>
    %c0_194 = arith.constant 0 : index
    %c99_195 = arith.constant 99 : index
    %c0_196 = arith.constant 0 : index
    %196 = vector.load %arg3[%c0_194, %c99_195, %c0_196] : memref<1x360x8xbf16, #tpu.memory_space<vmem>>, vector<1x72x8xbf16>
    %197 = vector.shape_cast %196 : vector<1x72x8xbf16> to vector<72x8xbf16>
    %c3_197 = arith.constant 3 : index
    %c0_198 = arith.constant 0 : index
    %c0_199 = arith.constant 0 : index
    %198 = vector.load %arg4[%c3_197, %c0_198, %c0_199] : memref<9x8x128xbf16, #tpu.memory_space<vmem>>, vector<1x8x128xbf16>
    %199 = vector.shape_cast %198 : vector<1x8x128xbf16> to vector<8x128xbf16>
    %cst_200 = arith.constant dense<0.000000e+00> : vector<72x128xf32>
    %200 = tpu.matmul %197, %199, %cst_200 {dimension_numbers = #tpu.dot_dimension_numbers<[1], [0], [0], [1], [0, 0, 1, 1], [], []>} : vector<72x8xbf16>, vector<8x128xbf16>, vector<72x128xf32> -> vector<72x128xf32>
    %201 = arith.addf %195, %200 : vector<72x128xf32>
    %c0_201 = arith.constant 0 : index
    %c10_202 = arith.constant 10 : index
    %c0_203 = arith.constant 0 : index
    %202 = vector.load %arg3[%c0_201, %c10_202, %c0_203] : memref<1x360x8xbf16, #tpu.memory_space<vmem>>, vector<1x72x8xbf16>
    %203 = vector.shape_cast %202 : vector<1x72x8xbf16> to vector<72x8xbf16>
    %c4_204 = arith.constant 4 : index
    %c0_205 = arith.constant 0 : index
    %c0_206 = arith.constant 0 : index
    %204 = vector.load %arg4[%c4_204, %c0_205, %c0_206] : memref<9x8x128xbf16, #tpu.memory_space<vmem>>, vector<1x8x128xbf16>
    %205 = vector.shape_cast %204 : vector<1x8x128xbf16> to vector<8x128xbf16>
    %cst_207 = arith.constant dense<0.000000e+00> : vector<72x128xf32>
    %206 = tpu.matmul %203, %205, %cst_207 {dimension_numbers = #tpu.dot_dimension_numbers<[1], [0], [0], [1], [0, 0, 1, 1], [], []>} : vector<72x8xbf16>, vector<8x128xbf16>, vector<72x128xf32> -> vector<72x128xf32>
    %207 = arith.addf %201, %206 : vector<72x128xf32>
    %c0_208 = arith.constant 0 : index
    %c100_209 = arith.constant 100 : index
    %c0_210 = arith.constant 0 : index
    %208 = vector.load %arg3[%c0_208, %c100_209, %c0_210] : memref<1x360x8xbf16, #tpu.memory_space<vmem>>, vector<1x72x8xbf16>
    %209 = vector.shape_cast %208 : vector<1x72x8xbf16> to vector<72x8xbf16>
    %c5_211 = arith.constant 5 : index
    %c0_212 = arith.constant 0 : index
    %c0_213 = arith.constant 0 : index
    %210 = vector.load %arg4[%c5_211, %c0_212, %c0_213] : memref<9x8x128xbf16, #tpu.memory_space<vmem>>, vector<1x8x128xbf16>
    %211 = vector.shape_cast %210 : vector<1x8x128xbf16> to vector<8x128xbf16>
    %cst_214 = arith.constant dense<0.000000e+00> : vector<72x128xf32>
    %212 = tpu.matmul %209, %211, %cst_214 {dimension_numbers = #tpu.dot_dimension_numbers<[1], [0], [0], [1], [0, 0, 1, 1], [], []>} : vector<72x8xbf16>, vector<8x128xbf16>, vector<72x128xf32> -> vector<72x128xf32>
    %213 = arith.addf %207, %212 : vector<72x128xf32>
    %c0_215 = arith.constant 0 : index
    %c279_216 = arith.constant 279 : index
    %c0_217 = arith.constant 0 : index
    %214 = vector.load %arg3[%c0_215, %c279_216, %c0_217] : memref<1x360x8xbf16, #tpu.memory_space<vmem>>, vector<1x72x8xbf16>
    %215 = vector.shape_cast %214 : vector<1x72x8xbf16> to vector<72x8xbf16>
    %c6_218 = arith.constant 6 : index
    %c0_219 = arith.constant 0 : index
    %c0_220 = arith.constant 0 : index
    %216 = vector.load %arg4[%c6_218, %c0_219, %c0_220] : memref<9x8x128xbf16, #tpu.memory_space<vmem>>, vector<1x8x128xbf16>
    %217 = vector.shape_cast %216 : vector<1x8x128xbf16> to vector<8x128xbf16>
    %cst_221 = arith.constant dense<0.000000e+00> : vector<72x128xf32>
    %218 = tpu.matmul %215, %217, %cst_221 {dimension_numbers = #tpu.dot_dimension_numbers<[1], [0], [0], [1], [0, 0, 1, 1], [], []>} : vector<72x8xbf16>, vector<8x128xbf16>, vector<72x128xf32> -> vector<72x128xf32>
    %219 = arith.addf %213, %218 : vector<72x128xf32>
    %c0_222 = arith.constant 0 : index
    %c190_223 = arith.constant 190 : index
    %c0_224 = arith.constant 0 : index
    %220 = vector.load %arg3[%c0_222, %c190_223, %c0_224] : memref<1x360x8xbf16, #tpu.memory_space<vmem>>, vector<1x72x8xbf16>
    %221 = vector.shape_cast %220 : vector<1x72x8xbf16> to vector<72x8xbf16>
    %c7_225 = arith.constant 7 : index
    %c0_226 = arith.constant 0 : index
    %c0_227 = arith.constant 0 : index
    %222 = vector.load %arg4[%c7_225, %c0_226, %c0_227] : memref<9x8x128xbf16, #tpu.memory_space<vmem>>, vector<1x8x128xbf16>
    %223 = vector.shape_cast %222 : vector<1x8x128xbf16> to vector<8x128xbf16>
    %cst_228 = arith.constant dense<0.000000e+00> : vector<72x128xf32>
    %224 = tpu.matmul %221, %223, %cst_228 {dimension_numbers = #tpu.dot_dimension_numbers<[1], [0], [0], [1], [0, 0, 1, 1], [], []>} : vector<72x8xbf16>, vector<8x128xbf16>, vector<72x128xf32> -> vector<72x128xf32>
    %225 = arith.addf %219, %224 : vector<72x128xf32>
    %c0_229 = arith.constant 0 : index
    %c280 = arith.constant 280 : index
    %c0_230 = arith.constant 0 : index
    %226 = vector.load %arg3[%c0_229, %c280, %c0_230] : memref<1x360x8xbf16, #tpu.memory_space<vmem>>, vector<1x72x8xbf16>
    %227 = vector.shape_cast %226 : vector<1x72x8xbf16> to vector<72x8xbf16>
    %c8_231 = arith.constant 8 : index
    %c0_232 = arith.constant 0 : index
    %c0_233 = arith.constant 0 : index
    %228 = vector.load %arg4[%c8_231, %c0_232, %c0_233] : memref<9x8x128xbf16, #tpu.memory_space<vmem>>, vector<1x8x128xbf16>
    %229 = vector.shape_cast %228 : vector<1x8x128xbf16> to vector<8x128xbf16>
    %cst_234 = arith.constant dense<0.000000e+00> : vector<72x128xf32>
    %230 = tpu.matmul %227, %229, %cst_234 {dimension_numbers = #tpu.dot_dimension_numbers<[1], [0], [0], [1], [0, 0, 1, 1], [], []>} : vector<72x8xbf16>, vector<8x128xbf16>, vector<72x128xf32> -> vector<72x128xf32>
    %231 = arith.addf %225, %230 : vector<72x128xf32>
    %232 = arith.mulf %231, %2 : vector<72x128xf32>
    %233 = arith.addf %232, %5 : vector<72x128xf32>
    %cst_235 = arith.constant 0.000000e+00 : f32
    %234 = vector.broadcast %cst_235 : f32 to vector<72x128xf32>
    %235 = arith.maximumf %233, %234 : vector<72x128xf32>
    %236 = arith.maximumf %178, %235 : vector<72x128xf32>
    %237 = arith.truncf %236 : vector<72x128xf32> to vector<72x128xbf16>
    %c0_236 = arith.constant 0 : index
    %c0_237 = arith.constant 0 : index
    %c0_238 = arith.constant 0 : index
    %238 = vector.load %arg5[%c0_236, %c0_237, %c0_238] : memref<1x72x128xbf16, #tpu.memory_space<vmem>>, vector<1x72x128xbf16>
    %239 = vector.shape_cast %238 : vector<1x72x128xbf16> to vector<72x128xbf16>
    %240 = vector.shape_cast %237 : vector<72x128xbf16> to vector<1x72x128xbf16>
    tpu.vector_store %arg5[%c0_236, %c0_237, %c0_238], %240 {strides = array<i32>} : memref<1x72x128xbf16, #tpu.memory_space<vmem>>, vector<1x72x128xbf16>,
    return
  }
  func.func @transform_0(%arg0: i32) -> (i32, i32) {
    %c0_i32 = arith.constant 0 : i32
    %c0_i32_0 = arith.constant 0 : i32
    %c0_i32_1 = arith.constant 0 : i32
    return %c0_i32, %c0_i32_0 : i32, i32
  }
  func.func @transform_1(%arg0: i32) -> (i32, i32) {
    %c0_i32 = arith.constant 0 : i32
    %c0_i32_0 = arith.constant 0 : i32
    %c0_i32_1 = arith.constant 0 : i32
    return %c0_i32, %c0_i32_0 : i32, i32
  }
  func.func @transform_2(%arg0: i32) -> (i32, i32, i32) {
    %c0_i32 = arith.constant 0 : i32
    %c0_i32_0 = arith.constant 0 : i32
    %c0_i32_1 = arith.constant 0 : i32
    return %arg0, %c0_i32, %c0_i32_0 : i32, i32, i32
  }
  func.func @transform_3(%arg0: i32) -> (i32, i32, i32) {
    %c0_i32 = arith.constant 0 : i32
    %c0_i32_0 = arith.constant 0 : i32
    %c0_i32_1 = arith.constant 0 : i32
    %c0_i32_2 = arith.constant 0 : i32
    return %c0_i32, %c0_i32_0, %c0_i32_1 : i32, i32, i32
  }
  func.func @transform_4(%arg0: i32) -> (i32, i32, i32) {
    %c0_i32 = arith.constant 0 : i32
    %c0_i32_0 = arith.constant 0 : i32
    %c0_i32_1 = arith.constant 0 : i32
    return %arg0, %c0_i32, %c0_i32_0 : i32, i32, i32
  }
}

</mosaic_0001>

<bundles_post_ra>
// kernel: conv_block_forward.2
= control target key start
LH: loop header
LB: loop body
LE: loop exit
PB: predicated region body
PF: predicated region fallthrough
CT: control target
= control target key end

     0   :  { %s6540_s12 = smov 0   ;;  %s8026_s0 = inlined_call_operand.vmem [shape: bf16[2,360,8], index: 0, kind: input, shape index: {}]   ;;  %s8027_s1 = inlined_call_operand.vmem [shape: bf16[9,8,128], index: 1, kind: input, shape index: {}]   ;;  %s8028_s2 = inlined_call_operand.vmem [shape: f32[16,128], index: 2, kind: output, shape index: {0}]   ;;  %s8029_s3 = inlined_call_operand.vmem [shape: f32[16,128], index: 3, kind: output, shape index: {1}]  }
   0x1 LB: > { %s4514_s13 = sadd.s32 4294967295, %s6516_s12   ;;  %p4518_p0 = scmp.ge.s32.totalorder %s6516_s12, 1  ;;  %s6516_s12 = sphi %s6540_s12, %s14_s12  }
   0x2   : > { %p140_p1 = scmp.lt.s32.totalorder %s6516_s12, 3 }
   0x4   : > { %p141_p2 = pnand %p4518_p0, %p140_p1 }
   0x5   : > { %v4531_v0 = vld [vmem:[%s8027_s1 + $0x4] sm:$0xf] (!%p141_p2)  ;;  %vm435_vm0 = vcmask (!%p141_p2), 1043456   ;;  %p167_p3 = scmp.lt.s32.totalorder (!%p141_p2), %s4514_s13, 1  ;;  %v6518_v1 = vmov (!%p141_p2), 0.0   ;;  %vm6519_vm1 = vmmov (!%p141_p2), 0  }
   0x6   : > { %144 = sbr.rel (%p141_p2) target bundleno = 970 (0x3ca), region = 28  ;;  %4993 = vmatprep.subr.bf16.mxu0 (!%p141_p2), %v6518_v1  ;;  %v6553_v2 = vsel (!%p141_p2), %vm435_vm0, %v4531_v0, 0  ;;  %4995 = vmatprep.mubr.msk.bf16.mxu0 (!%p141_p2), %vm6519_vm1, %v6518_v1  ;;  %vm409_vm2 = vcmask (!%p141_p2), 1046528   ;;  %v371_v3 = vld [vmem:[%s8027_s1] sm:$0xf] (!%p141_p2)  ;;  %vm419_vm3 = vcmask (!%p141_p2), 64512  }
   0x7   : > { %4994 = vmatpush3.bf16.msra.mxu0 (!%p141_p2), %v6553_v2  ;;  %5191 = vmatprep.subr.bf16.mxu1 (!%p141_p2), %v6518_v1  ;;  %v6580_v10 = vsel (!%p141_p2), %vm435_vm0, %v371_v3, 0  ;;  %vm661_vm4 = vsmask.f32 (!%p141_p2), 7424  ;;  %vm1454_vm5 = vsmask.f32 (!%p141_p2), 6400  ;;  %vm837_vm7 = vcmask (!%p141_p2), 1045504  }
   0x8   : > { %5192 = vmatpush3.bf16.msra.mxu1 (!%p141_p2), %v6553_v2  ;;  %5015 = vmatprep.subr.bf16.mxu0 (!%p141_p2), %v6518_v1  ;;  %vm2214_vm6 = vsmask.f32 (!%p141_p2), 4352  ;;  %vm983_vm8 = vcmask (!%p141_p2), 1044480   ;;  %vm1098_vm9 = vsmask.f32 (!%p141_p2), 5376 }
   0x9   : > { %5193 = vmatprep.mubr.msk.bf16.mxu1 (!%p141_p2), %vm6519_vm1, %v6518_v1  ;;  %5213 = vmatprep.subr.bf16.mxu1 (!%p141_p2), %v6518_v1 }
   0xd   : > { %s8059_s13 = smov (!%p167_p3, %s4514_s13), 1 }
   0xe   : > { %s6425_s16 = smul.u32 180, %s8059_s13  ;;  %s4520_s9 = sshll.u32 %s8059_s13, 3 }
   0xf   : > { %s175_s14 = scalar_lea.vmem %s8028_s2, %s4520_s9  ;;  %s179_s17 = scalar_lea.vmem %s8029_s3, %s4520_s9 }
  0x10   : > { %s6570_s19 = scalar_lea.vmem %s8026_s0, %s6425_s16 }
  0x11   : > { %v6454_v4 = vld [vmem:[%s6570_s19 + $0x2c] sm:$0xfe]   ;;  %v6455_v5 = vld [vmem:[%s6570_s19 + $0x34] sm:$0xff]   ;;  %v6456_v8 = vld [vmem:[%s6570_s19] sm:$0xff]  }
  0x12   : > { %v410_v6 = vrot.slane %v6454_v4, 1  ;;  %v411_v7 = vrot.slane %v6455_v5, 1  ;;  %v6457_v9 = vld [vmem:[%s6570_s19 + $0x8] sm:$0xff]   ;;  %v6458_v11 = vld [vmem:[%s6570_s19 + $0x3c] sm:$0xff]   ;;  %v663_v13 = vshrl.u32 %v6456_v8, 16  ;;  %v665_v14 = vshll.u32 %v6456_v8, 16 }
  0x13   : > { %v670_v15 = vshll.u32 %v6457_v9, 16  ;;  %v6459_v16 = vld [vmem:[%s6570_s19 + $0x10] sm:$0xff]   ;;  %v413_v19 = vrot.slane %v6458_v11, 1  ;;  %v6593_v20 = vld [vmem:[%s6570_s19 + $0x18] sm:$0xff]   ;;  %v674_v22 = vshrl.u32 %v6457_v9, 16  ;;  %v6597_v24 = vld [vmem:[%s6570_s19 + $0x44] sm:$0xff]  }
  0x14   : > { %v6584_v12 = vsel %vm409_vm2, %v410_v6, %v411_v7  ;;  %v667_v17 = vrot.slane %v665_v14, 1  ;;  %v678_v23 = vshll.u32 %v6459_v16, 16  ;;  %v380_v25 = vld [vmem:[%s6570_s19 + $0x4c] sm:$0xf]  ;;  %v381_v28 = vld [vmem:[%s6570_s19 + $0x50] sm:$0x1] }
  0x15   : > { %4996 = vmatmul.mubr.msk.bf16.vlgmr.msra.gmra.mrb[0].mxu0 %vm419_vm3, %v6584_v12  ;;  %v672_v18 = vrot.slane %v670_v15, 1  ;;  %v6604_v27 = vsel %vm409_vm2, %v411_v7, %v413_v19  ;;  %v686_v29 = vshll.u32 %v6593_v20, 16  ;;  %v1904_v30 = vld [vmem:[%s6570_s19 + $0x50] sm:$0x3]  ;;  %v1909_v31 = vshrl.u32 %v6454_v4, 16 }
  0x16   : > { %5016 = vmatpush3.bf16.msra.mxu0 %v6580_v10  ;;  %4999 = vmatprep.mubr.msk.bf16.mxu0 %vm6519_vm1, %v6518_v1  ;;  %v668_v21 = vor.u32 %v667_v17, %v663_v13  ;;  %v680_v33 = vrot.slane %v678_v23, 1  ;;  %v415_v34 = vrot.slane %v6597_v24, 1  ;;  %v682_v35 = vshrl.u32 %v6459_v16, 16  ;;  %v6464_v54 = vld [vmem:[%s6570_s19 + $0x20] sm:$0x1f]  }
  0x17   : > { %5037 = vmatprep.subr.bf16.mxu0 %v6518_v1  ;;  %v676_v32 = vor.u32 %v674_v22, %v672_v18  ;;  %v4536_v36 = vcombine.low %v380_v25, %v381_v28  ;;  %v4631_v37 = vcombine.low %v380_v25, %v1904_v30  ;;  %v688_v38 = vrot.slane %v686_v29, 1  ;;  %v6465_v22 = vld [vmem:[%s6570_s19] sm:$0xff]   ;;  %v6467_v25 = vld [vmem:[%s6570_s19 + $0x10] sm:$0xff]  }
  0x18   : > { %v6601_v26 = vsel %vm661_vm4, %v668_v21, %v672_v18  ;;  %v1911_v39 = vrot.slane %v1909_v31, 1  ;;  %v1912_v40 = vshll.u32 %v6454_v4, 16  ;;  %v1917_v41 = vshrl.u32 %v6455_v5, 16  ;;  %v4552_v21 = vld [vmem:[%s8027_s1 + $0x8] sm:$0xf]  ;;  %v6727_v29 = vld [vmem:[%s6570_s19 + $0x8c] sm:$0xff]  }
  0x19   : > { %5194 = vmatmul.mubr.msk.bf16.vlgmr.msra.gmra.mrb[0].mxu1 %vm419_vm3, %v6601_v26  ;;  %v6621_v42 = vsel %vm661_vm4, %v676_v32, %v680_v33  ;;  %v6624_v43 = vsel %vm409_vm2, %v413_v19, %v415_v34  ;;  %v1920_v44 = vshll.u32 %v6455_v5, 16  ;;  %v1926_v45 = vshrl.u32 %v6458_v11, 16  ;;  %v6724_v28 = vld [vmem:[%s6570_s19 + $0x84] sm:$0xf8]  }
  0x1a   : > { %5214 = vmatpush3.bf16.msra.mxu1 %v6580_v10  ;;  %5197 = vmatprep.mubr.msk.bf16.mxu1 %vm6519_vm1, %v6518_v1  ;;  %v1914_v46 = vrot.slane %v1912_v40, 2  ;;  %v1919_v47 = vrot.slane %v1917_v41, 1  ;;  %v1929_v48 = vshll.u32 %v6458_v11, 16  ;;  %v1935_v49 = vshrl.u32 %v6597_v24, 16  ;;  %v6743_v41 = vld [vmem:[%s6570_s19 + $0x94] sm:$0xff]  }
  0x1b   : > { %5235 = vmatprep.subr.bf16.mxu1 %v6518_v1  ;;  %v1922_v50 = vrot.slane %v1920_v44, 2  ;;  %v1928_v51 = vrot.slane %v1926_v45, 1  ;;  %v1938_v52 = vshll.u32 %v6597_v24, 16  ;;  %v1944_v53 = vshrl.u32 %v4631_v37, 16  ;;  %v6466_v24 = vld [vmem:[%s6570_s19 + $0x8] sm:$0xff]  }
  0x1c   : > { %v1915_v55 = vor.u32 %v1914_v46, %v1911_v39  ;;  %v1931_v56 = vrot.slane %v1929_v48, 2  ;;  %v1937_v57 = vrot.slane %v1935_v49, 1  ;;  %v1947_v58 = vshll.u32 %v4631_v37, 16 }
  0x1d   : > { %5000 = vmatmul.mubr.msk.bf16.gmra.mrb[4].mxu0 %vm419_vm3, %v6604_v27  ;;  %v684_v59 = vor.u32 %v682_v35, %v680_v33  ;;  %v1923_v60 = vor.u32 %v1922_v50, %v1919_v47  ;;  %v1940_v61 = vrot.slane %v1938_v52, 2  ;;  %v1946_v62 = vrot.slane %v1944_v53, 1  ;;  %v6764_v50 = vld [vmem:[%s6570_s19 + $0x9c] sm:$0xff]  }
  0x1e   : > { %5003 = vmatprep.mubr.msk.bf16.mxu0 %vm6519_vm1, %v6518_v1  ;;  %v1932_v63 = vor.u32 %v1931_v56, %v1928_v51  ;;  %v1949_v0 = vrot.slane %v1947_v58, 2  ;;  %v6637_v3 = vrot.slane %v4536_v36, 1  ;;  %v690_v9 = vshrl.u32 %v6593_v20, 16 }
  0x1f   : > { %v6640_v4 = vsel %vm1454_vm5, %v1915_v55, %v1923_v60  ;;  %v1941_v5 = vor.u32 %v1940_v61, %v1937_v57  ;;  %v6648_v8 = vsel %vm661_vm4, %v684_v59, %v688_v38  ;;  %v694_v11 = vshll.u32 %v6464_v54, 16  ;;  %v6807_v57 = vld [vmem:[%s6570_s19 + $0x60] sm:$0xff]  }
  0x20   : > { %v6643_v6 = vsel %vm1454_vm5, %v1923_v60, %v1932_v63  ;;  %v6645_v7 = vor.u32 %v1949_v0, %v1946_v62  ;;  %v418_v15 = vsel %vm409_vm2, %v415_v34, %v6637_v3  ;;  %v692_v16 = vor.u32 %v690_v9, %v688_v38  ;;  %v4563_v38 = vld [vmem:[%s8027_s1 + $0xc] sm:$0xf]  ;;  %v4574_v60 = vld [vmem:[%s8027_s1 + $0x10] sm:$0xf] }
  0x21   : > { %5198 = vmatmul.mubr.msk.bf16.gmra.mrb[4].mxu1 %vm419_vm3, %v6621_v42  ;;  %v6652_v13 = vsel %vm1454_vm5, %v1932_v63, %v1941_v5  ;;  %v696_v17 = vrot.slane %v694_v11, 1  ;;  %v698_v19 = vshrl.u32 %v6464_v54, 16  ;;  %v6687_v23 = vsel %vm435_vm0, %v4552_v21, 0  ;;  %v6826_v62 = vld [vmem:[%s6570_s19 + $0x68] sm:$0xff]   ;;  %v808_v11 = vld [vmem:[%s6570_s19 + $0x78] sm:$0xf] }
  0x22   : > { %5201 = vmatprep.mubr.msk.bf16.mxu1 %vm6519_vm1, %v6518_v1  ;;  %v6656_v14 = vsel %vm1454_vm5, %v1941_v5, %v6645_v7  ;;  %v2216_v30 = vshrl.u32 %v6724_v28, 16  ;;  %v2219_v31 = vshll.u32 %v6724_v28, 16  ;;  %v2224_v32 = vshrl.u32 %v6727_v29, 16 }
  0x23   : > { %v6668_v18 = vsel %vm661_vm4, %v692_v16, %v696_v17  ;;  %v6678_v20 = vor.u32 %v698_v19, %v696_v17  ;;  %v2227_v33 = vshll.u32 %v6727_v29, 16  ;;  %v2233_v45 = vshrl.u32 %v6743_v41, 16  ;;  %v955_v19 = vld [vmem:[%s6570_s19 + $0xa8] sm:$0x7] }
  0x24   : > { %v2218_v34 = vrot.slane %v2216_v30, 3  ;;  %v2221_v35 = vrot.slane %v2219_v31, 4  ;;  %v2226_v36 = vrot.slane %v2224_v32, 3  ;;  %v2236_v46 = vshll.u32 %v6743_v41, 16  ;;  %v4585_v31 = vld [vmem:[%s8027_s1 + $0x14] sm:$0xf] }
  0x25   : > { %5004 = vmatmul.mubr.msk.bf16.gmra.mrb[8].mxu0 %vm419_vm3, %v6624_v43  ;;  %v2229_v37 = vrot.slane %v2227_v33, 4  ;;  %v2235_v47 = vrot.slane %v2233_v45, 3  ;;  %v2245_v52 = vshll.u32 %v6764_v50, 16  ;;  %v839_v59 = vrot.slane %v6807_v57, 2 }
  0x26   : > { %5007 = vmatprep.mubr.msk.bf16.mxu0 %vm6519_vm1, %v6518_v1  ;;  %v2222_v39 = vor.u32 %v2221_v35, %v2218_v34  ;;  %v2238_v48 = vrot.slane %v2236_v46, 4  ;;  %v6831_v63 = vsel %vm435_vm0, %v4574_v60, 0  ;;  %v984_v0 = vrot.slane %v6724_v28, 3 }
  0x27   : > { %v2230_v40 = vor.u32 %v2229_v37, %v2226_v36  ;;  %v2247_v54 = vrot.slane %v2245_v52, 4  ;;  %v989_v17 = vrot.slane %v6764_v50, 3  ;;  %v1111_v30 = vshll.u32 %v6807_v57, 16 }
  0x28   : > { %v2239_v49 = vor.u32 %v2238_v48, %v2235_v47  ;;  %v6928_v36 = vsel %vm435_vm0, %v4585_v31, 0 }
  0x29   : > { %5202 = vmatmul.mubr.msk.bf16.gmra.mrb[8].mxu1 %vm419_vm3, %v6648_v8  ;;  %v6751_v44 = vsel %vm2214_vm6, %v2222_v39, %v2230_v40  ;;  %v1113_v35 = vrot.slane %v1111_v30, 3  ;;  %v1117_v39 = vshrl.u32 %v6826_v62, 16  ;;  %v7048_v30 = vld [vmem:[%s6570_s19 + $0xc] sm:$0xff]  }
  0x2a   : > { %5205 = vmatprep.mubr.msk.bf16.mxu1 %vm6519_vm1, %v6518_v1  ;;  %v6767_v51 = vsel %vm2214_vm6, %v2230_v40, %v2239_v49  ;;  %v1120_v40 = vshll.u32 %v6826_v62, 16 }
  0x2b   : > { %v1119_v45 = vrot.slane %v1117_v39, 2 }
  0x2c   : > { %v1122_v46 = vrot.slane %v1120_v40, 3 }
  0x2d   : > { %5008 = vmatmul.mubr.msk.bf16.gmra.mrb[12].mxu0 %vm419_vm3, %v418_v15 }
  0x2e   : > { %5011 = vmatprep.mubr.msk.bf16.mxu0 %vm6519_vm1, %v6518_v1  ;;  %v1123_v47 = vor.u32 %v1122_v46, %v1119_v45 }
  0x31   : > { %5206 = vmatmul.mubr.msk.bf16.gmra.mrb[12].mxu1 %vm419_vm3, %v6668_v18 }
  0x32   : > { %5209 = vmatprep.mubr.msk.bf16.mxu1 %vm6519_vm1, %v6518_v1 }
  0x35   : > { %5012 = vmatmul.mubr.msk.bf16.gmra.mrb[16].mxu0 %vm419_vm3, %v6637_v3 }
  0x36   : > { %5017 = vmatprep.mubr.msk.bf16.mxu0 %vm6519_vm1, %v6518_v1 }
  0x39   : > { %5210 = vmatmul.mubr.msk.bf16.gmra.mrb[16].mxu1 %vm419_vm3, %v6678_v20 }
  0x3a   : > { %5215 = vmatprep.mubr.msk.bf16.mxu1 %vm6519_vm1, %v6518_v1 }
  0x3d   : > { %5018 = vmatmul.mubr.msk.bf16.vlgmr.msra.gmra.mrb[0].mxu0 %vm419_vm3, %v6465_v22 }
  0x3e   : > { %5038 = vmatpush3.bf16.msra.mxu0 %v6687_v23  ;;  %5021 = vmatprep.mubr.msk.bf16.mxu0 %vm6519_vm1, %v6518_v1 }
  0x3f   : > { %5059 = vmatprep.subr.bf16.mxu0 %v6518_v1 }
  0x41   : > { %5216 = vmatmul.mubr.msk.bf16.vlgmr.msra.gmra.mrb[0].mxu1 %vm419_vm3, %v6584_v12  ;;  %v6468_v12 = vld [vmem:[%s6570_s19 + $0x18] sm:$0xff]  }
  0x42   : > { %5236 = vmatpush3.bf16.msra.mxu1 %v6687_v23  ;;  %5219 = vmatprep.mubr.msk.bf16.mxu1 %vm6519_vm1, %v6518_v1 }
  0x43   : > { %5257 = vmatprep.subr.bf16.mxu1 %v6518_v1 }
  0x45   : > { %5022 = vmatmul.mubr.msk.bf16.gmra.mrb[4].mxu0 %vm419_vm3, %v6466_v24 }
  0x46   : > { %5025 = vmatprep.mubr.msk.bf16.mxu0 %vm6519_vm1, %v6518_v1 }
  0x49   : > { %5220 = vmatmul.mubr.msk.bf16.gmra.mrb[4].mxu1 %vm419_vm3, %v6604_v27  ;;  %v6469_v27 = vld [vmem:[%s6570_s19 + $0x20] ss:$0 sps:$4 sm:$0xff]  }
  0x4a   : > { %5223 = vmatprep.mubr.msk.bf16.mxu1 %vm6519_vm1, %v6518_v1 }
  0x4d   : > { %5026 = vmatmul.mubr.msk.bf16.gmra.mrb[8].mxu0 %vm419_vm3, %v6467_v25 }
  0x4e   : > { %5029 = vmatprep.mubr.msk.bf16.mxu0 %vm6519_vm1, %v6518_v1 }
  0x51   : > { %5224 = vmatmul.mubr.msk.bf16.gmra.mrb[8].mxu1 %vm419_vm3, %v6624_v43  ;;  %v6748_v43 = vsel %vm435_vm0, %v4563_v38, 0 }
  0x52   : > { %5227 = vmatprep.mubr.msk.bf16.mxu1 %vm6519_vm1, %v6518_v1 }
  0x55   : > { %5030 = vmatmul.mubr.msk.bf16.gmra.mrb[12].mxu0 %vm419_vm3, %v6468_v12 }
  0x56   : > { %5033 = vmatprep.mubr.msk.bf16.mxu0 %vm6519_vm1, %v6518_v1 }
  0x59   : > { %5228 = vmatmul.mubr.msk.bf16.gmra.mrb[12].mxu1 %vm419_vm3, %v418_v15 }
  0x5a   : > { %5231 = vmatprep.mubr.msk.bf16.mxu1 %vm6519_vm1, %v6518_v1 }
  0x5d   : > { %5034 = vmatmul.mubr.msk.bf16.gmra.mrb[16].mxu0 %vm419_vm3, %v6469_v27 }
  0x5e   : > { %5039 = vmatprep.mubr.msk.bf16.mxu0 %vm6519_vm1, %v6518_v1 }
  0x61   : > { %5232 = vmatmul.mubr.msk.bf16.gmra.mrb[16].mxu1 %vm419_vm3, %v6637_v3  ;;  %v985_v3 = vrot.slane %v6727_v29, 3  ;;  %v1108_v29 = vshrl.u32 %v6807_v57, 16 }
  0x62   : > { %5237 = vmatprep.mubr.msk.bf16.mxu1 %vm6519_vm1, %v6518_v1 }
  0x63   : > { %v6845_v5 = vsel %vm983_vm8, %v984_v0, %v985_v3  ;;  %v1110_v34 = vrot.slane %v1108_v29, 2  ;;  %v7043_v29 = vld [vmem:[%s6570_s19 + $0x34] sm:$0xf] }
  0x65   : > { %5040 = vmatmul.mubr.msk.bf16.vlgmr.msra.gmra.mrb[0].mxu0 %vm419_vm3, %v6601_v26  ;;  %v2242_v26 = vshrl.u32 %v6764_v50, 16  ;;  %v1114_v38 = vor.u32 %v1113_v35, %v1110_v34  ;;  %v1092_v50 = vld [vmem:[%s6570_s19 + $0x7c] sm:$0x7] }
  0x66   : > { %5060 = vmatpush3.bf16.msra.mxu0 %v6748_v43  ;;  %5043 = vmatprep.mubr.msk.bf16.mxu0 %vm6519_vm1, %v6518_v1  ;;  %v7057_v34 = vld [vmem:[%s6570_s19 + $0x38] sm:$0xff]  }
  0x67   : > { %5081 = vmatprep.subr.bf16.mxu0 %v6518_v1  ;;  %v2244_v53 = vrot.slane %v2242_v26, 3  ;;  %v4586_v26 = vcombine.low %v808_v11, %v1092_v50  ;;  %v6957_v52 = vsel %vm1098_vm9, %v1114_v38, %v1123_v47  ;;  %v1467_v45 = vshll.u32 %v7057_v34, 16 }
  0x69   : > { %5238 = vmatmul.mubr.msk.bf16.vlgmr.msra.gmra.mrb[0].mxu1 %vm419_vm3, %v6640_v4  ;;  %v6781_v55 = vor.u32 %v2247_v54, %v2244_v53  ;;  %v841_v4 = vrot.slane %v6826_v62, 2  ;;  %v1138_v57 = vshll.u32 %v4586_v26, 16 }
  0x6a   : > { %5258 = vmatpush3.bf16.msra.mxu1 %v6748_v43  ;;  %5241 = vmatprep.mubr.msk.bf16.mxu1 %vm6519_vm1, %v6518_v1 }
  0x6b   : > { %5279 = vmatprep.subr.bf16.mxu1 %v6518_v1  ;;  %v6785_v56 = vsel %vm2214_vm6, %v2239_v49, %v6781_v55  ;;  %v1140_v60 = vrot.slane %v1138_v57, 3 }
  0x6d   : > { %5044 = vmatmul.mubr.msk.bf16.gmra.mrb[4].mxu0 %vm419_vm3, %v6621_v42  ;;  %v6804_v42 = vld [vmem:[%s6570_s19 + $0x58] sm:$0xfc]  }
  0x6e   : > { %5047 = vmatprep.mubr.msk.bf16.mxu0 %vm6519_vm1, %v6518_v1  ;;  %v838_v58 = vrot.slane %v6804_v42, 2  ;;  %v1100_v27 = vshrl.u32 %v6804_v42, 16  ;;  %v1103_v28 = vshll.u32 %v6804_v42, 16  ;;  %v1135_v42 = vshrl.u32 %v4586_v26, 16 }
  0x70   : > { %v6823_v61 = vsel %vm837_vm7, %v838_v58, %v839_v59  ;;  %v1102_v32 = vrot.slane %v1100_v27, 2  ;;  %v1105_v33 = vrot.slane %v1103_v28, 3  ;;  %v1417_v28 = vld [vmem:[%s6570_s19 + $0x30] sm:$0xe] }
  0x71   : > { %5242 = vmatmul.mubr.msk.bf16.gmra.mrb[4].mxu1 %vm419_vm3, %v6643_v6  ;;  %v6848_v6 = vsel %vm837_vm7, %v839_v59, %v841_v4  ;;  %v1137_v59 = vrot.slane %v1135_v42, 2  ;;  %v7077_v42 = vld [vmem:[%s6570_s19 + $0x40] sm:$0xff]  }
  0x72   : > { %5245 = vmatprep.mubr.msk.bf16.mxu1 %vm6519_vm1, %v6518_v1  ;;  %v1106_v37 = vor.u32 %v1105_v33, %v1102_v32  ;;  %v4604_v33 = vcombine.low %v1417_v28, %v7043_v29 }
  0x73   : > { %v6972_v0 = vor.u32 %v1140_v60, %v1137_v59 }
  0x74   : > { %v1456_v39 = vshrl.u32 %v4604_v33, 16  ;;  %v1459_v40 = vshll.u32 %v4604_v33, 16 }
  0x75   : > { %5048 = vmatmul.mubr.msk.bf16.gmra.mrb[8].mxu0 %vm419_vm3, %v6648_v8  ;;  %v987_v8 = vrot.slane %v6743_v41, 3  ;;  %v6941_v41 = vsel %vm1098_vm9, %v1106_v37, %v1114_v38  ;;  %v1287_v38 = vshll.u32 %v7048_v30, 16 }
  0x76   : > { %5051 = vmatprep.mubr.msk.bf16.mxu0 %vm6519_vm1, %v6518_v1  ;;  %v1458_v50 = vrot.slane %v1456_v39, 1  ;;  %v1461_v26 = vrot.slane %v1459_v40, 2 }
  0x77   : > { %v6889_v21 = vsel %vm983_vm8, %v987_v8, %v989_v17 }
  0x79   : > { %5246 = vmatmul.mubr.msk.bf16.gmra.mrb[8].mxu1 %vm419_vm3, %v6652_v13  ;;  %v809_v13 = vld [vmem:[%s6570_s19 + $0x7c] sm:$0x3] }
  0x7a   : > { %5249 = vmatprep.mubr.msk.bf16.mxu1 %vm6519_vm1, %v6518_v1  ;;  %v4568_v16 = vcombine.low %v808_v11, %v809_v13 }
  0x7d   : > { %5052 = vmatmul.mubr.msk.bf16.gmra.mrb[12].mxu0 %vm419_vm3, %v6668_v18  ;;  %v6881_v18 = vld [vmem:[%s6570_s19 + $0xa4] sm:$0xf] }
  0x7e   : > { %5055 = vmatprep.mubr.msk.bf16.mxu0 %vm6519_vm1, %v6518_v1  ;;  %v4579_v22 = vcombine.low %v6881_v18, %v955_v19 }
  0x80   : > { %v6900_v25 = vrot.slane %v4579_v22, 3 }
  0x81   : > { %5250 = vmatmul.mubr.msk.bf16.gmra.mrb[12].mxu1 %vm419_vm3, %v6656_v14  ;;  %v6868_v14 = vsel %vm983_vm8, %v985_v3, %v987_v8  ;;  %v2210_v8 = vld [vmem:[%s6570_s19 + $0xa8] sm:$0xf] }
  0x82   : > { %5253 = vmatprep.mubr.msk.bf16.mxu1 %vm6519_vm1, %v6518_v1  ;;  %v6908_v12 = vsel %vm983_vm8, %v989_v17, %v6900_v25  ;;  %v7030_v17 = vld [vmem:[%s6570_s19 + $0x8] sm:$0xf] }
  0x85   : > { %5056 = vmatmul.mubr.msk.bf16.gmra.mrb[16].mxu0 %vm419_vm3, %v6678_v20  ;;  %v6886_v20 = vrot.slane %v4568_v16, 2  ;;  %v1242_v16 = vld [vmem:[%s6570_s19 + $0x4] sm:$0xf] }
  0x86   : > { %5061 = vmatprep.mubr.msk.bf16.mxu0 %vm6519_vm1, %v6518_v1  ;;  %v4593_v22 = vcombine.low %v1242_v16, %v7030_v17 }
  0x88   : > { %v1282_v31 = vshll.u32 %v4593_v22, 16  ;;  %v1280_v35 = vshrl.u32 %v4593_v22, 16 }
  0x89   : > { %5254 = vmatmul.mubr.msk.bf16.gmra.mrb[16].mxu1 %vm419_vm3, %v6645_v7  ;;  %v6851_v7 = vld [vmem:[%s6570_s19 + $0x70] sm:$0xff]  }
  0x8a   : > { %5259 = vmatprep.mubr.msk.bf16.mxu1 %vm6519_vm1, %v6518_v1  ;;  %v843_v9 = vrot.slane %v6851_v7, 2  ;;  %v1126_v48 = vshrl.u32 %v6851_v7, 16  ;;  %v1129_v49 = vshll.u32 %v6851_v7, 16  ;;  %v1284_v37 = vrot.slane %v1282_v31, 1  ;;  %v7106_v31 = vld [vmem:[%s6570_s19 + $0x48] sm:$0xff]  }
  0x8b   : > { %v1482_v39 = vshrl.u32 %v7106_v31, 16  ;;  %v1485_v40 = vshll.u32 %v7106_v31, 16 }
  0x8c   : > { %v6871_v15 = vsel %vm837_vm7, %v841_v4, %v843_v9  ;;  %v6894_v24 = vsel %vm837_vm7, %v843_v9, %v6886_v20  ;;  %v1128_v53 = vrot.slane %v1126_v48, 2  ;;  %v1131_v54 = vrot.slane %v1129_v49, 3  ;;  %v4592_v4 = vld [vmem:[%s8027_s1 + $0x18] sm:$0xf]  ;;  %v4603_v49 = vld [vmem:[%s8027_s1 + $0x1c] sm:$0xf] }
  0x8d   : > { %5062 = vmatmul.mubr.msk.bf16.vlgmr.msra.gmra.mrb[0].mxu0 %vm419_vm3, %v6823_v61  ;;  %v6998_v7 = vsel %vm435_vm0, %v4592_v4, 0  ;;  %v4647_v9 = vcombine.low %v6881_v18, %v2210_v8  ;;  %v1285_v46 = vor.u32 %v1284_v37, %v1280_v35  ;;  %v7071_v48 = vld [vmem:[%s6570_s19 + $0x14] sm:$0xff]   ;;  %v7087_v60 = vsel %vm435_vm0, %v4603_v49, 0 }
  0x8e   : > { %5082 = vmatpush3.bf16.msra.mxu0 %v6831_v63  ;;  %5065 = vmatprep.mubr.msk.bf16.mxu0 %vm6519_vm1, %v6518_v1  ;;  %v1132_v58 = vor.u32 %v1131_v54, %v1128_v53  ;;  %v1469_v54 = vrot.slane %v1467_v45, 2  ;;  %v1295_v59 = vshll.u32 %v7071_v48, 16  ;;  %v1462_v4 = vor.u32 %v1461_v26, %v1458_v50  ;;  %v7130_v26 = vld [vmem:[%s6570_s19 + $0x50] sm:$0x3f]  }
  0x8f   : > { %5103 = vmatprep.subr.bf16.mxu0 %v6518_v1  ;;  %v2251_v11 = vshrl.u32 %v4647_v9, 16  ;;  %v2254_v13 = vshll.u32 %v4647_v9, 16  ;;  %v1473_v9 = vshrl.u32 %v7077_v42, 16  ;;  %v1299_v35 = vshrl.u32 %v7071_v48, 16 }
  0x90   : > { %v6968_v62 = vsel %vm1098_vm9, %v1123_v47, %v1132_v58  ;;  %v6982_v3 = vsel %vm1098_vm9, %v1132_v58, %v6972_v0  ;;  %v1289_v47 = vrot.slane %v1287_v38, 1  ;;  %v1291_v58 = vshrl.u32 %v7048_v30, 16 }
  0x91   : > { %5260 = vmatmul.mubr.msk.bf16.vlgmr.msra.gmra.mrb[0].mxu1 %vm419_vm3, %v6845_v5  ;;  %v2253_v18 = vrot.slane %v2251_v11, 3  ;;  %v2256_v19 = vrot.slane %v2254_v13, 4  ;;  %v1476_v11 = vshll.u32 %v7077_v42, 16  ;;  %v1297_v16 = vrot.slane %v1295_v59, 1 }
  0x92   : > { %5280 = vmatpush3.bf16.msra.mxu1 %v6831_v63  ;;  %5263 = vmatprep.mubr.msk.bf16.mxu1 %vm6519_vm1, %v6518_v1  ;;  %v7080_v57 = vsel %vm661_vm4, %v1285_v46, %v1289_v47  ;;  %v1293_v13 = vor.u32 %v1291_v58, %v1289_v47  ;;  %v1475_v22 = vrot.slane %v1473_v9, 1  ;;  %v6490_v46 = vld [vmem:[%s6570_s19 + $0x24] sm:$0x1f]   ;;  %v1484_v49 = vrot.slane %v1482_v39, 1 }
  0x93   : > { %5301 = vmatprep.subr.bf16.mxu1 %v6518_v1  ;;  %v7037_v27 = vor.u32 %v2256_v19, %v2253_v18  ;;  %v7099_v18 = vld [vmem:[%s6570_s19 + $0x1c] sm:$0xff]   ;;  %v1478_v28 = vrot.slane %v1476_v11, 2  ;;  %v1487_v50 = vrot.slane %v1485_v40, 2  ;;  %v1311_v58 = vshll.u32 %v6490_v46, 16  ;;  %v1598_v40 = vld [vmem:[%s6570_s19 + $0x4] sm:$0xe] }
  0x94   : > { %v7109_v33 = vsel %vm661_vm4, %v1293_v13, %v1297_v16  ;;  %v1303_v37 = vshll.u32 %v7099_v18, 16 }
  0x95   : > { %5066 = vmatmul.mubr.msk.bf16.gmra.mrb[4].mxu0 %vm419_vm3, %v6848_v6  ;;  %v7053_v32 = vsel %vm2214_vm6, %v6781_v55, %v7037_v27  ;;  %v1464_v55 = vshrl.u32 %v7057_v34, 16  ;;  %v1479_v38 = vor.u32 %v1478_v28, %v1475_v22  ;;  %v1488_v59 = vor.u32 %v1487_v50, %v1484_v49 }
  0x96   : > { %5069 = vmatprep.mubr.msk.bf16.mxu0 %vm6519_vm1, %v6518_v1  ;;  %v1305_v45 = vrot.slane %v1303_v37, 1  ;;  %v1313_v11 = vrot.slane %v1311_v58, 1  ;;  %v1315_v37 = vshrl.u32 %v6490_v46, 16 }
  0x97   : > { %v1466_v53 = vrot.slane %v1464_v55, 1  ;;  %v1301_v55 = vor.u32 %v1299_v35, %v1297_v16  ;;  %v7147_v13 = vsel %vm1454_vm5, %v1479_v38, %v1488_v59 }
  0x98   : > { %v7166_v39 = vor.u32 %v1315_v37, %v1313_v11 }
  0x99   : > { %5264 = vmatmul.mubr.msk.bf16.gmra.mrb[4].mxu1 %vm419_vm3, %v6868_v14  ;;  %v1470_v8 = vor.u32 %v1469_v54, %v1466_v53  ;;  %v7133_v53 = vsel %vm661_vm4, %v1301_v55, %v1305_v45  ;;  %v1307_v54 = vshrl.u32 %v7099_v18, 16  ;;  %v4614_v55 = vld [vmem:[%s8027_s1 + $0x20] sm:$0xf] }
  0x9a   : > { %5267 = vmatprep.mubr.msk.bf16.mxu1 %vm6519_vm1, %v6518_v1  ;;  %v7184_v49 = vsel %vm435_vm0, %v4614_v55, 0 }
  0x9b   : > { %v7103_v19 = vsel %vm1454_vm5, %v1462_v4, %v1470_v8  ;;  %v7127_v47 = vsel %vm1454_vm5, %v1470_v8, %v1479_v38  ;;  %v1491_v4 = vshrl.u32 %v7130_v26, 16  ;;  %v1494_v8 = vshll.u32 %v7130_v26, 16 }
  0x9c   : > { %v1309_v9 = vor.u32 %v1307_v54, %v1305_v45  ;;  %v4615_v45 = vcombine.low %v1598_v40, %v7030_v17  ;;  %v1605_v54 = vrot.slane %v7048_v30, 1  ;;  %v1607_v30 = vrot.slane %v7071_v48, 1 }
  0x9d   : > { %5070 = vmatmul.mubr.msk.bf16.gmra.mrb[8].mxu0 %vm419_vm3, %v6871_v15  ;;  %v1493_v16 = vrot.slane %v1491_v4, 1  ;;  %v1496_v22 = vrot.slane %v1494_v8, 2  ;;  %v1609_v48 = vrot.slane %v7099_v18, 1  ;;  %v7228_v4 = vrot.slane %v6490_v46, 1  ;;  %v2517_v46 = vld [vmem:[%s6570_s19 + $0x30] sm:$0xc] }
  0x9e   : > { %5073 = vmatprep.mubr.msk.bf16.mxu0 %vm6519_vm1, %v6518_v1  ;;  %v7150_v28 = vsel %vm661_vm4, %v1309_v9, %v1313_v11  ;;  %v1604_v50 = vrot.slane %v4615_v45, 1  ;;  %v7210_v58 = vsel %vm409_vm2, %v1605_v54, %v1607_v30  ;;  %v4663_v8 = vcombine.low %v2517_v46, %v7043_v29 }
  0x9f   : > { %v7156_v35 = vor.u32 %v1496_v22, %v1493_v16  ;;  %v7236_v18 = vsel %vm409_vm2, %v1609_v48, %v7228_v4  ;;  %v2522_v11 = vrot.slane %v7057_v34, 2  ;;  %v2524_v34 = vrot.slane %v7077_v42, 2 }
  0xa0   : > { %v7196_v17 = vsel %vm409_vm2, %v1604_v50, %v1605_v54  ;;  %v2521_v9 = vrot.slane %v4663_v8, 2  ;;  %v7293_v22 = vrot.slane %v7130_v26, 2 }
  0xa1   : > { %5268 = vmatmul.mubr.msk.bf16.gmra.mrb[8].mxu1 %vm419_vm3, %v6889_v21  ;;  %v7164_v38 = vsel %vm1454_vm5, %v1488_v59, %v7156_v35  ;;  %v7222_v59 = vsel %vm409_vm2, %v1607_v30, %v1609_v48  ;;  %v7274_v16 = vsel %vm837_vm7, %v2522_v11, %v2524_v34 }
  0xa2   : > { %5271 = vmatprep.mubr.msk.bf16.mxu1 %vm6519_vm1, %v6518_v1  ;;  %v7260_v29 = vsel %vm837_vm7, %v2521_v9, %v2522_v11 }
  0xa5   : > { %5074 = vmatmul.mubr.msk.bf16.gmra.mrb[12].mxu0 %vm419_vm3, %v6894_v24 }
  0xa6   : > { %5077 = vmatprep.mubr.msk.bf16.mxu0 %vm6519_vm1, %v6518_v1 }
  0xa9   : > { %5272 = vmatmul.mubr.msk.bf16.gmra.mrb[12].mxu1 %vm419_vm3, %v6908_v12 }
  0xaa   : > { %5275 = vmatprep.mubr.msk.bf16.mxu1 %vm6519_vm1, %v6518_v1 }
  0xad   : > { %5078 = vmatmul.mubr.msk.bf16.gmra.mrb[16].mxu0 %vm419_vm3, %v6886_v20 }
  0xae   : > { %5083 = vmatprep.mubr.msk.bf16.mxu0 %vm6519_vm1, %v6518_v1 }
  0xb1   : > { %5276 = vmatmul.mubr.msk.bf16.gmra.mrb[16].mxu1 %vm419_vm3, %v6900_v25 }
  0xb2   : > { %5281 = vmatprep.mubr.msk.bf16.mxu1 %vm6519_vm1, %v6518_v1 }
  0xb5   : > { %5084 = vmatmul.mubr.msk.bf16.vlgmr.msra.gmra.mrb[0].mxu0 %vm419_vm3, %v6845_v5 }
  0xb6   : > { %5104 = vmatpush3.bf16.msra.mxu0 %v6928_v36  ;;  %5087 = vmatprep.mubr.msk.bf16.mxu0 %vm6519_vm1, %v6518_v1 }
  0xb7   : > { %5125 = vmatprep.subr.bf16.mxu0 %v6518_v1 }
  0xb9   : > { %5282 = vmatmul.mubr.msk.bf16.vlgmr.msra.gmra.mrb[0].mxu1 %vm419_vm3, %v6941_v41 }
  0xba   : > { %5302 = vmatpush3.bf16.msra.mxu1 %v6928_v36  ;;  %5285 = vmatprep.mubr.msk.bf16.mxu1 %vm6519_vm1, %v6518_v1 }
  0xbb   : > { %5323 = vmatprep.subr.bf16.mxu1 %v6518_v1 }
  0xbd   : > { %5088 = vmatmul.mubr.msk.bf16.gmra.mrb[4].mxu0 %vm419_vm3, %v6868_v14 }
  0xbe   : > { %5091 = vmatprep.mubr.msk.bf16.mxu0 %vm6519_vm1, %v6518_v1 }
  0xc1   : > { %5286 = vmatmul.mubr.msk.bf16.gmra.mrb[4].mxu1 %vm419_vm3, %v6957_v52 }
  0xc2   : > { %5289 = vmatprep.mubr.msk.bf16.mxu1 %vm6519_vm1, %v6518_v1 }
  0xc5   : > { %5092 = vmatmul.mubr.msk.bf16.gmra.mrb[8].mxu0 %vm419_vm3, %v6889_v21 }
  0xc6   : > { %5095 = vmatprep.mubr.msk.bf16.mxu0 %vm6519_vm1, %v6518_v1 }
  0xc9   : > { %5290 = vmatmul.mubr.msk.bf16.gmra.mrb[8].mxu1 %vm419_vm3, %v6968_v62 }
  0xca   : > { %5293 = vmatprep.mubr.msk.bf16.mxu1 %vm6519_vm1, %v6518_v1 }
  0xcd   : > { %5096 = vmatmul.mubr.msk.bf16.gmra.mrb[12].mxu0 %vm419_vm3, %v6908_v12 }
  0xce   : > { %5099 = vmatprep.mubr.msk.bf16.mxu0 %vm6519_vm1, %v6518_v1 }
  0xd1   : > { %5294 = vmatmul.mubr.msk.bf16.gmra.mrb[12].mxu1 %vm419_vm3, %v6982_v3 }
  0xd2   : > { %5297 = vmatprep.mubr.msk.bf16.mxu1 %vm6519_vm1, %v6518_v1 }
  0xd5   : > { %5100 = vmatmul.mubr.msk.bf16.gmra.mrb[16].mxu0 %vm419_vm3, %v6900_v25 }
  0xd6   : > { %5105 = vmatprep.mubr.msk.bf16.mxu0 %vm6519_vm1, %v6518_v1 }
  0xd9   : > { %5298 = vmatmul.mubr.msk.bf16.gmra.mrb[16].mxu1 %vm419_vm3, %v6972_v0 }
  0xda   : > { %5303 = vmatprep.mubr.msk.bf16.mxu1 %vm6519_vm1, %v6518_v1 }
  0xdd   : > { %5106 = vmatmul.mubr.msk.bf16.vlgmr.msra.gmra.mrb[0].mxu0 %vm419_vm3, %v6941_v41 }
  0xde   : > { %5126 = vmatpush3.bf16.msra.mxu0 %v6998_v7  ;;  %5109 = vmatprep.mubr.msk.bf16.mxu0 %vm6519_vm1, %v6518_v1 }
  0xdf   : > { %5147 = vmatprep.subr.bf16.mxu0 %v6518_v1 }
  0xe1   : > { %5304 = vmatmul.mubr.msk.bf16.vlgmr.msra.gmra.mrb[0].mxu1 %vm419_vm3, %v6751_v44 }
  0xe2   : > { %5324 = vmatpush3.bf16.msra.mxu1 %v6998_v7  ;;  %5307 = vmatprep.mubr.msk.bf16.mxu1 %vm6519_vm1, %v6518_v1 }
  0xe3   : > { %5345 = vmatprep.subr.bf16.mxu1 %v6518_v1 }
  0xe5   : > { %5110 = vmatmul.mubr.msk.bf16.gmra.mrb[4].mxu0 %vm419_vm3, %v6957_v52 }
  0xe6   : > { %5113 = vmatprep.mubr.msk.bf16.mxu0 %vm6519_vm1, %v6518_v1 }
  0xe9   : > { %5308 = vmatmul.mubr.msk.bf16.gmra.mrb[4].mxu1 %vm419_vm3, %v6767_v51 }
  0xea   : > { %5311 = vmatprep.mubr.msk.bf16.mxu1 %vm6519_vm1, %v6518_v1 }
  0xed   : > { %5114 = vmatmul.mubr.msk.bf16.gmra.mrb[8].mxu0 %vm419_vm3, %v6968_v62 }
  0xee   : > { %5117 = vmatprep.mubr.msk.bf16.mxu0 %vm6519_vm1, %v6518_v1 }
  0xf1   : > { %5312 = vmatmul.mubr.msk.bf16.gmra.mrb[8].mxu1 %vm419_vm3, %v6785_v56 }
  0xf2   : > { %5315 = vmatprep.mubr.msk.bf16.mxu1 %vm6519_vm1, %v6518_v1 }
  0xf5   : > { %5118 = vmatmul.mubr.msk.bf16.gmra.mrb[12].mxu0 %vm419_vm3, %v6982_v3 }
  0xf6   : > { %5121 = vmatprep.mubr.msk.bf16.mxu0 %vm6519_vm1, %v6518_v1 }
  0xf9   : > { %5316 = vmatmul.mubr.msk.bf16.gmra.mrb[12].mxu1 %vm419_vm3, %v7053_v32 }
  0xfa   : > { %5319 = vmatprep.mubr.msk.bf16.mxu1 %vm6519_vm1, %v6518_v1 }
  0xfd   : > { %5122 = vmatmul.mubr.msk.bf16.gmra.mrb[16].mxu0 %vm419_vm3, %v6972_v0 }
  0xfe   : > { %5127 = vmatprep.mubr.msk.bf16.mxu0 %vm6519_vm1, %v6518_v1 }
 0x101   : > { %5320 = vmatmul.mubr.msk.bf16.gmra.mrb[16].mxu1 %vm419_vm3, %v7037_v27 }
 0x102   : > { %5325 = vmatprep.mubr.msk.bf16.mxu1 %vm6519_vm1, %v6518_v1 }
 0x105   : > { %5128 = vmatmul.mubr.msk.bf16.vlgmr.msra.gmra.mrb[0].mxu0 %vm419_vm3, %v7080_v57 }
 0x106   : > { %5148 = vmatpush3.bf16.msra.mxu0 %v7087_v60  ;;  %5131 = vmatprep.mubr.msk.bf16.mxu0 %vm6519_vm1, %v6518_v1 }
 0x107   : > { %5169 = vmatprep.subr.bf16.mxu0 %v6518_v1 }
 0x109   : > { %5326 = vmatmul.mubr.msk.bf16.vlgmr.msra.gmra.mrb[0].mxu1 %vm419_vm3, %v7103_v19 }
 0x10a   : > { %5346 = vmatpush3.bf16.msra.mxu1 %v7087_v60  ;;  %5329 = vmatprep.mubr.msk.bf16.mxu1 %vm6519_vm1, %v6518_v1 }
 0x10b   : > { %5367 = vmatprep.subr.bf16.mxu1 %v6518_v1 }
 0x10d   : > { %5132 = vmatmul.mubr.msk.bf16.gmra.mrb[4].mxu0 %vm419_vm3, %v7109_v33 }
 0x10e   : > { %5135 = vmatprep.mubr.msk.bf16.mxu0 %vm6519_vm1, %v6518_v1 }
 0x111   : > { %5330 = vmatmul.mubr.msk.bf16.gmra.mrb[4].mxu1 %vm419_vm3, %v7127_v47 }
 0x112   : > { %5333 = vmatprep.mubr.msk.bf16.mxu1 %vm6519_vm1, %v6518_v1 }
 0x115   : > { %5136 = vmatmul.mubr.msk.bf16.gmra.mrb[8].mxu0 %vm419_vm3, %v7133_v53 }
 0x116   : > { %5139 = vmatprep.mubr.msk.bf16.mxu0 %vm6519_vm1, %v6518_v1 }
 0x119   : > { %5334 = vmatmul.mubr.msk.bf16.gmra.mrb[8].mxu1 %vm419_vm3, %v7147_v13 }
 0x11a   : > { %5337 = vmatprep.mubr.msk.bf16.mxu1 %vm6519_vm1, %v6518_v1 }
 0x11d   : > { %5140 = vmatmul.mubr.msk.bf16.gmra.mrb[12].mxu0 %vm419_vm3, %v7150_v28 }
 0x11e   : > { %5143 = vmatprep.mubr.msk.bf16.mxu0 %vm6519_vm1, %v6518_v1 }
 0x121   : > { %5338 = vmatmul.mubr.msk.bf16.gmra.mrb[12].mxu1 %vm419_vm3, %v7164_v38 }
 0x122   : > { %5341 = vmatprep.mubr.msk.bf16.mxu1 %vm6519_vm1, %v6518_v1 }
 0x125   : > { %5144 = vmatmul.mubr.msk.bf16.gmra.mrb[16].mxu0 %vm419_vm3, %v7166_v39 }
 0x126   : > { %5149 = vmatprep.mubr.msk.bf16.mxu0 %vm6519_vm1, %v6518_v1 }
 0x129   : > { %5342 = vmatmul.mubr.msk.bf16.gmra.mrb[16].mxu1 %vm419_vm3, %v7156_v35 }
 0x12a   : > { %5347 = vmatprep.mubr.msk.bf16.mxu1 %vm6519_vm1, %v6518_v1 }
 0x12d   : > { %5150 = vmatmul.mubr.msk.bf16.vlgmr.msra.gmra.mrb[0].mxu0 %vm419_vm3, %v7103_v19 }
 0x12e   : > { %5170 = vmatpush3.bf16.msra.mxu0 %v7184_v49  ;;  %5153 = vmatprep.mubr.msk.bf16.mxu0 %vm6519_vm1, %v6518_v1 }
 0x12f   : > { %5389 = vmatprep.subr.bf16.mxu0 %v6518_v1 }
 0x131   : > { %5348 = vmatmul.mubr.msk.bf16.vlgmr.msra.gmra.mrb[0].mxu1 %vm419_vm3, %v7196_v17 }
 0x132   : > { %5368 = vmatpush3.bf16.msra.mxu1 %v7184_v49  ;;  %5351 = vmatprep.mubr.msk.bf16.mxu1 %vm6519_vm1, %v6518_v1 }
 0x133   : > { %5587 = vmatprep.subr.bf16.mxu1 %v6518_v1 }
 0x135   : > { %5154 = vmatmul.mubr.msk.bf16.gmra.mrb[4].mxu0 %vm419_vm3, %v7127_v47 }
 0x136   : > { %5157 = vmatprep.mubr.msk.bf16.mxu0 %vm6519_vm1, %v6518_v1 }
 0x139   : > { %5352 = vmatmul.mubr.msk.bf16.gmra.mrb[4].mxu1 %vm419_vm3, %v7210_v58 }
 0x13a   : > { %5355 = vmatprep.mubr.msk.bf16.mxu1 %vm6519_vm1, %v6518_v1 }
 0x13d   : > { %5158 = vmatmul.mubr.msk.bf16.gmra.mrb[8].mxu0 %vm419_vm3, %v7147_v13 }
 0x13e   : > { %5161 = vmatprep.mubr.msk.bf16.mxu0 %vm6519_vm1, %v6518_v1 }
 0x141   : > { %5356 = vmatmul.mubr.msk.bf16.gmra.mrb[8].mxu1 %vm419_vm3, %v7222_v59 }
 0x142   : > { %5359 = vmatprep.mubr.msk.bf16.mxu1 %vm6519_vm1, %v6518_v1 }
 0x145   : > { %5162 = vmatmul.mubr.msk.bf16.gmra.mrb[12].mxu0 %vm419_vm3, %v7164_v38 }
 0x146   : > { %5165 = vmatprep.mubr.msk.bf16.mxu0 %vm6519_vm1, %v6518_v1 }
 0x149   : > { %5360 = vmatmul.mubr.msk.bf16.gmra.mrb[12].mxu1 %vm419_vm3, %v7236_v18 }
 0x14a   : > { %5363 = vmatprep.mubr.msk.bf16.mxu1 %vm6519_vm1, %v6518_v1 }
 0x14d   : > { %5166 = vmatmul.mubr.msk.bf16.gmra.mrb[16].mxu0 %vm419_vm3, %v7156_v35 }
 0x14e   : > { %5171 = vmatprep.mubr.msk.bf16.mxu0 %vm6519_vm1, %v6518_v1 }
 0x151   : > { %5364 = vmatmul.mubr.msk.bf16.gmra.mrb[16].mxu1 %vm419_vm3, %v7228_v4 }
 0x152   : > { %5369 = vmatprep.mubr.msk.bf16.mxu1 %vm6519_vm1, %v6518_v1 }
 0x155   : > { %5172 = vmatmul.mubr.msk.bf16.vlgmr.msra.gmra.mrb[0].mxu0 %vm419_vm3, %v7196_v17 }
 0x156   : > { %5390 = vmatpush3.bf16.msra.mxu0 %v6553_v2  ;;  %5175 = vmatprep.mubr.msk.bf16.mxu0 %vm6519_vm1, %v6518_v1 }
 0x157   : > { %5411 = vmatprep.subr.bf16.mxu0 %v6518_v1 }
 0x159   : > { %5370 = vmatmul.mubr.msk.bf16.vlgmr.msra.gmra.mrb[0].mxu1 %vm419_vm3, %v7260_v29 }
 0x15a   : > { %5588 = vmatpush3.bf16.msra.mxu1 %v6553_v2  ;;  %5373 = vmatprep.mubr.msk.bf16.mxu1 %vm6519_vm1, %v6518_v1  ;;  %v2526_v2 = vrot.slane %v7106_v31, 2 }
 0x15b   : > { %5609 = vmatprep.subr.bf16.mxu1 %v6518_v1 }
 0x15c   : > { %v7286_v42 = vsel %vm837_vm7, %v2524_v34, %v2526_v2  ;;  %v7301_v31 = vsel %vm837_vm7, %v2526_v2, %v7293_v22 }
 0x15d   : > { %5176 = vmatmul.mubr.msk.bf16.gmra.mrb[4].mxu0 %vm419_vm3, %v7210_v58 }
 0x15e   : > { %5179 = vmatprep.mubr.msk.bf16.mxu0 %vm6519_vm1, %v6518_v1 }
 0x161   : > { %5374 = vmatmul.mubr.msk.bf16.gmra.mrb[4].mxu1 %vm419_vm3, %v7274_v16 }
 0x162   : > { %5377 = vmatprep.mubr.msk.bf16.mxu1 %vm6519_vm1, %v6518_v1 }
 0x165   : > { %5180 = vmatmul.mubr.msk.bf16.gmra.mrb[8].mxu0 %vm419_vm3, %v7222_v59 }
 0x166   : > { %5183 = vmatprep.mubr.msk.bf16.mxu0 %vm6519_vm1, %v6518_v1 }
 0x169   : > { %5378 = vmatmul.mubr.msk.bf16.gmra.mrb[8].mxu1 %vm419_vm3, %v7286_v42 }
 0x16a   : > { %5381 = vmatprep.mubr.msk.bf16.mxu1 %vm6519_vm1, %v6518_v1 }
 0x16d   : > { %5184 = vmatmul.mubr.msk.bf16.gmra.mrb[12].mxu0 %vm419_vm3, %v7236_v18 }
 0x16e   : > { %5187 = vmatprep.mubr.msk.bf16.mxu0 %vm6519_vm1, %v6518_v1 }
 0x171   : > { %5382 = vmatmul.mubr.msk.bf16.gmra.mrb[12].mxu1 %vm419_vm3, %v7301_v31 }
 0x172   : > { %5385 = vmatprep.mubr.msk.bf16.mxu1 %vm6519_vm1, %v6518_v1 }
 0x175   : > { %5188 = vmatmul.mubr.msk.bf16.gmra.mrb[16].mxu0 %vm419_vm3, %v7228_v4 }
 0x176   : > { %5391 = vmatprep.mubr.msk.bf16.mxu0 %vm6519_vm1, %v6518_v1 }
 0x179   : > { %5386 = vmatmul.mubr.msk.bf16.gmra.mrb[16].mxu1 %vm419_vm3, %v7293_v22 }
 0x17a   : > { %5589 = vmatprep.mubr.msk.bf16.mxu1 %vm6519_vm1, %v6518_v1 }
 0x17d   : > { %5392 = vmatmul.mubr.msk.bf16.vlgmr.msra.gmra.mrb[20].mxu0 %vm419_vm3, %v6845_v5 }
 0x17e   : > { %5412 = vmatpush3.bf16.msra.mxu0 %v6580_v10  ;;  %5395 = vmatprep.mubr.msk.bf16.mxu0 %vm6519_vm1, %v6518_v1 }
 0x17f   : > { %5433 = vmatprep.subr.bf16.mxu0 %v6518_v1 }
 0x181   : > { %5590 = vmatmul.mubr.msk.bf16.vlgmr.msra.gmra.mrb[20].mxu1 %vm419_vm3, %v6941_v41 }
 0x182   : > { %5610 = vmatpush3.bf16.msra.mxu1 %v6580_v10  ;;  %5593 = vmatprep.mubr.msk.bf16.mxu1 %vm6519_vm1, %v6518_v1  ;;  %v181_v10 = vlaneseq }
 0x183   : > { %5631 = vmatprep.subr.bf16.mxu1 %v6518_v1 }
 0x185   : > { %5396 = vmatmul.mubr.msk.bf16.gmra.mrb[24].mxu0 %vm419_vm3, %v6868_v14 }
 0x186   : > { %5399 = vmatprep.mubr.msk.bf16.mxu0 %vm6519_vm1, %v6518_v1 }
 0x189   : > { %5594 = vmatmul.mubr.msk.bf16.gmra.mrb[24].mxu1 %vm419_vm3, %v6957_v52 }
 0x18a   : > { %5597 = vmatprep.mubr.msk.bf16.mxu1 %vm6519_vm1, %v6518_v1 }
 0x18d   : > { %5400 = vmatmul.mubr.msk.bf16.gmra.mrb[28].mxu0 %vm419_vm3, %v6889_v21 }
 0x18e   : > { %5403 = vmatprep.mubr.msk.bf16.mxu0 %vm6519_vm1, %v6518_v1 }
 0x191   : > { %5598 = vmatmul.mubr.msk.bf16.gmra.mrb[28].mxu1 %vm419_vm3, %v6968_v62 }
 0x192   : > { %5601 = vmatprep.mubr.msk.bf16.mxu1 %vm6519_vm1, %v6518_v1 }
 0x195   : > { %5404 = vmatmul.mubr.msk.bf16.gmra.mrb[32].mxu0 %vm419_vm3, %v6908_v12 }
 0x196   : > { %5407 = vmatprep.mubr.msk.bf16.mxu0 %vm6519_vm1, %v6518_v1 }
 0x199   : > { %5602 = vmatmul.mubr.msk.bf16.gmra.mrb[32].mxu1 %vm419_vm3, %v6982_v3 }
 0x19a   : > { %5605 = vmatprep.mubr.msk.bf16.mxu1 %vm6519_vm1, %v6518_v1 }
 0x19d   : > { %5408 = vmatmul.mubr.msk.bf16.gmra.mrb[36].mxu0 %vm419_vm3, %v6900_v25 }
 0x19e   : > { %5413 = vmatprep.mubr.msk.bf16.mxu0 %vm6519_vm1, %v6518_v1 }
 0x1a1   : > { %5606 = vmatmul.mubr.msk.bf16.gmra.mrb[36].mxu1 %vm419_vm3, %v6972_v0 }
 0x1a2   : > { %5611 = vmatprep.mubr.msk.bf16.mxu1 %vm6519_vm1, %v6518_v1 }
 0x1a5   : > { %5414 = vmatmul.mubr.msk.bf16.vlgmr.msra.gmra.mrb[20].mxu0 %vm419_vm3, %v6823_v61 }
 0x1a6   : > { %5434 = vmatpush3.bf16.msra.mxu0 %v6687_v23  ;;  %5417 = vmatprep.mubr.msk.bf16.mxu0 %vm6519_vm1, %v6518_v1 }
 0x1a7   : > { %5455 = vmatprep.subr.bf16.mxu0 %v6518_v1 }
 0x1a9   : > { %5612 = vmatmul.mubr.msk.bf16.vlgmr.msra.gmra.mrb[20].mxu1 %vm419_vm3, %v6845_v5 }
 0x1aa   : > { %5632 = vmatpush3.bf16.msra.mxu1 %v6687_v23  ;;  %5615 = vmatprep.mubr.msk.bf16.mxu1 %vm6519_vm1, %v6518_v1  ;;  %v7461_v23 = vshrl.u32 %v181_v10, 7 }
 0x1ab   : > { %5653 = vmatprep.subr.bf16.mxu1 %v6518_v1 }
 0x1ac   : > { %v185_v5 = vadd.s32 24, %v7461_v23  ;;  %v7537_v50 = vadd.s32 56, %v7461_v23  ;;  %v7560_v10 = vadd.s32 64, %v7461_v23 }
 0x1ad   : > { %5418 = vmatmul.mubr.msk.bf16.gmra.mrb[24].mxu0 %vm419_vm3, %v6848_v6 }
 0x1ae   : > { %5421 = vmatprep.mubr.msk.bf16.mxu0 %vm6519_vm1, %v6518_v1  ;;  %v7556_v34 = vmul.u32.u64.low 3817748708, %v7537_v50  ;;  %v7557_v2 = vmul.u32.u64.high 3817748708, %v7537_v50, %v7556_v34 }
 0x1b1   : > { %5616 = vmatmul.mubr.msk.bf16.gmra.mrb[24].mxu1 %vm419_vm3, %v6868_v14 }
 0x1b2   : > { %5619 = vmatprep.mubr.msk.bf16.mxu1 %vm6519_vm1, %v6518_v1 }
 0x1b5   : > { %5422 = vmatmul.mubr.msk.bf16.gmra.mrb[28].mxu0 %vm419_vm3, %v6871_v15 }
 0x1b6   : > { %5425 = vmatprep.mubr.msk.bf16.mxu0 %vm6519_vm1, %v6518_v1 }
 0x1b9   : > { %5620 = vmatmul.mubr.msk.bf16.gmra.mrb[28].mxu1 %vm419_vm3, %v6889_v21 }
 0x1ba   : > { %5623 = vmatprep.mubr.msk.bf16.mxu1 %vm6519_vm1, %v6518_v1 }
 0x1bd   : > { %5426 = vmatmul.mubr.msk.bf16.gmra.mrb[32].mxu0 %vm419_vm3, %v6894_v24  ;;  %v7496_v21 = vmul.u32.u64.low 3817748708, %v185_v5  ;;  %v7497_v24 = vmul.u32.u64.high 3817748708, %v185_v5, %v7496_v21 }
 0x1be   : > { %5429 = vmatprep.mubr.msk.bf16.mxu0 %vm6519_vm1, %v6518_v1 }
 0x1c1   : > { %5624 = vmatmul.mubr.msk.bf16.gmra.mrb[32].mxu1 %vm419_vm3, %v6908_v12 }
 0x1c2   : > { %5627 = vmatprep.mubr.msk.bf16.mxu1 %vm6519_vm1, %v6518_v1 }
 0x1c5   : > { %5430 = vmatmul.mubr.msk.bf16.gmra.mrb[36].mxu0 %vm419_vm3, %v6886_v20 }
 0x1c6   : > { %5435 = vmatprep.mubr.msk.bf16.mxu0 %vm6519_vm1, %v6518_v1 }
 0x1c9   : > { %5628 = vmatmul.mubr.msk.bf16.gmra.mrb[36].mxu1 %vm419_vm3, %v6900_v25 }
 0x1ca   : > { %5633 = vmatprep.mubr.msk.bf16.mxu1 %vm6519_vm1, %v6518_v1 }
 0x1cd   : > { %5436 = vmatmul.mubr.msk.bf16.vlgmr.msra.gmra.mrb[20].mxu0 %vm419_vm3, %v6941_v41  ;;  %v186_v41 = vadd.s32 32, %v7461_v23 }
 0x1ce   : > { %5456 = vmatpush3.bf16.msra.mxu0 %v6748_v43  ;;  %5439 = vmatprep.mubr.msk.bf16.mxu0 %vm6519_vm1, %v6518_v1 }
 0x1cf   : > { %5477 = vmatprep.subr.bf16.mxu0 %v6518_v1 }
 0x1d1   : > { %5634 = vmatmul.mubr.msk.bf16.vlgmr.msra.gmra.mrb[20].mxu1 %vm419_vm3, %v6751_v44 }
 0x1d2   : > { %5654 = vmatpush3.bf16.msra.mxu1 %v6748_v43  ;;  %5637 = vmatprep.mubr.msk.bf16.mxu1 %vm6519_vm1, %v6518_v1  ;;  %v183_v43 = vadd.s32 8, %v7461_v23 }
 0x1d3   : > { %5675 = vmatprep.subr.bf16.mxu1 %v6518_v1 }
 0x1d5   : > { %5440 = vmatmul.mubr.msk.bf16.gmra.mrb[24].mxu0 %vm419_vm3, %v6957_v52 }
 0x1d6   : > { %5443 = vmatprep.mubr.msk.bf16.mxu0 %vm6519_vm1, %v6518_v1 }
 0x1d9   : > { %5638 = vmatmul.mubr.msk.bf16.gmra.mrb[24].mxu1 %vm419_vm3, %v6767_v51  ;;  %v7471_v44 = vmul.u32.u64.low 3817748708, %v7461_v23  ;;  %v7472_v51 = vmul.u32.u64.high 3817748708, %v7461_v23, %v7471_v44 }
 0x1da   : > { %5641 = vmatprep.mubr.msk.bf16.mxu1 %vm6519_vm1, %v6518_v1 }
 0x1db   : > { %v197_v6 = vshrl.u32 %v7472_v51, 3 }
 0x1dd   : > { %5444 = vmatmul.mubr.msk.bf16.gmra.mrb[28].mxu0 %vm419_vm3, %v6968_v62  ;;  %v198_v25 = vmul.u32 9, %v197_v6  ;;  %v7506_v62 = vadd.s32 40, %v7461_v23 }
 0x1de   : > { %5447 = vmatprep.mubr.msk.bf16.mxu0 %vm6519_vm1, %v6518_v1 }
 0x1df   : > { %v199_v52 = vsub.s32 %v7461_v23, %v198_v25 }
 0x1e1   : > { %5642 = vmatmul.mubr.msk.bf16.gmra.mrb[28].mxu1 %vm419_vm3, %v6785_v56  ;;  %v7476_v56 = vmul.u32.u64.low 3817748708, %v183_v43  ;;  %v7477_v61 = vmul.u32.u64.high 3817748708, %v183_v43, %v7476_v56  ;;  %vm290_vm10 = vcmp.ne.s32.totalorder %v199_v52, 0  ;;  %vm299_vm11 = vcmp.lt.s32.totalorder %v199_v52, 0 }
 0x1e2   : > { %5645 = vmatprep.mubr.msk.bf16.mxu1 %vm6519_vm1, %v6518_v1  ;;  %vm7526_vm14 = vmand %vm299_vm11, %vm290_vm10  ;;  %v317_v40 = vadd.s32 9, %v199_v52 }
 0x1e3   : > { %v208_v14 = vshrl.u32 %v7477_v61, 3 }
 0x1e4   : > { %v326_v9 = vsel %vm7526_vm14, %v317_v40, %v199_v52 }
 0x1e5   : > { %5448 = vmatmul.mubr.msk.bf16.gmra.mrb[32].mxu0 %vm419_vm3, %v6982_v3  ;;  %v209_v12 = vmul.u32 9, %v208_v14  ;;  %vm335_vm7 = vcmp.ne.s32.totalorder %v326_v9, 8 }
 0x1e6   : > { %5451 = vmatprep.mubr.msk.bf16.mxu0 %vm6519_vm1, %v6518_v1 }
 0x1e9   : > { %5646 = vmatmul.mubr.msk.bf16.gmra.mrb[32].mxu1 %vm419_vm3, %v7053_v32 }
 0x1ea   : > { %5649 = vmatprep.mubr.msk.bf16.mxu1 %vm6519_vm1, %v6518_v1 }
 0x1ed   : > { %5452 = vmatmul.mubr.msk.bf16.gmra.mrb[36].mxu0 %vm419_vm3, %v6972_v0  ;;  %v210_v0 = vsub.s32 %v183_v43, %v209_v12  ;;  %v274_v12 = vshrl.u32 %v7557_v2, 3 }
 0x1ee   : > { %5457 = vmatprep.mubr.msk.bf16.mxu0 %vm6519_vm1, %v6518_v1 }
 0x1ef   : > { %vm291_vm12 = vcmp.ne.s32.totalorder %v210_v0, 0  ;;  %vm300_vm13 = vcmp.lt.s32.totalorder %v210_v0, 0  ;;  %v318_v55 = vadd.s32 9, %v210_v0 }
 0x1f0   : > { %vm7532_vm15 = vmand %vm300_vm13, %vm291_vm12 }
 0x1f1   : > { %5650 = vmatmul.mubr.msk.bf16.gmra.mrb[36].mxu1 %vm419_vm3, %v7037_v27  ;;  %v7511_v27 = vmul.u32.u64.low 3817748708, %v186_v41  ;;  %v7512_v32 = vmul.u32.u64.high 3817748708, %v186_v41, %v7511_v27  ;;  %v327_v11 = vsel %vm7532_vm15, %v318_v55, %v210_v0 }
 0x1f2   : > { %5655 = vmatprep.mubr.msk.bf16.mxu1 %vm6519_vm1, %v6518_v1  ;;  %vm7564_vm10 = vcmp.ne.s32.totalorder %v327_v11, 8 }
 0x1f3   : > { %v241_v30 = vshrl.u32 %v7512_v32, 3 }
 0x1f5   : > { %5458 = vmatmul.mubr.msk.bf16.vlgmr.msra.gmra.mrb[20].mxu0 %vm419_vm3, %v7080_v57  ;;  %v230_v57 = vshrl.u32 %v7497_v24, 3  ;;  %v242_v43 = vmul.u32 9, %v241_v30 }
 0x1f6   : > { %5478 = vmatpush3.bf16.msra.mxu0 %v6831_v63  ;;  %5461 = vmatprep.mubr.msk.bf16.mxu0 %vm6519_vm1, %v6518_v1 }
 0x1f7   : > { %5499 = vmatprep.subr.bf16.mxu0 %v6518_v1  ;;  %v231_v37 = vmul.u32 9, %v230_v57 }
 0x1f9   : > { %5656 = vmatmul.mubr.msk.bf16.vlgmr.msra.gmra.mrb[20].mxu1 %vm419_vm3, %v7103_v19  ;;  %v232_v8 = vsub.s32 %v185_v5, %v231_v37 }
 0x1fa   : > { %5676 = vmatpush3.bf16.msra.mxu1 %v6831_v63  ;;  %5659 = vmatprep.mubr.msk.bf16.mxu1 %vm6519_vm1, %v6518_v1  ;;  %v184_v63 = vadd.s32 16, %v7461_v23 }
 0x1fb   : > { %5697 = vmatprep.subr.bf16.mxu1 %v6518_v1  ;;  %vm293_vm4 = vcmp.ne.s32.totalorder %v232_v8, 0  ;;  %vm302_vm5 = vcmp.lt.s32.totalorder %v232_v8, 0  ;;  %v320_v56 = vadd.s32 9, %v232_v8 }
 0x1fc   : > { %v7491_v15 = vmul.u32.u64.low 3817748708, %v184_v63  ;;  %v7492_v20 = vmul.u32.u64.high 3817748708, %v184_v63, %v7491_v15  ;;  %vm7581_vm12 = vmand %vm302_vm5, %vm293_vm4 }
 0x1fd   : > { %5462 = vmatmul.mubr.msk.bf16.gmra.mrb[24].mxu0 %vm419_vm3, %v7109_v33  ;;  %v7518_v33 = vmul.u32.u64.low 3817748708, %v7506_v62  ;;  %v7519_v26 = vmul.u32.u64.high 3817748708, %v7506_v62, %v7518_v33  ;;  %v7588_v15 = vsel %vm335_vm7, 1.0, %v6518_v1  ;;  %v329_v24 = vsel %vm7581_vm12, %v320_v56, %v232_v8 }
 0x1fe   : > { %5465 = vmatprep.mubr.msk.bf16.mxu0 %vm6519_vm1, %v6518_v1  ;;  %v219_v3 = vshrl.u32 %v7492_v20, 3  ;;  %v7595_v20 = vsel %vm7564_vm10, 1.0, %v6518_v1 }
 0x201   : > { %5660 = vmatmul.mubr.msk.bf16.gmra.mrb[24].mxu1 %vm419_vm3, %v7127_v47 }
 0x202   : > { %5663 = vmatprep.mubr.msk.bf16.mxu1 %vm6519_vm1, %v6518_v1 }
 0x205   : > { %5466 = vmatmul.mubr.msk.bf16.gmra.mrb[28].mxu0 %vm419_vm3, %v7133_v53  ;;  %v220_v53 = vmul.u32 9, %v219_v3 }
 0x206   : > { %5469 = vmatprep.mubr.msk.bf16.mxu0 %vm6519_vm1, %v6518_v1 }
 0x207   : > { %v221_v54 = vsub.s32 %v184_v63, %v220_v53  ;;  %v7576_v63 = vmul.u32.u64.low 3817748708, %v7560_v10  ;;  %v7577_v5 = vmul.u32.u64.high 3817748708, %v7560_v10, %v7576_v63 }
 0x209   : > { %5664 = vmatmul.mubr.msk.bf16.gmra.mrb[28].mxu1 %vm419_vm3, %v7147_v13  ;;  %vm292_vm0 = vcmp.ne.s32.totalorder %v221_v54, 0  ;;  %vm301_vm2 = vcmp.lt.s32.totalorder %v221_v54, 0  ;;  %v319_v51 = vadd.s32 9, %v221_v54  ;;  %v285_v53 = vshrl.u32 %v7577_v5, 3 }
 0x20a   : > { %5667 = vmatprep.mubr.msk.bf16.mxu1 %vm6519_vm1, %v6518_v1  ;;  %vm7571_vm11 = vmand %vm301_vm2, %vm292_vm0  ;;  %vm7609_vm0 = vcmp.ne.s32.totalorder %v329_v24, 8 }
 0x20b   : > { %v328_v21 = vsel %vm7571_vm11, %v319_v51, %v221_v54  ;;  %v286_v2 = vmul.u32 9, %v285_v53 }
 0x20c   : > { %vm337_vm15 = vcmp.ne.s32.totalorder %v328_v21, 8 }
 0x20d   : > { %5470 = vmatmul.mubr.msk.bf16.gmra.mrb[32].mxu0 %vm419_vm3, %v7150_v28  ;;  %v7522_v28 = vadd.s32 48, %v7461_v23  ;;  %v7628_v54 = vsel %vm337_vm15, 1.0, %v6518_v1 }
 0x20e   : > { %5473 = vmatprep.mubr.msk.bf16.mxu0 %vm6519_vm1, %v6518_v1 }
 0x20f   : > { %v7543_v48 = vmul.u32.u64.low 3817748708, %v7522_v28  ;;  %v7544_v46 = vmul.u32.u64.high 3817748708, %v7522_v28, %v7543_v48 }
 0x211   : > { %5668 = vmatmul.mubr.msk.bf16.gmra.mrb[32].mxu1 %vm419_vm3, %v7164_v38  ;;  %v263_v14 = vshrl.u32 %v7544_v46, 3 }
 0x212   : > { %5671 = vmatprep.mubr.msk.bf16.mxu1 %vm6519_vm1, %v6518_v1 }
 0x213   : > { %v264_v0 = vmul.u32 9, %v263_v14 }
 0x215   : > { %5474 = vmatmul.mubr.msk.bf16.gmra.mrb[36].mxu0 %vm419_vm3, %v7166_v39  ;;  %v7625_v55 = vsub.s32 %v7522_v28, %v264_v0 }
 0x216   : > { %5479 = vmatprep.mubr.msk.bf16.mxu0 %vm6519_vm1, %v6518_v1 }
 0x217   : > { %vm296_vm10 = vcmp.ne.s32.totalorder %v7625_v55, 0  ;;  %vm305_vm11 = vcmp.lt.s32.totalorder %v7625_v55, 0  ;;  %v323_v5 = vadd.s32 9, %v7625_v55 }
 0x219   : > { %5672 = vmatmul.mubr.msk.bf16.gmra.mrb[36].mxu1 %vm419_vm3, %v7156_v35 }
 0x21a   : > { %5677 = vmatprep.mubr.msk.bf16.mxu1 %vm6519_vm1, %v6518_v1 }
 0x21d   : > { %5480 = vmatmul.mubr.msk.bf16.vlgmr.msra.gmra.mrb[20].mxu0 %vm419_vm3, %v7103_v19  ;;  %v252_v19 = vshrl.u32 %v7519_v26, 3  ;;  %v275_v26 = vmul.u32 9, %v274_v12 }
 0x21e   : > { %5500 = vmatpush3.bf16.msra.mxu0 %v6928_v36  ;;  %5483 = vmatprep.mubr.msk.bf16.mxu0 %vm6519_vm1, %v6518_v1 }
 0x21f   : > { %5521 = vmatprep.subr.bf16.mxu0 %v6518_v1  ;;  %v253_v61 = vmul.u32 9, %v252_v19  ;;  %v7647_v19 = vsel %vm7609_vm0, 1.0, %v6518_v1  ;;  %v7650_v34 = vsub.s32 %v7537_v50, %v275_v26 }
 0x221   : > { %5678 = vmatmul.mubr.msk.bf16.vlgmr.msra.gmra.mrb[20].mxu1 %vm419_vm3, %v7196_v17  ;;  %v7602_v25 = vsub.s32 %v7506_v62, %v253_v61  ;;  %vm306_vm15 = vcmp.lt.s32.totalorder %v7650_v34, 0 }
 0x222   : > { %5698 = vmatpush3.bf16.msra.mxu1 %v6928_v36  ;;  %5681 = vmatprep.mubr.msk.bf16.mxu1 %vm6519_vm1, %v6518_v1  ;;  %v243_v36 = vsub.s32 %v186_v41, %v242_v43 }
 0x223   : > { %5719 = vmatprep.subr.bf16.mxu1 %v6518_v1  ;;  %vm295_vm4 = vcmp.ne.s32.totalorder %v7602_v25, 0  ;;  %vm304_vm5 = vcmp.lt.s32.totalorder %v7602_v25, 0  ;;  %v322_v30 = vadd.s32 9, %v7602_v25 }
 0x224   : > { %vm294_vm13 = vcmp.ne.s32.totalorder %v243_v36, 0  ;;  %vm303_vm14 = vcmp.lt.s32.totalorder %v243_v36, 0  ;;  %v321_v62 = vadd.s32 9, %v243_v36  ;;  %vm7640_vm7 = vmand %vm304_vm5, %vm295_vm4 }
 0x225   : > { %5484 = vmatmul.mubr.msk.bf16.gmra.mrb[24].mxu0 %vm419_vm3, %v7127_v47  ;;  %vm7615_vm2 = vmand %vm303_vm14, %vm294_vm13  ;;  %v331_v50 = vsel %vm7640_vm7, %v322_v30, %v7602_v25  ;;  %vm297_vm14 = vcmp.ne.s32.totalorder %v7650_v34, 0  ;;  %v7678_v25 = vsub.s32 %v7560_v10, %v286_v2  ;;  %v324_v10 = vadd.s32 9, %v7650_v34 }
 0x226   : > { %5487 = vmatprep.mubr.msk.bf16.mxu0 %vm6519_vm1, %v6518_v1  ;;  %v330_v9 = vsel %vm7615_vm2, %v321_v62, %v243_v36  ;;  %vm7671_vm13 = vmand %vm305_vm11, %vm296_vm10  ;;  %vm340_vm0 = vcmp.ne.s32.totalorder %v331_v50, 8 }
 0x227   : > { %vm7656_vm12 = vcmp.ne.s32.totalorder %v330_v9, 8  ;;  %vm7698_vm2 = vmand %vm306_vm15, %vm297_vm14  ;;  %vm298_vm4 = vcmp.ne.s32.totalorder %v7678_v25, 0  ;;  %vm307_vm5 = vcmp.lt.s32.totalorder %v7678_v25, 0 }
 0x228   : > { %v1665_v47 = vpop.f32.mrb[0].mxu0  ;;  %vm7726_vm10 = vmand %vm307_vm5, %vm298_vm4 }
 0x229   : > { %v1712_v41 = vmul.f32 %v7588_v15, %v1665_v47  ;;  %v5173_v52 = vpop.f32.mrb[1].mxu0  ;;  %5682 = vmatmul.mubr.msk.bf16.gmra.mrb[24].mxu1 %vm419_vm3, %v7210_v58 }
 0x22a   : > { %v1668_v3 = vpop.f32.mrb[2].mxu0  ;;  %5685 = vmatprep.mubr.msk.bf16.mxu1 %vm6519_vm1, %v6518_v1 }
 0x22b   : > { %v1713_v27 = vmul.f32 %v7595_v20, %v1668_v3  ;;  %v5174_v32 = vpop.f32.mrb[3].mxu0  ;;  %v1736_v37 = vmul.f32 %v1712_v41, %v1665_v47 }
 0x22c   : > { %v2579_v45 = vpop.f32.mrb[0].mxu1  ;;  %v7685_v32 = vsel %vm7656_vm12, 1.0, %v6518_v1 }
 0x22d   : > { %v1721_v39 = vadd.f32 %v1713_v27, %v1712_v41  ;;  %v1737_v40 = vmul.f32 %v1713_v27, %v1668_v3  ;;  %5488 = vmatmul.mubr.msk.bf16.gmra.mrb[28].mxu0 %vm419_vm3, %v7147_v13  ;;  %v2626_v46 = vmul.f32 %v7588_v15, %v2579_v45  ;;  %v5371_v8 = vpop.f32.mrb[1].mxu1  ;;  %v333_v13 = vsel %vm7698_vm2, %v324_v10, %v7650_v34 }
 0x22e   : > { %5491 = vmatprep.mubr.msk.bf16.mxu0 %vm6519_vm1, %v6518_v1  ;;  %v2582_v28 = vpop.f32.mrb[2].mxu1  ;;  %vm342_vm11 = vcmp.ne.s32.totalorder %v333_v13, 8 }
 0x22f   : > { %v1745_v48 = vadd.f32 %v1737_v40, %v1736_v37  ;;  %v2627_v43 = vmul.f32 %v7595_v20, %v2582_v28  ;;  %v5372_v44 = vpop.f32.mrb[3].mxu1  ;;  %v2650_v56 = vmul.f32 %v2626_v46, %v2579_v45 }
 0x230   : > { %v1673_v11 = vpop.f32.mrb[4].mxu0 }
 0x231   : > { %v1714_v51 = vmul.f32 %v7628_v54, %v1673_v11  ;;  %v5177_v23 = vpop.f32.mrb[5].mxu0  ;;  %v2635_v6 = vadd.f32 %v2627_v43, %v2626_v46  ;;  %v2651_v36 = vmul.f32 %v2627_v43, %v2582_v28  ;;  %5686 = vmatmul.mubr.msk.bf16.gmra.mrb[28].mxu1 %vm419_vm3, %v7222_v59  ;;  %v325_v28 = vadd.s32 9, %v7678_v25 }
 0x232   : > { %v1676_v61 = vpop.f32.mrb[6].mxu0  ;;  %5689 = vmatprep.mubr.msk.bf16.mxu1 %vm6519_vm1, %v6518_v1 }
 0x233   : > { %v1722_v14 = vadd.f32 %v1721_v39, %v1714_v51  ;;  %v1738_v47 = vmul.f32 %v1714_v51, %v1673_v11  ;;  %v5178_v21 = vpop.f32.mrb[7].mxu0  ;;  %v1715_v24 = vmul.f32 %v7647_v19, %v1676_v61  ;;  %v2659_v41 = vadd.f32 %v2651_v36, %v2650_v56 }
 0x234   : > { %v2587_v27 = vpop.f32.mrb[4].mxu1  ;;  %v7703_v39 = vsel %vm340_vm0, 1.0, %v6518_v1 }
 0x235   : > { %v1746_v52 = vadd.f32 %v1745_v48, %v1738_v47  ;;  %5492 = vmatmul.mubr.msk.bf16.gmra.mrb[32].mxu0 %vm419_vm3, %v7164_v38  ;;  %v1723_v0 = vadd.f32 %v1722_v14, %v1715_v24  ;;  %v1739_v3 = vmul.f32 %v1715_v24, %v1676_v61  ;;  %v2628_v57 = vmul.f32 %v7628_v54, %v2587_v27  ;;  %v5375_v62 = vpop.f32.mrb[5].mxu1 }
 0x236   : > { %5495 = vmatprep.mubr.msk.bf16.mxu0 %vm6519_vm1, %v6518_v1  ;;  %v332_v38 = vsel %vm7671_vm13, %v323_v5, %v7625_v55  ;;  %v2590_v53 = vpop.f32.mrb[6].mxu1 }
 0x237   : > { %v1747_v26 = vadd.f32 %v1746_v52, %v1739_v3  ;;  %v2636_v40 = vadd.f32 %v2635_v6, %v2628_v57  ;;  %v2652_v55 = vmul.f32 %v2628_v57, %v2587_v27  ;;  %v2629_v45 = vmul.f32 %v7647_v19, %v2590_v53  ;;  %v5376_v30 = vpop.f32.mrb[7].mxu1 }
 0x238   : > { %v1681_v37 = vpop.f32.mrb[8].mxu0  ;;  %vm7709_vm7 = vcmp.ne.s32.totalorder %v332_v38, 8 }
 0x239   : > { %v1716_v48 = vmul.f32 %v7685_v32, %v1681_v37  ;;  %v5181_v46 = vpop.f32.mrb[9].mxu0  ;;  %v2660_v11 = vadd.f32 %v2659_v41, %v2652_v55  ;;  %v2637_v2 = vadd.f32 %v2636_v40, %v2629_v45  ;;  %v2653_v43 = vmul.f32 %v2629_v45, %v2590_v53  ;;  %5690 = vmatmul.mubr.msk.bf16.gmra.mrb[32].mxu1 %vm419_vm3, %v7236_v18 }
 0x23a   : > { %v1684_v8 = vpop.f32.mrb[10].mxu0  ;;  %5693 = vmatprep.mubr.msk.bf16.mxu1 %vm6519_vm1, %v6518_v1  ;;  %v7735_v36 = vsel %vm7709_vm7, 1.0, %v6518_v1  ;;  %v7744_v41 = vsel %vm342_vm11, 1.0, %v6518_v1 }
 0x23b   : > { %v1724_v44 = vadd.f32 %v1723_v0, %v1716_v48  ;;  %v5182_v51 = vpop.f32.mrb[11].mxu0  ;;  %v1740_v23 = vmul.f32 %v1716_v48, %v1681_v37  ;;  %v1717_v56 = vmul.f32 %v7703_v39, %v1684_v8  ;;  %v2661_v61 = vadd.f32 %v2660_v11, %v2653_v43 }
 0x23c   : > { %v2595_v6 = vpop.f32.mrb[8].mxu1 }
 0x23d   : > { %5496 = vmatmul.mubr.msk.bf16.gmra.mrb[36].mxu0 %vm419_vm3, %v7156_v35  ;;  %v1748_v63 = vadd.f32 %v1747_v26, %v1740_v23  ;;  %v1725_v50 = vadd.f32 %v1724_v44, %v1717_v56  ;;  %v1741_v5 = vmul.f32 %v1717_v56, %v1684_v8  ;;  %v2630_v14 = vmul.f32 %v7685_v32, %v2595_v6  ;;  %v5379_v47 = vpop.f32.mrb[9].mxu1 }
 0x23e   : > { %5501 = vmatprep.mubr.msk.bf16.mxu0 %vm6519_vm1, %v6518_v1  ;;  %v334_v35 = vsel %vm7726_vm10, %v325_v28, %v7678_v25  ;;  %v2598_v24 = vpop.f32.mrb[10].mxu1 }
 0x23f   : > { %v1749_v21 = vadd.f32 %v1748_v63, %v1741_v5  ;;  %v2638_v52 = vadd.f32 %v2637_v2, %v2630_v14  ;;  %v2654_v0 = vmul.f32 %v2630_v14, %v2595_v6  ;;  %v2631_v3 = vmul.f32 %v7703_v39, %v2598_v24  ;;  %v5380_v27 = vpop.f32.mrb[11].mxu1 }
 0x240   : > { %v1689_v12 = vpop.f32.mrb[12].mxu0  ;;  %vm7748_vm12 = vcmp.ne.s32.totalorder %v334_v35, 8 }
 0x241   : > { %v1718_v10 = vmul.f32 %v7735_v36, %v1689_v12  ;;  %v5185_v57 = vpop.f32.mrb[13].mxu0  ;;  %v2662_v25 = vadd.f32 %v2661_v61, %v2654_v0  ;;  %v2639_v33 = vadd.f32 %v2638_v52, %v2631_v3  ;;  %v2655_v26 = vmul.f32 %v2631_v3, %v2598_v24  ;;  %5694 = vmatmul.mubr.msk.bf16.gmra.mrb[36].mxu1 %vm419_vm3, %v7228_v4 }
 0x242   : > { %v1692_v62 = vpop.f32.mrb[14].mxu0  ;;  %5699 = vmatprep.mubr.msk.bf16.mxu1 %vm6519_vm1, %v6518_v1  ;;  %v7763_v9 = vsel %vm7748_vm12, 1.0, %v6518_v1 }
 0x243   : > { %v1726_v53 = vadd.f32 %v1725_v50, %v1718_v10  ;;  %v5186_v37 = vpop.f32.mrb[15].mxu0  ;;  %v1742_v40 = vmul.f32 %v1718_v10, %v1689_v12  ;;  %v1719_v55 = vmul.f32 %v7744_v41, %v1692_v62  ;;  %v2663_v45 = vadd.f32 %v2662_v25, %v2655_v26 }
 0x244   : > { %v2603_v8 = vpop.f32.mrb[12].mxu1 }
 0x245   : > { %5502 = vmatmul.mubr.msk.bf16.vlgmr.msra.gmra.mrb[20].mxu0 %vm419_vm3, %v7196_v17  ;;  %v1750_v30 = vadd.f32 %v1749_v21, %v1742_v40  ;;  %v1727_v48 = vadd.f32 %v1726_v53, %v1719_v55  ;;  %v1743_v46 = vmul.f32 %v1719_v55, %v1692_v62  ;;  %v2632_v13 = vmul.f32 %v7735_v36, %v2603_v8  ;;  %v5383_v28 = vpop.f32.mrb[13].mxu1 }
 0x246   : > { %5522 = vmatpush3.bf16.msra.mxu0 %v6998_v7  ;;  %5505 = vmatprep.mubr.msk.bf16.mxu0 %vm6519_vm1, %v6518_v1  ;;  %v2606_v11 = vpop.f32.mrb[14].mxu1  ;;  %v7796_v28 = vld [vmem:[%s6570_s19 + $0x64] sm:$0xff]  }
 0x247   : > { %5543 = vmatprep.subr.bf16.mxu0 %v6518_v1  ;;  %v1751_v17 = vadd.f32 %v1750_v30, %v1743_v46  ;;  %v2640_v43 = vadd.f32 %v2639_v33, %v2632_v13  ;;  %v2656_v44 = vmul.f32 %v2632_v13, %v2603_v8  ;;  %v2633_v51 = vmul.f32 %v7744_v41, %v2606_v11  ;;  %v5384_v23 = vpop.f32.mrb[15].mxu1  ;;  %v7792_v30 = vld [vmem:[%s6570_s19 + $0x60] sm:$0xf] }
 0x248   : > { %v1697_v2 = vpop.f32.mrb[16].mxu0 }
 0x249   : > { %v1720_v56 = vmul.f32 %v7763_v9, %v1697_v2  ;;  %v5189_v34 = vpop.f32.mrb[17].mxu0  ;;  %v2664_v63 = vadd.f32 %v2663_v45, %v2656_v44  ;;  %v2641_v50 = vadd.f32 %v2640_v43, %v2633_v51  ;;  %v2657_v5 = vmul.f32 %v2633_v51, %v2606_v11  ;;  %5700 = vmatmul.mubr.msk.bf16.vlgmr.msra.gmra.mrb[20].mxu1 %vm419_vm3, %v7260_v29  ;;  %v7804_v43 = vld [vmem:[%s6570_s19 + $0x8c] sm:$0xf] }
 0x24a   : > { %v1700_v61 = vpop.f32.mrb[18].mxu0  ;;  %5720 = vmatpush3.bf16.msra.mxu1 %v6998_v7  ;;  %5703 = vmatprep.mubr.msk.bf16.mxu1 %vm6519_vm1, %v6518_v1  ;;  %v7812_v34 = vld [vmem:[%s6570_s19 + $0x94] sm:$0xf] }
 0x24b   : > { %v1728_v6 = vadd.f32 %v1727_v48, %v1720_v56  ;;  %v5190_v14 = vpop.f32.mrb[19].mxu0  ;;  %v1744_v47 = vmul.f32 %v1720_v56, %v1697_v2  ;;  %v2665_v35 = vadd.f32 %v2664_v63, %v2657_v5  ;;  %5741 = vmatprep.subr.bf16.mxu1 %v6518_v1  ;;  %v3317_v2 = vld [vmem:[%s6570_s19 + $0x88] sm:$0x8]  ;;  %v7809_v56 = vld [vmem:[%s6570_s19 + $0x90] sm:$0xf]  ;;  %v3186_v63 = vshrl.u32 %v7796_v28, 16 }
 0x24c   : > { %v2611_v12 = vpop.f32.mrb[16].mxu1 }
 0x24d   : > { %v1729_v21 = vrot.slane %v1728_v6, 4  ;;  %5506 = vmatmul.mubr.msk.bf16.gmra.mrb[24].mxu0 %vm419_vm3, %v7210_v58  ;;  %v1752_v24 = vadd.f32 %v1751_v17, %v1744_v47  ;;  %v2634_v52 = vmul.f32 %v7763_v9, %v2611_v12  ;;  %v5387_v0 = vpop.f32.mrb[17].mxu1  ;;  %v4710_v47 = vcombine.low %v7809_v56, %v7812_v34 }
 0x24e   : > { %5509 = vmatprep.mubr.msk.bf16.mxu0 %vm6519_vm1, %v6518_v1  ;;  %v2614_v3 = vpop.f32.mrb[18].mxu1 }
 0x24f   : > { %v1730_v29 = vadd.f32 %v1729_v21, %v1728_v6  ;;  %v1753_v7 = vrot.slane %v1752_v24, 4  ;;  %v2642_v10 = vadd.f32 %v2641_v50, %v2634_v52  ;;  %v2658_v57 = vmul.f32 %v2634_v52, %v2611_v12  ;;  %v5388_v62 = vpop.f32.mrb[19].mxu1  ;;  %v7826_v52 = vld [vmem:[%s6570_s19 + $0x6c] sm:$0xff]  }
 0x250   : > { %v3189_v50 = vshll.u32 %v7796_v28, 16  ;;  %v3188_v12 = vrot.slane %v3186_v63, 2  ;;  %v3361_v3 = vshrl.u32 %v4710_v47, 16 }
 0x251   : > { %v1731_v27 = vrot.slane %v1730_v29, 2  ;;  %v1754_v58 = vadd.f32 %v1753_v7, %v1752_v24  ;;  %v2643_v38 = vrot.slane %v2642_v10, 4  ;;  %v2666_v25 = vadd.f32 %v2665_v35, %v2658_v57  ;;  %5704 = vmatmul.mubr.msk.bf16.gmra.mrb[24].mxu1 %vm419_vm3, %v7274_v16  ;;  %v3142_v16 = vld [vmem:[%s6570_s19 + $0x5c] sm:$0xc] }
 0x252   : > { %5707 = vmatprep.mubr.msk.bf16.mxu1 %vm6519_vm1, %v6518_v1  ;;  %v4699_v13 = vcombine.low %v3142_v16, %v7792_v30  ;;  %v7838_v57 = vld [vmem:[%s6570_s19 + $0x9c] sm:$0xf] }
 0x253   : > { %v1755_v33 = vrot.slane %v1754_v58, 2  ;;  %v1732_v26 = vadd.f32 %v1731_v27, %v1730_v29  ;;  %v2644_v53 = vadd.f32 %v2643_v38, %v2642_v10  ;;  %v2667_v37 = vrot.slane %v2666_v25, 4  ;;  %v7835_v10 = vld [vmem:[%s6570_s19 + $0x98] sm:$0xf] }
 0x254   : > { %v3181_v61 = vshll.u32 %v4699_v13, 16  ;;  %v3191_v29 = vrot.slane %v3189_v50, 3  ;;  %v3364_v27 = vshll.u32 %v4710_v47, 16  ;;  %v3198_v38 = vshll.u32 %v7826_v52, 16  ;;  %v7872_v50 = vld [vmem:[%s6570_s19 + $0x7c] sm:$0x7f]  }
 0x255   : > { %5510 = vmatmul.mubr.msk.bf16.gmra.mrb[28].mxu0 %vm419_vm3, %v7222_v59  ;;  %v1756_v40 = vadd.f32 %v1755_v33, %v1754_v58  ;;  %v2645_v55 = vrot.slane %v2644_v53, 2  ;;  %v2668_v45 = vadd.f32 %v2667_v37, %v2666_v25  ;;  %v1733_v48 = vrot.slane %v1732_v26, 1  ;;  %v7880_v47 = vld [vmem:[%s6570_s19 + $0xa8] sm:$0xf] }
 0x256   : > { %5513 = vmatprep.mubr.msk.bf16.mxu0 %vm6519_vm1, %v6518_v1  ;;  %v3183_v24 = vrot.slane %v3181_v61, 3  ;;  %v3195_v58 = vshrl.u32 %v7826_v52, 16 }
 0x257   : > { %v2646_v46 = vadd.f32 %v2645_v55, %v2644_v53  ;;  %v2669_v8 = vrot.slane %v2668_v45, 2  ;;  %v1757_v59 = vrot.slane %v1756_v40, 1  ;;  %v1734_v44 = vadd.f32 %v1733_v48, %v1732_v26 }
 0x258   : > { %v3363_v26 = vrot.slane %v3361_v3, 3  ;;  %v4711_v53 = vcombine.low %v7835_v10, %v7838_v57  ;;  %v3200_v55 = vrot.slane %v3198_v38, 3 }
 0x259   : > { %v2647_v17 = vrot.slane %v2646_v46, 1  ;;  %v2670_v11 = vadd.f32 %v2669_v8, %v2668_v45  ;;  %5708 = vmatmul.mubr.msk.bf16.gmra.mrb[28].mxu1 %vm419_vm3, %v7286_v42  ;;  %v3178_v42 = vshrl.u32 %v4699_v13, 16  ;;  %v1758_v5 = vadd.f32 %v1757_v59, %v1756_v40  ;;  %v7848_v45 = vld [vmem:[%s6570_s19 + $0x74] sm:$0xff]   ;;  %v7856_v13 = vld [vmem:[%s6570_s19 + $0xa0] sm:$0xf] }
 0x25a   : > { %5711 = vmatprep.mubr.msk.bf16.mxu1 %vm6519_vm1, %v6518_v1  ;;  %v3197_v40 = vrot.slane %v3195_v58, 2  ;;  %v3373_v8 = vshll.u32 %v4711_v53, 16  ;;  %v7859_v59 = vld [vmem:[%s6570_s19 + $0xa4] sm:$0xf] }
 0x25b   : > { %v2648_v51 = vadd.f32 %v2647_v17, %v2646_v46  ;;  %v2671_v23 = vrot.slane %v2670_v11, 1  ;;  %v3180_v21 = vrot.slane %v3178_v42, 2  ;;  %v3370_v46 = vshrl.u32 %v4711_v53, 16 }
 0x25c   : > { %v3204_v17 = vshrl.u32 %v7848_v45, 16 }
 0x25d   : > { %5514 = vmatmul.mubr.msk.bf16.gmra.mrb[32].mxu0 %vm419_vm3, %v7236_v18  ;;  %v7818_v6 = vadd.f32 %v2648_v51, %v1734_v44  ;;  %v2672_v14 = vadd.f32 %v2671_v23, %v2670_v11  ;;  %v4709_v18 = vcombine.low %v3317_v2, %v7804_v43  ;;  %v3184_v62 = vor.u32 %v3183_v24, %v3180_v21  ;;  %v7883_v21 = vld [vmem:[%s6570_s19 + $0xac] sm:$0xf] }
 0x25e   : > { %5517 = vmatprep.mubr.msk.bf16.mxu0 %vm6519_vm1, %v6518_v1  ;;  %v3207_v11 = vshll.u32 %v7848_v45, 16  ;;  %v3372_v44 = vrot.slane %v3370_v46, 3  ;;  %v3375_v51 = vrot.slane %v3373_v8, 4  ;;  %v4712_v23 = vcombine.low %v7856_v13, %v7859_v59 }
 0x25f   : > { %v7823_v35 = vadd.f32 %v2672_v14, %v1758_v5  ;;  %v3353_v0 = vshrl.u32 %v4709_v18, 16  ;;  %v3356_v7 = vshll.u32 %v4709_v18, 16  ;;  %v3206_v61 = vrot.slane %v3204_v17, 2 }
 0x260   : > { %v3209_v63 = vrot.slane %v3207_v11, 3  ;;  %v3376_v5 = vor.u32 %v3375_v51, %v3372_v44  ;;  %v3379_v14 = vshrl.u32 %v4712_v23, 16  ;;  %v3382_v18 = vshll.u32 %v4712_v23, 16 }
 0x261   : > { %5712 = vmatmul.mubr.msk.bf16.gmra.mrb[32].mxu1 %vm419_vm3, %v7301_v31  ;;  %v3192_v31 = vor.u32 %v3191_v29, %v3188_v12  ;;  %v3355_v25 = vrot.slane %v3353_v0, 3  ;;  %v3358_v33 = vrot.slane %v3356_v7, 4  ;;  %v3216_v12 = vshll.u32 %v7872_v50, 16 }
 0x262   : > { %5715 = vmatprep.mubr.msk.bf16.mxu1 %vm6519_vm1, %v6518_v1  ;;  %v3210_v24 = vor.u32 %v3209_v63, %v3206_v61  ;;  %v3381_v0 = vrot.slane %v3379_v14, 3  ;;  %v3384_v7 = vrot.slane %v3382_v18, 4  ;;  %v4713_v3 = vcombine.low %v7880_v47, %v7883_v21 }
 0x263   : > { %v3193_v37 = vsel %vm1098_vm9, %v3184_v62, %v3192_v31  ;;  %v3359_v16 = vor.u32 %v3358_v33, %v3355_v25  ;;  %v3497_v8 = vrot.slane %v7796_v28, 3  ;;  %v3501_v17 = vrot.slane %v7848_v45, 3 }
 0x264   : > { %v3385_v58 = vor.u32 %v3384_v7, %v3381_v0  ;;  %v3388_v38 = vshrl.u32 %v4713_v3, 16  ;;  %v3391_v25 = vshll.u32 %v4713_v3, 16  ;;  %v4765_v11 = vcombine.low %v7804_v43, %v7809_v56 }
 0x265   : > { %5518 = vmatmul.mubr.msk.bf16.gmra.mrb[36].mxu0 %vm419_vm3, %v7228_v4  ;;  %v3366_v4 = vrot.slane %v3364_v27, 4  ;;  %v4767_v43 = vcombine.low %v7838_v57, %v7856_v13  ;;  %v4768_v56 = vcombine.low %v7859_v59, %v7880_v47 }
 0x266   : > { %5523 = vmatprep.mubr.msk.bf16.mxu0 %vm6519_vm1, %v6518_v1  ;;  %v3393_v53 = vrot.slane %v3391_v25, 4 }
 0x267   : > { %v3367_v48 = vor.u32 %v3366_v4, %v3363_v26  ;;  %v3386_v26 = vsel %vm2214_vm6, %v3376_v5, %v3385_v58  ;;  %v3390_v4 = vrot.slane %v3388_v38, 3 }
 0x269   : > { %5716 = vmatmul.mubr.msk.bf16.gmra.mrb[36].mxu1 %vm419_vm3, %v7293_v22  ;;  %v3201_v22 = vor.u32 %v3200_v55, %v3197_v40  ;;  %v3368_v2 = vsel %vm2214_vm6, %v3359_v16, %v3367_v48  ;;  %v3377_v29 = vsel %vm2214_vm6, %v3367_v48, %v3376_v5  ;;  %v3394_v40 = vor.u32 %v3393_v53, %v3390_v4  ;;  %v3492_v16 = vld [vmem:[%s6570_s19 + $0x5c] sm:$0x8] }
 0x26a   : > { %5721 = vmatprep.mubr.msk.bf16.mxu1 %vm6519_vm1, %v6518_v1  ;;  %v4719_v48 = vcombine.low %v3492_v16, %v7792_v30  ;;  %v3499_v30 = vrot.slane %v7826_v52, 3  ;;  %v3503_v52 = vrot.slane %v7872_v50, 3 }
 0x26b   : > { %v3202_v42 = vsel %vm1098_vm9, %v3192_v31, %v3201_v22  ;;  %v3211_v27 = vsel %vm1098_vm9, %v3201_v22, %v3210_v24  ;;  %v3218_v31 = vrot.slane %v3216_v12, 3  ;;  %v3395_v55 = vsel %vm2214_vm6, %v3385_v58, %v3394_v40 }
 0x26c   : > { %v3496_v46 = vrot.slane %v4719_v48, 3  ;;  %v3500_v28 = vsel %vm983_vm8, %v3497_v8, %v3499_v30  ;;  %v3504_v45 = vsel %vm983_vm8, %v3501_v17, %v3503_v52 }
 0x26d   : > { %5524 = vmatmul.mubr.msk.bf16.vlgmr.msra.gmra.mrb[20].mxu0 %vm419_vm3, %v3193_v37 }
 0x26e   : > { %5544 = vmatpush3.bf16.msra.mxu0 %v7087_v60  ;;  %5527 = vmatprep.mubr.msk.bf16.mxu0 %vm6519_vm1, %v6518_v1  ;;  %v3498_v22 = vsel %vm983_vm8, %v3496_v46, %v3497_v8 }
 0x26f   : > { %5565 = vmatprep.subr.bf16.mxu0 %v6518_v1 }
 0x271   : > { %5722 = vmatmul.mubr.msk.bf16.vlgmr.msra.gmra.mrb[20].mxu1 %vm419_vm3, %v3368_v2 }
 0x272   : > { %5742 = vmatpush3.bf16.msra.mxu1 %v7087_v60  ;;  %5725 = vmatprep.mubr.msk.bf16.mxu1 %vm6519_vm1, %v6518_v1  ;;  %v3213_v60 = vshrl.u32 %v7872_v50, 16 }
 0x273   : > { %5763 = vmatprep.subr.bf16.mxu1 %v6518_v1 }
 0x274   : > { %v3215_v62 = vrot.slane %v3213_v60, 2 }
 0x275   : > { %5528 = vmatmul.mubr.msk.bf16.gmra.mrb[24].mxu0 %vm419_vm3, %v3202_v42 }
 0x276   : > { %5531 = vmatprep.mubr.msk.bf16.mxu0 %vm6519_vm1, %v6518_v1  ;;  %v3219_v33 = vor.u32 %v3218_v31, %v3215_v62 }
 0x278   : > { %v3220_v37 = vsel %vm1098_vm9, %v3210_v24, %v3219_v33 }
 0x279   : > { %5726 = vmatmul.mubr.msk.bf16.gmra.mrb[24].mxu1 %vm419_vm3, %v3377_v29 }
 0x27a   : > { %5729 = vmatprep.mubr.msk.bf16.mxu1 %vm6519_vm1, %v6518_v1 }
 0x27d   : > { %5532 = vmatmul.mubr.msk.bf16.gmra.mrb[28].mxu0 %vm419_vm3, %v3211_v27 }
 0x27e   : > { %5535 = vmatprep.mubr.msk.bf16.mxu0 %vm6519_vm1, %v6518_v1 }
 0x281   : > { %5730 = vmatmul.mubr.msk.bf16.gmra.mrb[28].mxu1 %vm419_vm3, %v3386_v26 }
 0x282   : > { %5733 = vmatprep.mubr.msk.bf16.mxu1 %vm6519_vm1, %v6518_v1 }
 0x285   : > { %5536 = vmatmul.mubr.msk.bf16.gmra.mrb[32].mxu0 %vm419_vm3, %v3220_v37 }
 0x286   : > { %5539 = vmatprep.mubr.msk.bf16.mxu0 %vm6519_vm1, %v6518_v1 }
 0x289   : > { %5734 = vmatmul.mubr.msk.bf16.gmra.mrb[32].mxu1 %vm419_vm3, %v3395_v55 }
 0x28a   : > { %5737 = vmatprep.mubr.msk.bf16.mxu1 %vm6519_vm1, %v6518_v1 }
 0x28d   : > { %5540 = vmatmul.mubr.msk.bf16.gmra.mrb[36].mxu0 %vm419_vm3, %v3219_v33 }
 0x28e   : > { %5545 = vmatprep.mubr.msk.bf16.mxu0 %vm6519_vm1, %v6518_v1 }
 0x291   : > { %5738 = vmatmul.mubr.msk.bf16.gmra.mrb[36].mxu1 %vm419_vm3, %v3394_v40 }
 0x292   : > { %5743 = vmatprep.mubr.msk.bf16.mxu1 %vm6519_vm1, %v6518_v1 }
 0x295   : > { %5546 = vmatmul.mubr.msk.bf16.vlgmr.msra.gmra.mrb[20].mxu0 %vm419_vm3, %v3368_v2  ;;  %v4766_v2 = vcombine.low %v7812_v34, %v7835_v10  ;;  %v4769_v34 = vcombine.low %v7883_v21, %v7883_v21 }
 0x296   : > { %5566 = vmatpush3.bf16.msra.mxu0 %v7184_v49  ;;  %5549 = vmatprep.mubr.msk.bf16.mxu0 %vm6519_vm1, %v6518_v1 }
 0x299   : > { %5744 = vmatmul.mubr.msk.bf16.vlgmr.msra.gmra.mrb[20].mxu1 %vm419_vm3, %v3498_v22 }
 0x29a   : > { %5764 = vmatpush3.bf16.msra.mxu1 %v7184_v49  ;;  %5747 = vmatprep.mubr.msk.bf16.mxu1 %vm6519_vm1, %v6518_v1  ;;  %v3502_v49 = vsel %vm983_vm8, %v3499_v30, %v3501_v17 }
 0x29d   : > { %5550 = vmatmul.mubr.msk.bf16.gmra.mrb[24].mxu0 %vm419_vm3, %v3377_v29 }
 0x29e   : > { %5553 = vmatprep.mubr.msk.bf16.mxu0 %vm6519_vm1, %v6518_v1 }
 0x2a1   : > { %5748 = vmatmul.mubr.msk.bf16.gmra.mrb[24].mxu1 %vm419_vm3, %v3500_v28 }
 0x2a2   : > { %5751 = vmatprep.mubr.msk.bf16.mxu1 %vm6519_vm1, %v6518_v1 }
 0x2a5   : > { %5554 = vmatmul.mubr.msk.bf16.gmra.mrb[28].mxu0 %vm419_vm3, %v3386_v26 }
 0x2a6   : > { %5557 = vmatprep.mubr.msk.bf16.mxu0 %vm6519_vm1, %v6518_v1 }
 0x2a9   : > { %5752 = vmatmul.mubr.msk.bf16.gmra.mrb[28].mxu1 %vm419_vm3, %v3502_v49 }
 0x2aa   : > { %5755 = vmatprep.mubr.msk.bf16.mxu1 %vm6519_vm1, %v6518_v1 }
 0x2ad   : > { %5558 = vmatmul.mubr.msk.bf16.gmra.mrb[32].mxu0 %vm419_vm3, %v3395_v55 }
 0x2ae   : > { %5561 = vmatprep.mubr.msk.bf16.mxu0 %vm6519_vm1, %v6518_v1 }
 0x2b1   : > { %5756 = vmatmul.mubr.msk.bf16.gmra.mrb[32].mxu1 %vm419_vm3, %v3504_v45 }
 0x2b2   : > { %5759 = vmatprep.mubr.msk.bf16.mxu1 %vm6519_vm1, %v6518_v1 }
 0x2b5   : > { %5562 = vmatmul.mubr.msk.bf16.gmra.mrb[36].mxu0 %vm419_vm3, %v3394_v40 }
 0x2b6   : > { %5567 = vmatprep.mubr.msk.bf16.mxu0 %vm6519_vm1, %v6518_v1 }
 0x2b9   : > { %5760 = vmatmul.mubr.msk.bf16.gmra.mrb[36].mxu1 %vm419_vm3, %v3503_v52 }
 0x2ba   : > { %5765 = vmatprep.mubr.msk.bf16.mxu1 %vm6519_vm1, %v6518_v1 }
 0x2bd   : > { %5568 = vmatmul.mubr.msk.bf16.vlgmr.msra.gmra.mrb[20].mxu0 %vm419_vm3, %v3498_v22 }
 0x2be   : > { %5571 = vmatprep.mubr.msk.bf16.mxu0 %vm6519_vm1, %v6518_v1 }
 0x2c1   : > { %5766 = vmatmul.mubr.msk.bf16.vlgmr.msra.gmra.mrb[20].mxu1 %vm419_vm3, %v4765_v11 }
 0x2c2   : > { %5769 = vmatprep.mubr.msk.bf16.mxu1 %vm6519_vm1, %v6518_v1 }
 0x2c5   : > { %5572 = vmatmul.mubr.msk.bf16.gmra.mrb[24].mxu0 %vm419_vm3, %v3500_v28 }
 0x2c6   : > { %5575 = vmatprep.mubr.msk.bf16.mxu0 %vm6519_vm1, %v6518_v1 }
 0x2c9   : > { %5770 = vmatmul.mubr.msk.bf16.gmra.mrb[24].mxu1 %vm419_vm3, %v4766_v2 }
 0x2ca   : > { %5773 = vmatprep.mubr.msk.bf16.mxu1 %vm6519_vm1, %v6518_v1 }
 0x2cd   : > { %5576 = vmatmul.mubr.msk.bf16.gmra.mrb[28].mxu0 %vm419_vm3, %v3502_v49 }
 0x2ce   : > { %5579 = vmatprep.mubr.msk.bf16.mxu0 %vm6519_vm1, %v6518_v1 }
 0x2d1   : > { %5774 = vmatmul.mubr.msk.bf16.gmra.mrb[28].mxu1 %vm419_vm3, %v4767_v43 }
 0x2d2   : > { %5777 = vmatprep.mubr.msk.bf16.mxu1 %vm6519_vm1, %v6518_v1 }
 0x2d5   : > { %5580 = vmatmul.mubr.msk.bf16.gmra.mrb[32].mxu0 %vm419_vm3, %v3504_v45 }
 0x2d6   : > { %5583 = vmatprep.mubr.msk.bf16.mxu0 %vm6519_vm1, %v6518_v1 }
 0x2d9   : > { %5778 = vmatmul.mubr.msk.bf16.gmra.mrb[32].mxu1 %vm419_vm3, %v4768_v56 }
 0x2da   : > { %5781 = vmatprep.mubr.msk.bf16.mxu1 %vm6519_vm1, %v6518_v1 }
 0x2dd   : > { %5584 = vmatmul.mubr.msk.bf16.gmra.mrb[36].mxu0 %vm419_vm3, %v3503_v52 }
 0x2e1   : > { %5782 = vmatmul.mubr.msk.bf16.gmra.mrb[36].mxu1 %vm419_vm3, %v4769_v34 }
 0x390   : > { %v3554_v10 = vpop.f32.mrb[20].mxu0 }
 0x391   : > { %v3601_v57 = vmul.f32 %v7588_v15, %v3554_v10  ;;  %v5569_v13 = vpop.f32.mrb[21].mxu0 }
 0x392   : > { %v3557_v44 = vpop.f32.mrb[22].mxu0 }
 0x393   : > { %v3602_v51 = vmul.f32 %v7595_v20, %v3557_v44  ;;  %v5570_v59 = vpop.f32.mrb[23].mxu0  ;;  %v3625_v23 = vmul.f32 %v3601_v57, %v3554_v10 }
 0x394   : > { %v4333_v63 = vpop.f32.mrb[20].mxu1 }
 0x395   : > { %v3610_v42 = vadd.f32 %v3602_v51, %v3601_v57  ;;  %v3626_v61 = vmul.f32 %v3602_v51, %v3557_v44  ;;  %v4380_v50 = vmul.f32 %v7588_v15, %v4333_v63  ;;  %v5767_v5 = vpop.f32.mrb[21].mxu1 }
 0x396   : > { %v4336_v14 = vpop.f32.mrb[22].mxu1 }
 0x397   : > { %v3634_v1 = vadd.f32 %v3626_v61, %v3625_v23  ;;  %v4381_v47 = vmul.f32 %v7595_v20, %v4336_v14  ;;  %v5768_v21 = vpop.f32.mrb[23].mxu1  ;;  %v4404_v12 = vmul.f32 %v4380_v50, %v4333_v63 }
 0x398   : > { %v3562_v18 = vpop.f32.mrb[24].mxu0 }
 0x399   : > { %v3603_v24 = vmul.f32 %v7628_v54, %v3562_v18  ;;  %v5573_v60 = vpop.f32.mrb[25].mxu0  ;;  %v4389_v0 = vadd.f32 %v4381_v47, %v4380_v50  ;;  %v4405_v7 = vmul.f32 %v4381_v47, %v4336_v14 }
 0x39a   : > { %v3565_v29 = vpop.f32.mrb[26].mxu0 }
 0x39b   : > { %v3611_v3 = vadd.f32 %v3610_v42, %v3603_v24  ;;  %v3627_v27 = vmul.f32 %v3603_v24, %v3562_v18  ;;  %v5574_v62 = vpop.f32.mrb[27].mxu0  ;;  %v3604_v31 = vmul.f32 %v7647_v19, %v3565_v29  ;;  %v4413_v58 = vadd.f32 %v4405_v7, %v4404_v12 }
 0x39c   : > { %v4341_v33 = vpop.f32.mrb[24].mxu1 }
 0x39d   : > { %v3635_v15 = vadd.f32 %v3634_v1, %v3627_v27  ;;  %v3612_v38 = vadd.f32 %v3611_v3, %v3604_v31  ;;  %v3628_v25 = vmul.f32 %v3604_v31, %v3565_v29  ;;  %v4382_v20 = vmul.f32 %v7628_v54, %v4341_v33  ;;  %v5771_v26 = vpop.f32.mrb[25].mxu1 }
 0x39e   : > { %v4344_v53 = vpop.f32.mrb[26].mxu1 }
 0x39f   : > { %v3636_v4 = vadd.f32 %v3635_v15, %v3628_v25  ;;  %v4390_v40 = vadd.f32 %v4389_v0, %v4382_v20  ;;  %v4406_v55 = vmul.f32 %v4382_v20, %v4341_v33  ;;  %v4383_v16 = vmul.f32 %v7647_v19, %v4344_v53  ;;  %v5772_v48 = vpop.f32.mrb[27].mxu1 }
 0x3a0   : > { %v3570_v37 = vpop.f32.mrb[28].mxu0 }
 0x3a1   : > { %v3605_v46 = vmul.f32 %v7685_v32, %v3570_v37  ;;  %v5577_v8 = vpop.f32.mrb[29].mxu0  ;;  %v4414_v30 = vadd.f32 %v4413_v58, %v4406_v55  ;;  %v4391_v28 = vadd.f32 %v4390_v40, %v4383_v16  ;;  %v4407_v17 = vmul.f32 %v4383_v16, %v4344_v53 }
 0x3a2   : > { %v3573_v22 = vpop.f32.mrb[30].mxu0 }
 0x3a3   : > { %v3613_v49 = vadd.f32 %v3612_v38, %v3605_v46  ;;  %v5578_v52 = vpop.f32.mrb[31].mxu0  ;;  %v3629_v45 = vmul.f32 %v3605_v46, %v3570_v37  ;;  %v3606_v54 = vmul.f32 %v7703_v39, %v3573_v22  ;;  %v4415_v11 = vadd.f32 %v4414_v30, %v4407_v17 }
 0x3a4   : > { %v4349_v34 = vpop.f32.mrb[28].mxu1 }
 0x3a5   : > { %v3637_v2 = vadd.f32 %v3636_v4, %v3629_v45  ;;  %v3614_v43 = vadd.f32 %v3613_v49, %v3606_v54  ;;  %v3630_v56 = vmul.f32 %v3606_v54, %v3573_v22  ;;  %v4384_v19 = vmul.f32 %v7685_v32, %v4349_v34  ;;  %v5775_v10 = vpop.f32.mrb[29].mxu1 }
 0x3a6   : > { %v4352_v13 = vpop.f32.mrb[30].mxu1 }
 0x3a7   : > { %v3638_v57 = vadd.f32 %v3637_v2, %v3630_v56  ;;  %v4392_v51 = vadd.f32 %v4391_v28, %v4384_v19  ;;  %v4408_v59 = vmul.f32 %v4384_v19, %v4349_v34  ;;  %v4385_v23 = vmul.f32 %v7703_v39, %v4352_v13  ;;  %v5776_v42 = vpop.f32.mrb[31].mxu1 }
 0x3a8   : > { %v3578_v44 = vpop.f32.mrb[32].mxu0 }
 0x3a9   : > { %v3607_v61 = vmul.f32 %v7735_v36, %v3578_v44  ;;  %v5581_v63 = vpop.f32.mrb[33].mxu0  ;;  %v4416_v50 = vadd.f32 %v4415_v11, %v4408_v59  ;;  %v4393_v5 = vadd.f32 %v4392_v51, %v4385_v23  ;;  %v4409_v14 = vmul.f32 %v4385_v23, %v4352_v13 }
 0x3aa   : > { %v3581_v1 = vpop.f32.mrb[34].mxu0 }
 0x3ab   : > { %v3615_v18 = vadd.f32 %v3614_v43, %v3607_v61  ;;  %v5582_v47 = vpop.f32.mrb[35].mxu0  ;;  %v3631_v21 = vmul.f32 %v3607_v61, %v3578_v44  ;;  %v3608_v32 = vmul.f32 %v7744_v41, %v3581_v1  ;;  %v4417_v24 = vadd.f32 %v4416_v50, %v4409_v14 }
 0x3ac   : > { %v4357_v0 = vpop.f32.mrb[32].mxu1 }
 0x3ad   : > { %v3639_v60 = vadd.f32 %v3638_v57, %v3631_v21  ;;  %v3616_v12 = vadd.f32 %v3615_v18, %v3608_v32  ;;  %v3632_v29 = vmul.f32 %v3608_v32, %v3581_v1  ;;  %v4386_v39 = vmul.f32 %v7735_v36, %v4357_v0  ;;  %v5779_v7 = vpop.f32.mrb[33].mxu1 }
 0x3ae   : > { %v4360_v27 = vpop.f32.mrb[34].mxu1 }
 0x3af   : > { %v3640_v3 = vadd.f32 %v3639_v60, %v3632_v29  ;;  %v4394_v31 = vadd.f32 %v4393_v5, %v4386_v39  ;;  %v4410_v58 = vmul.f32 %v4386_v39, %v4357_v0  ;;  %v4387_v15 = vmul.f32 %v7744_v41, %v4360_v27  ;;  %v5780_v38 = vpop.f32.mrb[35].mxu1 }
 0x3b0   : > { %v3586_v62 = vpop.f32.mrb[36].mxu0 }
 0x3b1   : > { %v3609_v25 = vmul.f32 %v7763_v9, %v3586_v62  ;;  %v5585_v33 = vpop.f32.mrb[37].mxu0  ;;  %v4418_v26 = vadd.f32 %v4417_v24, %v4410_v58  ;;  %v4395_v4 = vadd.f32 %v4394_v31, %v4387_v15  ;;  %v4411_v53 = vmul.f32 %v4387_v15, %v4360_v27 }
 0x3b2   : > { %v3589_v20 = vpop.f32.mrb[38].mxu0 }
 0x3b3   : > { %v3617_v37 = vadd.f32 %v3616_v12, %v3609_v25  ;;  %v5586_v40 = vpop.f32.mrb[39].mxu0  ;;  %v3633_v55 = vmul.f32 %v3609_v25, %v3586_v62  ;;  %v4419_v36 = vadd.f32 %v4418_v26, %v4411_v53 }
 0x3b4   : > { %v4365_v46 = vpop.f32.mrb[36].mxu1 }
 0x3b5   : > { %v3618_v16 = vrot.slane %v3617_v37, 4  ;;  %v3641_v48 = vadd.f32 %v3640_v3, %v3633_v55  ;;  %v4388_v22 = vmul.f32 %v7763_v9, %v4365_v46  ;;  %v5783_v30 = vpop.f32.mrb[37].mxu1 }
 0x3b6   : > { %v4368_v28 = vpop.f32.mrb[38].mxu1 }
 0x3b7   : > { %v3619_v8 = vadd.f32 %v3618_v16, %v3617_v37  ;;  %v3642_v41 = vrot.slane %v3641_v48, 4  ;;  %v4396_v49 = vadd.f32 %v4395_v4, %v4388_v22  ;;  %v4412_v52 = vmul.f32 %v4388_v22, %v4365_v46  ;;  %v5784_v45 = vpop.f32.mrb[39].mxu1 }
 0x3b9   : > { %v3620_v17 = vrot.slane %v3619_v8, 2  ;;  %v3643_v54 = vadd.f32 %v3642_v41, %v3641_v48  ;;  %v4397_v2 = vrot.slane %v4396_v49, 4  ;;  %v4420_v43 = vadd.f32 %v4419_v36, %v4412_v52 }
 0x3bb   : > { %v3621_v11 = vadd.f32 %v3620_v17, %v3619_v8  ;;  %v3644_v56 = vrot.slane %v3643_v54, 2  ;;  %v4398_v19 = vadd.f32 %v4397_v2, %v4396_v49  ;;  %v4421_v10 = vrot.slane %v4420_v43, 4 }
 0x3bd   : > { %v3622_v34 = vrot.slane %v3621_v11, 1  ;;  %v3645_v57 = vadd.f32 %v3644_v56, %v3643_v54  ;;  %v4399_v44 = vrot.slane %v4398_v19, 2  ;;  %v4422_v9 = vadd.f32 %v4421_v10, %v4420_v43 }
 0x3bf   : > { %v3623_v13 = vadd.f32 %v3622_v34, %v3621_v11  ;;  %v3646_v51 = vrot.slane %v3645_v57, 1  ;;  %v4400_v23 = vadd.f32 %v4399_v44, %v4398_v19  ;;  %v4423_v42 = vrot.slane %v4422_v9, 2 }
 0x3c1   : > { %v3624_v59 = vadd.f32 %v3623_v13, %v7818_v6  ;;  %v3647_v61 = vadd.f32 %v3646_v51, %v3645_v57  ;;  %v4401_v63 = vrot.slane %v4400_v23, 1  ;;  %v4424_v1 = vadd.f32 %v4423_v42, %v4422_v9 }
 0x3c3   : > { %v3648_v50 = vadd.f32 %v3647_v61, %v7823_v35  ;;  %v4402_v5 = vadd.f32 %v4401_v63, %v4400_v23  ;;  %v4425_v14 = vrot.slane %v4424_v1, 1 }
 0x3c5   : > { %v4403_v18 = vadd.f32 %v4402_v5, %v3624_v59  ;;  %v4426_v47 = vadd.f32 %v4425_v14, %v4424_v1 }
 0x3c7   : > { %v4427_v6 = vadd.f32 %v4426_v47, %v3648_v50  ;;  %4428 = vst [vmem:[%s175_s14] sm:$0xff] %v4403_v18 }
 0x3c9   : > { %4429 = vst [vmem:[%s179_s17] sm:$0xff] %v4427_v6 }
 0x3ca PF: > { %s14_s12 = sadd.s32 1, %s6516_s12  }
 0x3cb   : > { %p11_p4 = scmp.ge.s32.totalorder %s14_s12, 4  }
 0x3cd   :  { %13 = sbr.rel (!%p11_p4) target bundleno = 1 (0x1), region = 78 }

// kernel: conv_block_forward.3
= control target key start
LH: loop header
LB: loop body
LE: loop exit
PB: predicated region body
PF: predicated region fallthrough
CT: control target
= control target key end

     0   :  { %s6370_s15 = smov 0   ;;  %s7714_s0 = inlined_call_operand.vmem [shape: f32[1,128], index: 0, kind: input, shape index: {}]   ;;  %s7715_s1 = inlined_call_operand.vmem [shape: f32[1,128], index: 1, kind: input, shape index: {}]   ;;  %s7716_s2 = inlined_call_operand.vmem [shape: bf16[2,360,8], index: 2, kind: input, shape index: {}]   ;;  %s7717_s3 = inlined_call_operand.vmem [shape: bf16[9,8,128], index: 3, kind: input, shape index: {}]   ;;  %s7718_s4 = inlined_call_operand.vmem [shape: bf16[2,72,128], index: 4, kind: output, shape index: {}]  }
   0x1 LB: > { %s4323_s16 = sadd.s32 4294967295, %s6341_s15   ;;  %p4327_p0 = scmp.ge.s32.totalorder %s6341_s15, 1  ;;  %s6341_s15 = sphi %s6370_s15, %s14_s15  }
   0x2   : > { %p162_p1 = scmp.lt.s32.totalorder %s6341_s15, 3 }
   0x4   : > { %p163_p2 = pnand %p4327_p0, %p162_p1 }
   0x5   : > { %v4332_v0 = vld [vmem:[%s7717_s3 + $0x4] sm:$0xf] (!%p163_p2)  ;;  %vm286_vm0 = vcmask (!%p163_p2), 1043456   ;;  %p188_p3 = scmp.lt.s32.totalorder (!%p163_p2), %s4323_s16, 1  ;;  %v6343_v1 = vmov (!%p163_p2), 0.0   ;;  %vm6344_vm1 = vmmov (!%p163_p2), 0  }
   0x6   : > { %166 = sbr.rel (%p163_p2) target bundleno = 960 (0x3c0), region = 36  ;;  %4835 = vmatprep.subr.bf16.mxu0 (!%p163_p2), %v6343_v1  ;;  %v6383_v2 = vsel (!%p163_p2), %vm286_vm0, %v4332_v0, 0  ;;  %4837 = vmatprep.mubr.msk.bf16.mxu0 (!%p163_p2), %vm6344_vm1, %v6343_v1  ;;  %vm260_vm2 = vcmask (!%p163_p2), 1046528   ;;  %v222_v3 = vld [vmem:[%s7717_s3] sm:$0xf] (!%p163_p2)  ;;  %vm270_vm3 = vcmask (!%p163_p2), 64512  }
   0x7   : > { %4836 = vmatpush3.bf16.msra.mxu0 (!%p163_p2), %v6383_v2  ;;  %5033 = vmatprep.subr.bf16.mxu1 (!%p163_p2), %v6343_v1  ;;  %v6410_v10 = vsel (!%p163_p2), %vm286_vm0, %v222_v3, 0  ;;  %vm512_vm4 = vsmask.f32 (!%p163_p2), 7424  ;;  %vm1305_vm5 = vsmask.f32 (!%p163_p2), 6400  ;;  %vm688_vm7 = vcmask (!%p163_p2), 1045504  }
   0x8   : > { %5034 = vmatpush3.bf16.msra.mxu1 (!%p163_p2), %v6383_v2  ;;  %4857 = vmatprep.subr.bf16.mxu0 (!%p163_p2), %v6343_v1  ;;  %vm2044_vm6 = vsmask.f32 (!%p163_p2), 4352  ;;  %vm834_vm8 = vcmask (!%p163_p2), 1044480   ;;  %vm949_vm9 = vsmask.f32 (!%p163_p2), 5376 }
   0x9   : > { %5035 = vmatprep.mubr.msk.bf16.mxu1 (!%p163_p2), %vm6344_vm1, %v6343_v1  ;;  %5055 = vmatprep.subr.bf16.mxu1 (!%p163_p2), %v6343_v1 }
   0xd   : > { %s7720_s16 = smov (!%p188_p3, %s4323_s16), 1 }
   0xe   : > { %s6267_s19 = smul.u32 180, %s7720_s16 }
  0x10   : > { %s6400_s22 = scalar_lea.vmem %s7716_s2, %s6267_s19  ;;  %s6268_s19 = smul.u32 36, %s7720_s16 }
  0x11   : > { %v6279_v4 = vld [vmem:[%s6400_s22 + $0x2c] sm:$0xfe]   ;;  %v6280_v5 = vld [vmem:[%s6400_s22 + $0x34] sm:$0xff]   ;;  %v6281_v8 = vld [vmem:[%s6400_s22] sm:$0xff]  }
  0x12   : > { %v261_v6 = vrot.slane %v6279_v4, 1  ;;  %v262_v7 = vrot.slane %v6280_v5, 1  ;;  %v6282_v9 = vld [vmem:[%s6400_s22 + $0x8] sm:$0xff]   ;;  %v6283_v11 = vld [vmem:[%s6400_s22 + $0x3c] sm:$0xff]   ;;  %v514_v13 = vshrl.u32 %v6281_v8, 16  ;;  %v516_v14 = vshll.u32 %v6281_v8, 16 }
  0x13   : > { %v521_v15 = vshll.u32 %v6282_v9, 16  ;;  %v6284_v16 = vld [vmem:[%s6400_s22 + $0x10] sm:$0xff]   ;;  %v264_v19 = vrot.slane %v6283_v11, 1  ;;  %v6423_v20 = vld [vmem:[%s6400_s22 + $0x18] sm:$0xff]   ;;  %v525_v22 = vshrl.u32 %v6282_v9, 16  ;;  %v6427_v24 = vld [vmem:[%s6400_s22 + $0x44] sm:$0xff]  }
  0x14   : > { %v6414_v12 = vsel %vm260_vm2, %v261_v6, %v262_v7  ;;  %v518_v17 = vrot.slane %v516_v14, 1  ;;  %v529_v23 = vshll.u32 %v6284_v16, 16  ;;  %v231_v25 = vld [vmem:[%s6400_s22 + $0x4c] sm:$0xf]  ;;  %v232_v28 = vld [vmem:[%s6400_s22 + $0x50] sm:$0x1] }
  0x15   : > { %4838 = vmatmul.mubr.msk.bf16.vlgmr.msra.gmra.mrb[0].mxu0 %vm270_vm3, %v6414_v12  ;;  %v523_v18 = vrot.slane %v521_v15, 1  ;;  %v6434_v27 = vsel %vm260_vm2, %v262_v7, %v264_v19  ;;  %v537_v29 = vshll.u32 %v6423_v20, 16  ;;  %v1734_v30 = vld [vmem:[%s6400_s22 + $0x50] sm:$0x3]  ;;  %v1739_v31 = vshrl.u32 %v6279_v4, 16 }
  0x16   : > { %4858 = vmatpush3.bf16.msra.mxu0 %v6410_v10  ;;  %4841 = vmatprep.mubr.msk.bf16.mxu0 %vm6344_vm1, %v6343_v1  ;;  %v519_v21 = vor.u32 %v518_v17, %v514_v13  ;;  %v531_v33 = vrot.slane %v529_v23, 1  ;;  %v266_v34 = vrot.slane %v6427_v24, 1  ;;  %v533_v35 = vshrl.u32 %v6284_v16, 16  ;;  %v6289_v54 = vld [vmem:[%s6400_s22 + $0x20] sm:$0x1f]  }
  0x17   : > { %4879 = vmatprep.subr.bf16.mxu0 %v6343_v1  ;;  %v527_v32 = vor.u32 %v525_v22, %v523_v18  ;;  %v4337_v36 = vcombine.low %v231_v25, %v232_v28  ;;  %v4432_v37 = vcombine.low %v231_v25, %v1734_v30  ;;  %v539_v38 = vrot.slane %v537_v29, 1  ;;  %v6290_v22 = vld [vmem:[%s6400_s22] sm:$0xff]   ;;  %v6292_v25 = vld [vmem:[%s6400_s22 + $0x10] sm:$0xff]  }
  0x18   : > { %v6431_v26 = vsel %vm512_vm4, %v519_v21, %v523_v18  ;;  %v1741_v39 = vrot.slane %v1739_v31, 1  ;;  %v1742_v40 = vshll.u32 %v6279_v4, 16  ;;  %v1747_v41 = vshrl.u32 %v6280_v5, 16  ;;  %v4353_v21 = vld [vmem:[%s7717_s3 + $0x8] sm:$0xf]  ;;  %v6557_v29 = vld [vmem:[%s6400_s22 + $0x8c] sm:$0xff]  }
  0x19   : > { %5036 = vmatmul.mubr.msk.bf16.vlgmr.msra.gmra.mrb[0].mxu1 %vm270_vm3, %v6431_v26  ;;  %v6451_v42 = vsel %vm512_vm4, %v527_v32, %v531_v33  ;;  %v6454_v43 = vsel %vm260_vm2, %v264_v19, %v266_v34  ;;  %v1750_v44 = vshll.u32 %v6280_v5, 16  ;;  %v1756_v45 = vshrl.u32 %v6283_v11, 16  ;;  %v6554_v28 = vld [vmem:[%s6400_s22 + $0x84] sm:$0xf8]  }
  0x1a   : > { %5056 = vmatpush3.bf16.msra.mxu1 %v6410_v10  ;;  %5039 = vmatprep.mubr.msk.bf16.mxu1 %vm6344_vm1, %v6343_v1  ;;  %v1744_v46 = vrot.slane %v1742_v40, 2  ;;  %v1749_v47 = vrot.slane %v1747_v41, 1  ;;  %v1759_v48 = vshll.u32 %v6283_v11, 16  ;;  %v1765_v49 = vshrl.u32 %v6427_v24, 16  ;;  %v6573_v41 = vld [vmem:[%s6400_s22 + $0x94] sm:$0xff]  }
  0x1b   : > { %5077 = vmatprep.subr.bf16.mxu1 %v6343_v1  ;;  %v1752_v50 = vrot.slane %v1750_v44, 2  ;;  %v1758_v51 = vrot.slane %v1756_v45, 1  ;;  %v1768_v52 = vshll.u32 %v6427_v24, 16  ;;  %v1774_v53 = vshrl.u32 %v4432_v37, 16  ;;  %v6291_v24 = vld [vmem:[%s6400_s22 + $0x8] sm:$0xff]  }
  0x1c   : > { %v1745_v55 = vor.u32 %v1744_v46, %v1741_v39  ;;  %v1761_v56 = vrot.slane %v1759_v48, 2  ;;  %v1767_v57 = vrot.slane %v1765_v49, 1  ;;  %v1777_v58 = vshll.u32 %v4432_v37, 16 }
  0x1d   : > { %4842 = vmatmul.mubr.msk.bf16.gmra.mrb[4].mxu0 %vm270_vm3, %v6434_v27  ;;  %v535_v59 = vor.u32 %v533_v35, %v531_v33  ;;  %v1753_v60 = vor.u32 %v1752_v50, %v1749_v47  ;;  %v1770_v61 = vrot.slane %v1768_v52, 2  ;;  %v1776_v62 = vrot.slane %v1774_v53, 1  ;;  %v6594_v50 = vld [vmem:[%s6400_s22 + $0x9c] sm:$0xff]  }
  0x1e   : > { %4845 = vmatprep.mubr.msk.bf16.mxu0 %vm6344_vm1, %v6343_v1  ;;  %v1762_v63 = vor.u32 %v1761_v56, %v1758_v51  ;;  %v1779_v0 = vrot.slane %v1777_v58, 2  ;;  %v6467_v3 = vrot.slane %v4337_v36, 1  ;;  %v541_v9 = vshrl.u32 %v6423_v20, 16 }
  0x1f   : > { %v6470_v4 = vsel %vm1305_vm5, %v1745_v55, %v1753_v60  ;;  %v1771_v5 = vor.u32 %v1770_v61, %v1767_v57  ;;  %v6478_v8 = vsel %vm512_vm4, %v535_v59, %v539_v38  ;;  %v545_v11 = vshll.u32 %v6289_v54, 16  ;;  %v6637_v57 = vld [vmem:[%s6400_s22 + $0x60] sm:$0xff]  }
  0x20   : > { %v6473_v6 = vsel %vm1305_vm5, %v1753_v60, %v1762_v63  ;;  %v6475_v7 = vor.u32 %v1779_v0, %v1776_v62  ;;  %v269_v15 = vsel %vm260_vm2, %v266_v34, %v6467_v3  ;;  %v543_v16 = vor.u32 %v541_v9, %v539_v38  ;;  %v4364_v38 = vld [vmem:[%s7717_s3 + $0xc] sm:$0xf]  ;;  %v4375_v60 = vld [vmem:[%s7717_s3 + $0x10] sm:$0xf] }
  0x21   : > { %5040 = vmatmul.mubr.msk.bf16.gmra.mrb[4].mxu1 %vm270_vm3, %v6451_v42  ;;  %v6482_v13 = vsel %vm1305_vm5, %v1762_v63, %v1771_v5  ;;  %v547_v17 = vrot.slane %v545_v11, 1  ;;  %v549_v19 = vshrl.u32 %v6289_v54, 16  ;;  %v6517_v23 = vsel %vm286_vm0, %v4353_v21, 0  ;;  %v6656_v62 = vld [vmem:[%s6400_s22 + $0x68] sm:$0xff]   ;;  %v659_v11 = vld [vmem:[%s6400_s22 + $0x78] sm:$0xf] }
  0x22   : > { %5043 = vmatprep.mubr.msk.bf16.mxu1 %vm6344_vm1, %v6343_v1  ;;  %v6486_v14 = vsel %vm1305_vm5, %v1771_v5, %v6475_v7  ;;  %v2046_v30 = vshrl.u32 %v6554_v28, 16  ;;  %v2049_v31 = vshll.u32 %v6554_v28, 16  ;;  %v2054_v32 = vshrl.u32 %v6557_v29, 16 }
  0x23   : > { %v6498_v18 = vsel %vm512_vm4, %v543_v16, %v547_v17  ;;  %v6508_v20 = vor.u32 %v549_v19, %v547_v17  ;;  %v2057_v33 = vshll.u32 %v6557_v29, 16  ;;  %v2063_v45 = vshrl.u32 %v6573_v41, 16  ;;  %v806_v19 = vld [vmem:[%s6400_s22 + $0xa8] sm:$0x7] }
  0x24   : > { %v2048_v34 = vrot.slane %v2046_v30, 3  ;;  %v2051_v35 = vrot.slane %v2049_v31, 4  ;;  %v2056_v36 = vrot.slane %v2054_v32, 3  ;;  %v2066_v46 = vshll.u32 %v6573_v41, 16  ;;  %v4386_v31 = vld [vmem:[%s7717_s3 + $0x14] sm:$0xf] }
  0x25   : > { %4846 = vmatmul.mubr.msk.bf16.gmra.mrb[8].mxu0 %vm270_vm3, %v6454_v43  ;;  %v2059_v37 = vrot.slane %v2057_v33, 4  ;;  %v2065_v47 = vrot.slane %v2063_v45, 3  ;;  %v2075_v52 = vshll.u32 %v6594_v50, 16  ;;  %v690_v59 = vrot.slane %v6637_v57, 2 }
  0x26   : > { %4849 = vmatprep.mubr.msk.bf16.mxu0 %vm6344_vm1, %v6343_v1  ;;  %v2052_v39 = vor.u32 %v2051_v35, %v2048_v34  ;;  %v2068_v48 = vrot.slane %v2066_v46, 4  ;;  %v6661_v63 = vsel %vm286_vm0, %v4375_v60, 0  ;;  %v835_v0 = vrot.slane %v6554_v28, 3 }
  0x27   : > { %v2060_v40 = vor.u32 %v2059_v37, %v2056_v36  ;;  %v2077_v54 = vrot.slane %v2075_v52, 4  ;;  %v840_v17 = vrot.slane %v6594_v50, 3  ;;  %v962_v30 = vshll.u32 %v6637_v57, 16 }
  0x28   : > { %v2069_v49 = vor.u32 %v2068_v48, %v2065_v47  ;;  %v6758_v36 = vsel %vm286_vm0, %v4386_v31, 0 }
  0x29   : > { %5044 = vmatmul.mubr.msk.bf16.gmra.mrb[8].mxu1 %vm270_vm3, %v6478_v8  ;;  %v6581_v44 = vsel %vm2044_vm6, %v2052_v39, %v2060_v40  ;;  %v964_v35 = vrot.slane %v962_v30, 3  ;;  %v968_v39 = vshrl.u32 %v6656_v62, 16  ;;  %v6878_v30 = vld [vmem:[%s6400_s22 + $0xc] sm:$0xff]  }
  0x2a   : > { %5047 = vmatprep.mubr.msk.bf16.mxu1 %vm6344_vm1, %v6343_v1  ;;  %v6597_v51 = vsel %vm2044_vm6, %v2060_v40, %v2069_v49  ;;  %v971_v40 = vshll.u32 %v6656_v62, 16 }
  0x2b   : > { %v970_v45 = vrot.slane %v968_v39, 2 }
  0x2c   : > { %v973_v46 = vrot.slane %v971_v40, 3 }
  0x2d   : > { %4850 = vmatmul.mubr.msk.bf16.gmra.mrb[12].mxu0 %vm270_vm3, %v269_v15 }
  0x2e   : > { %4853 = vmatprep.mubr.msk.bf16.mxu0 %vm6344_vm1, %v6343_v1  ;;  %v974_v47 = vor.u32 %v973_v46, %v970_v45 }
  0x31   : > { %5048 = vmatmul.mubr.msk.bf16.gmra.mrb[12].mxu1 %vm270_vm3, %v6498_v18 }
  0x32   : > { %5051 = vmatprep.mubr.msk.bf16.mxu1 %vm6344_vm1, %v6343_v1 }
  0x35   : > { %4854 = vmatmul.mubr.msk.bf16.gmra.mrb[16].mxu0 %vm270_vm3, %v6467_v3 }
  0x36   : > { %4859 = vmatprep.mubr.msk.bf16.mxu0 %vm6344_vm1, %v6343_v1 }
  0x39   : > { %5052 = vmatmul.mubr.msk.bf16.gmra.mrb[16].mxu1 %vm270_vm3, %v6508_v20 }
  0x3a   : > { %5057 = vmatprep.mubr.msk.bf16.mxu1 %vm6344_vm1, %v6343_v1 }
  0x3d   : > { %4860 = vmatmul.mubr.msk.bf16.vlgmr.msra.gmra.mrb[0].mxu0 %vm270_vm3, %v6290_v22 }
  0x3e   : > { %4880 = vmatpush3.bf16.msra.mxu0 %v6517_v23  ;;  %4863 = vmatprep.mubr.msk.bf16.mxu0 %vm6344_vm1, %v6343_v1 }
  0x3f   : > { %4901 = vmatprep.subr.bf16.mxu0 %v6343_v1 }
  0x41   : > { %5058 = vmatmul.mubr.msk.bf16.vlgmr.msra.gmra.mrb[0].mxu1 %vm270_vm3, %v6414_v12  ;;  %v6293_v12 = vld [vmem:[%s6400_s22 + $0x18] sm:$0xff]  }
  0x42   : > { %5078 = vmatpush3.bf16.msra.mxu1 %v6517_v23  ;;  %5061 = vmatprep.mubr.msk.bf16.mxu1 %vm6344_vm1, %v6343_v1 }
  0x43   : > { %5099 = vmatprep.subr.bf16.mxu1 %v6343_v1 }
  0x45   : > { %4864 = vmatmul.mubr.msk.bf16.gmra.mrb[4].mxu0 %vm270_vm3, %v6291_v24 }
  0x46   : > { %4867 = vmatprep.mubr.msk.bf16.mxu0 %vm6344_vm1, %v6343_v1 }
  0x49   : > { %5062 = vmatmul.mubr.msk.bf16.gmra.mrb[4].mxu1 %vm270_vm3, %v6434_v27  ;;  %v6294_v27 = vld [vmem:[%s6400_s22 + $0x20] ss:$0 sps:$4 sm:$0xff]  }
  0x4a   : > { %5065 = vmatprep.mubr.msk.bf16.mxu1 %vm6344_vm1, %v6343_v1 }
  0x4d   : > { %4868 = vmatmul.mubr.msk.bf16.gmra.mrb[8].mxu0 %vm270_vm3, %v6292_v25 }
  0x4e   : > { %4871 = vmatprep.mubr.msk.bf16.mxu0 %vm6344_vm1, %v6343_v1 }
  0x51   : > { %5066 = vmatmul.mubr.msk.bf16.gmra.mrb[8].mxu1 %vm270_vm3, %v6454_v43  ;;  %v6578_v43 = vsel %vm286_vm0, %v4364_v38, 0 }
  0x52   : > { %5069 = vmatprep.mubr.msk.bf16.mxu1 %vm6344_vm1, %v6343_v1 }
  0x55   : > { %4872 = vmatmul.mubr.msk.bf16.gmra.mrb[12].mxu0 %vm270_vm3, %v6293_v12 }
  0x56   : > { %4875 = vmatprep.mubr.msk.bf16.mxu0 %vm6344_vm1, %v6343_v1 }
  0x59   : > { %5070 = vmatmul.mubr.msk.bf16.gmra.mrb[12].mxu1 %vm270_vm3, %v269_v15 }
  0x5a   : > { %5073 = vmatprep.mubr.msk.bf16.mxu1 %vm6344_vm1, %v6343_v1 }
  0x5d   : > { %4876 = vmatmul.mubr.msk.bf16.gmra.mrb[16].mxu0 %vm270_vm3, %v6294_v27 }
  0x5e   : > { %4881 = vmatprep.mubr.msk.bf16.mxu0 %vm6344_vm1, %v6343_v1 }
  0x61   : > { %5074 = vmatmul.mubr.msk.bf16.gmra.mrb[16].mxu1 %vm270_vm3, %v6467_v3  ;;  %v836_v3 = vrot.slane %v6557_v29, 3  ;;  %v959_v29 = vshrl.u32 %v6637_v57, 16 }
  0x62   : > { %5079 = vmatprep.mubr.msk.bf16.mxu1 %vm6344_vm1, %v6343_v1 }
  0x63   : > { %v6675_v5 = vsel %vm834_vm8, %v835_v0, %v836_v3  ;;  %v961_v34 = vrot.slane %v959_v29, 2  ;;  %v6873_v29 = vld [vmem:[%s6400_s22 + $0x34] sm:$0xf] }
  0x65   : > { %4882 = vmatmul.mubr.msk.bf16.vlgmr.msra.gmra.mrb[0].mxu0 %vm270_vm3, %v6431_v26  ;;  %v2072_v26 = vshrl.u32 %v6594_v50, 16  ;;  %v965_v38 = vor.u32 %v964_v35, %v961_v34  ;;  %v943_v50 = vld [vmem:[%s6400_s22 + $0x7c] sm:$0x7] }
  0x66   : > { %4902 = vmatpush3.bf16.msra.mxu0 %v6578_v43  ;;  %4885 = vmatprep.mubr.msk.bf16.mxu0 %vm6344_vm1, %v6343_v1  ;;  %v6887_v34 = vld [vmem:[%s6400_s22 + $0x38] sm:$0xff]  }
  0x67   : > { %4923 = vmatprep.subr.bf16.mxu0 %v6343_v1  ;;  %v2074_v53 = vrot.slane %v2072_v26, 3  ;;  %v4387_v26 = vcombine.low %v659_v11, %v943_v50  ;;  %v6787_v52 = vsel %vm949_vm9, %v965_v38, %v974_v47  ;;  %v1318_v45 = vshll.u32 %v6887_v34, 16 }
  0x69   : > { %5080 = vmatmul.mubr.msk.bf16.vlgmr.msra.gmra.mrb[0].mxu1 %vm270_vm3, %v6470_v4  ;;  %v6611_v55 = vor.u32 %v2077_v54, %v2074_v53  ;;  %v692_v4 = vrot.slane %v6656_v62, 2  ;;  %v989_v57 = vshll.u32 %v4387_v26, 16 }
  0x6a   : > { %5100 = vmatpush3.bf16.msra.mxu1 %v6578_v43  ;;  %5083 = vmatprep.mubr.msk.bf16.mxu1 %vm6344_vm1, %v6343_v1 }
  0x6b   : > { %5121 = vmatprep.subr.bf16.mxu1 %v6343_v1  ;;  %v6615_v56 = vsel %vm2044_vm6, %v2069_v49, %v6611_v55  ;;  %v991_v60 = vrot.slane %v989_v57, 3 }
  0x6d   : > { %4886 = vmatmul.mubr.msk.bf16.gmra.mrb[4].mxu0 %vm270_vm3, %v6451_v42  ;;  %v6634_v42 = vld [vmem:[%s6400_s22 + $0x58] sm:$0xfc]  }
  0x6e   : > { %4889 = vmatprep.mubr.msk.bf16.mxu0 %vm6344_vm1, %v6343_v1  ;;  %v689_v58 = vrot.slane %v6634_v42, 2  ;;  %v951_v27 = vshrl.u32 %v6634_v42, 16  ;;  %v954_v28 = vshll.u32 %v6634_v42, 16  ;;  %v986_v42 = vshrl.u32 %v4387_v26, 16 }
  0x70   : > { %v6653_v61 = vsel %vm688_vm7, %v689_v58, %v690_v59  ;;  %v953_v32 = vrot.slane %v951_v27, 2  ;;  %v956_v33 = vrot.slane %v954_v28, 3  ;;  %v1268_v28 = vld [vmem:[%s6400_s22 + $0x30] sm:$0xe] }
  0x71   : > { %5084 = vmatmul.mubr.msk.bf16.gmra.mrb[4].mxu1 %vm270_vm3, %v6473_v6  ;;  %v6678_v6 = vsel %vm688_vm7, %v690_v59, %v692_v4  ;;  %v988_v59 = vrot.slane %v986_v42, 2  ;;  %v6907_v42 = vld [vmem:[%s6400_s22 + $0x40] sm:$0xff]  }
  0x72   : > { %5087 = vmatprep.mubr.msk.bf16.mxu1 %vm6344_vm1, %v6343_v1  ;;  %v957_v37 = vor.u32 %v956_v33, %v953_v32  ;;  %v4405_v33 = vcombine.low %v1268_v28, %v6873_v29 }
  0x73   : > { %v6802_v0 = vor.u32 %v991_v60, %v988_v59 }
  0x74   : > { %v1307_v39 = vshrl.u32 %v4405_v33, 16  ;;  %v1310_v40 = vshll.u32 %v4405_v33, 16 }
  0x75   : > { %4890 = vmatmul.mubr.msk.bf16.gmra.mrb[8].mxu0 %vm270_vm3, %v6478_v8  ;;  %v838_v8 = vrot.slane %v6573_v41, 3  ;;  %v6771_v41 = vsel %vm949_vm9, %v957_v37, %v965_v38  ;;  %v1138_v38 = vshll.u32 %v6878_v30, 16 }
  0x76   : > { %4893 = vmatprep.mubr.msk.bf16.mxu0 %vm6344_vm1, %v6343_v1  ;;  %v1309_v50 = vrot.slane %v1307_v39, 1  ;;  %v1312_v26 = vrot.slane %v1310_v40, 2 }
  0x77   : > { %v6719_v21 = vsel %vm834_vm8, %v838_v8, %v840_v17 }
  0x79   : > { %5088 = vmatmul.mubr.msk.bf16.gmra.mrb[8].mxu1 %vm270_vm3, %v6482_v13  ;;  %v660_v13 = vld [vmem:[%s6400_s22 + $0x7c] sm:$0x3] }
  0x7a   : > { %5091 = vmatprep.mubr.msk.bf16.mxu1 %vm6344_vm1, %v6343_v1  ;;  %v4369_v16 = vcombine.low %v659_v11, %v660_v13 }
  0x7d   : > { %4894 = vmatmul.mubr.msk.bf16.gmra.mrb[12].mxu0 %vm270_vm3, %v6498_v18  ;;  %v6711_v18 = vld [vmem:[%s6400_s22 + $0xa4] sm:$0xf] }
  0x7e   : > { %4897 = vmatprep.mubr.msk.bf16.mxu0 %vm6344_vm1, %v6343_v1  ;;  %v4380_v22 = vcombine.low %v6711_v18, %v806_v19 }
  0x80   : > { %v6730_v25 = vrot.slane %v4380_v22, 3 }
  0x81   : > { %5092 = vmatmul.mubr.msk.bf16.gmra.mrb[12].mxu1 %vm270_vm3, %v6486_v14  ;;  %v6698_v14 = vsel %vm834_vm8, %v836_v3, %v838_v8  ;;  %v2040_v8 = vld [vmem:[%s6400_s22 + $0xa8] sm:$0xf] }
  0x82   : > { %5095 = vmatprep.mubr.msk.bf16.mxu1 %vm6344_vm1, %v6343_v1  ;;  %v6738_v12 = vsel %vm834_vm8, %v840_v17, %v6730_v25  ;;  %v6860_v17 = vld [vmem:[%s6400_s22 + $0x8] sm:$0xf] }
  0x85   : > { %4898 = vmatmul.mubr.msk.bf16.gmra.mrb[16].mxu0 %vm270_vm3, %v6508_v20  ;;  %v6716_v20 = vrot.slane %v4369_v16, 2  ;;  %v1093_v16 = vld [vmem:[%s6400_s22 + $0x4] sm:$0xf] }
  0x86   : > { %4903 = vmatprep.mubr.msk.bf16.mxu0 %vm6344_vm1, %v6343_v1  ;;  %v4394_v22 = vcombine.low %v1093_v16, %v6860_v17 }
  0x88   : > { %v1133_v31 = vshll.u32 %v4394_v22, 16  ;;  %v1131_v35 = vshrl.u32 %v4394_v22, 16 }
  0x89   : > { %5096 = vmatmul.mubr.msk.bf16.gmra.mrb[16].mxu1 %vm270_vm3, %v6475_v7  ;;  %v6681_v7 = vld [vmem:[%s6400_s22 + $0x70] sm:$0xff]  }
  0x8a   : > { %5101 = vmatprep.mubr.msk.bf16.mxu1 %vm6344_vm1, %v6343_v1  ;;  %v694_v9 = vrot.slane %v6681_v7, 2  ;;  %v977_v48 = vshrl.u32 %v6681_v7, 16  ;;  %v980_v49 = vshll.u32 %v6681_v7, 16  ;;  %v1135_v37 = vrot.slane %v1133_v31, 1  ;;  %v6936_v31 = vld [vmem:[%s6400_s22 + $0x48] sm:$0xff]  }
  0x8b   : > { %v1333_v39 = vshrl.u32 %v6936_v31, 16  ;;  %v1336_v40 = vshll.u32 %v6936_v31, 16 }
  0x8c   : > { %v6701_v15 = vsel %vm688_vm7, %v692_v4, %v694_v9  ;;  %v6724_v24 = vsel %vm688_vm7, %v694_v9, %v6716_v20  ;;  %v979_v53 = vrot.slane %v977_v48, 2  ;;  %v982_v54 = vrot.slane %v980_v49, 3  ;;  %v4393_v4 = vld [vmem:[%s7717_s3 + $0x18] sm:$0xf]  ;;  %v4404_v49 = vld [vmem:[%s7717_s3 + $0x1c] sm:$0xf] }
  0x8d   : > { %4904 = vmatmul.mubr.msk.bf16.vlgmr.msra.gmra.mrb[0].mxu0 %vm270_vm3, %v6653_v61  ;;  %v6828_v7 = vsel %vm286_vm0, %v4393_v4, 0  ;;  %v4448_v9 = vcombine.low %v6711_v18, %v2040_v8  ;;  %v1136_v46 = vor.u32 %v1135_v37, %v1131_v35  ;;  %v6901_v48 = vld [vmem:[%s6400_s22 + $0x14] sm:$0xff]   ;;  %v6917_v60 = vsel %vm286_vm0, %v4404_v49, 0 }
  0x8e   : > { %4924 = vmatpush3.bf16.msra.mxu0 %v6661_v63  ;;  %4907 = vmatprep.mubr.msk.bf16.mxu0 %vm6344_vm1, %v6343_v1  ;;  %v983_v58 = vor.u32 %v982_v54, %v979_v53  ;;  %v1320_v54 = vrot.slane %v1318_v45, 2  ;;  %v1146_v59 = vshll.u32 %v6901_v48, 16  ;;  %v1313_v4 = vor.u32 %v1312_v26, %v1309_v50  ;;  %v6960_v26 = vld [vmem:[%s6400_s22 + $0x50] sm:$0x3f]  }
  0x8f   : > { %4945 = vmatprep.subr.bf16.mxu0 %v6343_v1  ;;  %v2081_v11 = vshrl.u32 %v4448_v9, 16  ;;  %v2084_v13 = vshll.u32 %v4448_v9, 16  ;;  %v1324_v9 = vshrl.u32 %v6907_v42, 16  ;;  %v1150_v35 = vshrl.u32 %v6901_v48, 16 }
  0x90   : > { %v6798_v62 = vsel %vm949_vm9, %v974_v47, %v983_v58  ;;  %v6812_v3 = vsel %vm949_vm9, %v983_v58, %v6802_v0  ;;  %v1140_v47 = vrot.slane %v1138_v38, 1  ;;  %v1142_v58 = vshrl.u32 %v6878_v30, 16 }
  0x91   : > { %5102 = vmatmul.mubr.msk.bf16.vlgmr.msra.gmra.mrb[0].mxu1 %vm270_vm3, %v6675_v5  ;;  %v2083_v18 = vrot.slane %v2081_v11, 3  ;;  %v2086_v19 = vrot.slane %v2084_v13, 4  ;;  %v1327_v11 = vshll.u32 %v6907_v42, 16  ;;  %v1148_v16 = vrot.slane %v1146_v59, 1 }
  0x92   : > { %5122 = vmatpush3.bf16.msra.mxu1 %v6661_v63  ;;  %5105 = vmatprep.mubr.msk.bf16.mxu1 %vm6344_vm1, %v6343_v1  ;;  %v6910_v57 = vsel %vm512_vm4, %v1136_v46, %v1140_v47  ;;  %v1144_v13 = vor.u32 %v1142_v58, %v1140_v47  ;;  %v1326_v22 = vrot.slane %v1324_v9, 1  ;;  %v6315_v46 = vld [vmem:[%s6400_s22 + $0x24] sm:$0x1f]   ;;  %v1335_v49 = vrot.slane %v1333_v39, 1 }
  0x93   : > { %5143 = vmatprep.subr.bf16.mxu1 %v6343_v1  ;;  %v6867_v27 = vor.u32 %v2086_v19, %v2083_v18  ;;  %v6929_v18 = vld [vmem:[%s6400_s22 + $0x1c] sm:$0xff]   ;;  %v1329_v28 = vrot.slane %v1327_v11, 2  ;;  %v1338_v50 = vrot.slane %v1336_v40, 2  ;;  %v1162_v58 = vshll.u32 %v6315_v46, 16  ;;  %v1449_v40 = vld [vmem:[%s6400_s22 + $0x4] sm:$0xe] }
  0x94   : > { %v6939_v33 = vsel %vm512_vm4, %v1144_v13, %v1148_v16  ;;  %v1154_v37 = vshll.u32 %v6929_v18, 16 }
  0x95   : > { %4908 = vmatmul.mubr.msk.bf16.gmra.mrb[4].mxu0 %vm270_vm3, %v6678_v6  ;;  %v6883_v32 = vsel %vm2044_vm6, %v6611_v55, %v6867_v27  ;;  %v1315_v55 = vshrl.u32 %v6887_v34, 16  ;;  %v1330_v38 = vor.u32 %v1329_v28, %v1326_v22  ;;  %v1339_v59 = vor.u32 %v1338_v50, %v1335_v49 }
  0x96   : > { %4911 = vmatprep.mubr.msk.bf16.mxu0 %vm6344_vm1, %v6343_v1  ;;  %v1156_v45 = vrot.slane %v1154_v37, 1  ;;  %v1164_v11 = vrot.slane %v1162_v58, 1  ;;  %v1166_v37 = vshrl.u32 %v6315_v46, 16 }
  0x97   : > { %v1317_v53 = vrot.slane %v1315_v55, 1  ;;  %v1152_v55 = vor.u32 %v1150_v35, %v1148_v16  ;;  %v6977_v13 = vsel %vm1305_vm5, %v1330_v38, %v1339_v59 }
  0x98   : > { %v6996_v39 = vor.u32 %v1166_v37, %v1164_v11 }
  0x99   : > { %5106 = vmatmul.mubr.msk.bf16.gmra.mrb[4].mxu1 %vm270_vm3, %v6698_v14  ;;  %v1321_v8 = vor.u32 %v1320_v54, %v1317_v53  ;;  %v6963_v53 = vsel %vm512_vm4, %v1152_v55, %v1156_v45  ;;  %v1158_v54 = vshrl.u32 %v6929_v18, 16  ;;  %v4415_v55 = vld [vmem:[%s7717_s3 + $0x20] sm:$0xf] }
  0x9a   : > { %5109 = vmatprep.mubr.msk.bf16.mxu1 %vm6344_vm1, %v6343_v1  ;;  %v7014_v49 = vsel %vm286_vm0, %v4415_v55, 0 }
  0x9b   : > { %v6933_v19 = vsel %vm1305_vm5, %v1313_v4, %v1321_v8  ;;  %v6957_v47 = vsel %vm1305_vm5, %v1321_v8, %v1330_v38  ;;  %v1342_v4 = vshrl.u32 %v6960_v26, 16  ;;  %v1345_v8 = vshll.u32 %v6960_v26, 16 }
  0x9c   : > { %v1160_v9 = vor.u32 %v1158_v54, %v1156_v45  ;;  %v4416_v45 = vcombine.low %v1449_v40, %v6860_v17  ;;  %v1456_v54 = vrot.slane %v6878_v30, 1  ;;  %v1458_v30 = vrot.slane %v6901_v48, 1 }
  0x9d   : > { %4912 = vmatmul.mubr.msk.bf16.gmra.mrb[8].mxu0 %vm270_vm3, %v6701_v15  ;;  %v1344_v16 = vrot.slane %v1342_v4, 1  ;;  %v1347_v22 = vrot.slane %v1345_v8, 2  ;;  %v1460_v48 = vrot.slane %v6929_v18, 1  ;;  %v7058_v4 = vrot.slane %v6315_v46, 1  ;;  %v2347_v46 = vld [vmem:[%s6400_s22 + $0x30] sm:$0xc] }
  0x9e   : > { %4915 = vmatprep.mubr.msk.bf16.mxu0 %vm6344_vm1, %v6343_v1  ;;  %v6980_v28 = vsel %vm512_vm4, %v1160_v9, %v1164_v11  ;;  %v1455_v50 = vrot.slane %v4416_v45, 1  ;;  %v7040_v58 = vsel %vm260_vm2, %v1456_v54, %v1458_v30  ;;  %v4464_v8 = vcombine.low %v2347_v46, %v6873_v29 }
  0x9f   : > { %v6986_v35 = vor.u32 %v1347_v22, %v1344_v16  ;;  %v7066_v18 = vsel %vm260_vm2, %v1460_v48, %v7058_v4  ;;  %v2352_v11 = vrot.slane %v6887_v34, 2  ;;  %v2354_v34 = vrot.slane %v6907_v42, 2 }
  0xa0   : > { %v7026_v17 = vsel %vm260_vm2, %v1455_v50, %v1456_v54  ;;  %v2351_v9 = vrot.slane %v4464_v8, 2  ;;  %v7123_v22 = vrot.slane %v6960_v26, 2 }
  0xa1   : > { %5110 = vmatmul.mubr.msk.bf16.gmra.mrb[8].mxu1 %vm270_vm3, %v6719_v21  ;;  %v6994_v38 = vsel %vm1305_vm5, %v1339_v59, %v6986_v35  ;;  %v7052_v59 = vsel %vm260_vm2, %v1458_v30, %v1460_v48  ;;  %v7104_v16 = vsel %vm688_vm7, %v2352_v11, %v2354_v34 }
  0xa2   : > { %5113 = vmatprep.mubr.msk.bf16.mxu1 %vm6344_vm1, %v6343_v1  ;;  %v7090_v29 = vsel %vm688_vm7, %v2351_v9, %v2352_v11 }
  0xa5   : > { %4916 = vmatmul.mubr.msk.bf16.gmra.mrb[12].mxu0 %vm270_vm3, %v6724_v24 }
  0xa6   : > { %4919 = vmatprep.mubr.msk.bf16.mxu0 %vm6344_vm1, %v6343_v1 }
  0xa9   : > { %5114 = vmatmul.mubr.msk.bf16.gmra.mrb[12].mxu1 %vm270_vm3, %v6738_v12 }
  0xaa   : > { %5117 = vmatprep.mubr.msk.bf16.mxu1 %vm6344_vm1, %v6343_v1 }
  0xad   : > { %4920 = vmatmul.mubr.msk.bf16.gmra.mrb[16].mxu0 %vm270_vm3, %v6716_v20 }
  0xae   : > { %4925 = vmatprep.mubr.msk.bf16.mxu0 %vm6344_vm1, %v6343_v1 }
  0xb1   : > { %5118 = vmatmul.mubr.msk.bf16.gmra.mrb[16].mxu1 %vm270_vm3, %v6730_v25 }
  0xb2   : > { %5123 = vmatprep.mubr.msk.bf16.mxu1 %vm6344_vm1, %v6343_v1 }
  0xb5   : > { %4926 = vmatmul.mubr.msk.bf16.vlgmr.msra.gmra.mrb[0].mxu0 %vm270_vm3, %v6675_v5 }
  0xb6   : > { %4946 = vmatpush3.bf16.msra.mxu0 %v6758_v36  ;;  %4929 = vmatprep.mubr.msk.bf16.mxu0 %vm6344_vm1, %v6343_v1 }
  0xb7   : > { %4967 = vmatprep.subr.bf16.mxu0 %v6343_v1 }
  0xb9   : > { %5124 = vmatmul.mubr.msk.bf16.vlgmr.msra.gmra.mrb[0].mxu1 %vm270_vm3, %v6771_v41 }
  0xba   : > { %5144 = vmatpush3.bf16.msra.mxu1 %v6758_v36  ;;  %5127 = vmatprep.mubr.msk.bf16.mxu1 %vm6344_vm1, %v6343_v1 }
  0xbb   : > { %5165 = vmatprep.subr.bf16.mxu1 %v6343_v1 }
  0xbd   : > { %4930 = vmatmul.mubr.msk.bf16.gmra.mrb[4].mxu0 %vm270_vm3, %v6698_v14 }
  0xbe   : > { %4933 = vmatprep.mubr.msk.bf16.mxu0 %vm6344_vm1, %v6343_v1 }
  0xc1   : > { %5128 = vmatmul.mubr.msk.bf16.gmra.mrb[4].mxu1 %vm270_vm3, %v6787_v52 }
  0xc2   : > { %5131 = vmatprep.mubr.msk.bf16.mxu1 %vm6344_vm1, %v6343_v1 }
  0xc5   : > { %4934 = vmatmul.mubr.msk.bf16.gmra.mrb[8].mxu0 %vm270_vm3, %v6719_v21 }
  0xc6   : > { %4937 = vmatprep.mubr.msk.bf16.mxu0 %vm6344_vm1, %v6343_v1 }
  0xc9   : > { %5132 = vmatmul.mubr.msk.bf16.gmra.mrb[8].mxu1 %vm270_vm3, %v6798_v62 }
  0xca   : > { %5135 = vmatprep.mubr.msk.bf16.mxu1 %vm6344_vm1, %v6343_v1 }
  0xcd   : > { %4938 = vmatmul.mubr.msk.bf16.gmra.mrb[12].mxu0 %vm270_vm3, %v6738_v12 }
  0xce   : > { %4941 = vmatprep.mubr.msk.bf16.mxu0 %vm6344_vm1, %v6343_v1 }
  0xd1   : > { %5136 = vmatmul.mubr.msk.bf16.gmra.mrb[12].mxu1 %vm270_vm3, %v6812_v3 }
  0xd2   : > { %5139 = vmatprep.mubr.msk.bf16.mxu1 %vm6344_vm1, %v6343_v1 }
  0xd5   : > { %4942 = vmatmul.mubr.msk.bf16.gmra.mrb[16].mxu0 %vm270_vm3, %v6730_v25 }
  0xd6   : > { %4947 = vmatprep.mubr.msk.bf16.mxu0 %vm6344_vm1, %v6343_v1 }
  0xd9   : > { %5140 = vmatmul.mubr.msk.bf16.gmra.mrb[16].mxu1 %vm270_vm3, %v6802_v0 }
  0xda   : > { %5145 = vmatprep.mubr.msk.bf16.mxu1 %vm6344_vm1, %v6343_v1 }
  0xdd   : > { %4948 = vmatmul.mubr.msk.bf16.vlgmr.msra.gmra.mrb[0].mxu0 %vm270_vm3, %v6771_v41 }
  0xde   : > { %4968 = vmatpush3.bf16.msra.mxu0 %v6828_v7  ;;  %4951 = vmatprep.mubr.msk.bf16.mxu0 %vm6344_vm1, %v6343_v1 }
  0xdf   : > { %4989 = vmatprep.subr.bf16.mxu0 %v6343_v1 }
  0xe1   : > { %5146 = vmatmul.mubr.msk.bf16.vlgmr.msra.gmra.mrb[0].mxu1 %vm270_vm3, %v6581_v44 }
  0xe2   : > { %5166 = vmatpush3.bf16.msra.mxu1 %v6828_v7  ;;  %5149 = vmatprep.mubr.msk.bf16.mxu1 %vm6344_vm1, %v6343_v1 }
  0xe3   : > { %5187 = vmatprep.subr.bf16.mxu1 %v6343_v1 }
  0xe5   : > { %4952 = vmatmul.mubr.msk.bf16.gmra.mrb[4].mxu0 %vm270_vm3, %v6787_v52 }
  0xe6   : > { %4955 = vmatprep.mubr.msk.bf16.mxu0 %vm6344_vm1, %v6343_v1 }
  0xe9   : > { %5150 = vmatmul.mubr.msk.bf16.gmra.mrb[4].mxu1 %vm270_vm3, %v6597_v51 }
  0xea   : > { %5153 = vmatprep.mubr.msk.bf16.mxu1 %vm6344_vm1, %v6343_v1 }
  0xed   : > { %4956 = vmatmul.mubr.msk.bf16.gmra.mrb[8].mxu0 %vm270_vm3, %v6798_v62 }
  0xee   : > { %4959 = vmatprep.mubr.msk.bf16.mxu0 %vm6344_vm1, %v6343_v1 }
  0xf1   : > { %5154 = vmatmul.mubr.msk.bf16.gmra.mrb[8].mxu1 %vm270_vm3, %v6615_v56 }
  0xf2   : > { %5157 = vmatprep.mubr.msk.bf16.mxu1 %vm6344_vm1, %v6343_v1 }
  0xf5   : > { %4960 = vmatmul.mubr.msk.bf16.gmra.mrb[12].mxu0 %vm270_vm3, %v6812_v3 }
  0xf6   : > { %4963 = vmatprep.mubr.msk.bf16.mxu0 %vm6344_vm1, %v6343_v1 }
  0xf9   : > { %5158 = vmatmul.mubr.msk.bf16.gmra.mrb[12].mxu1 %vm270_vm3, %v6883_v32 }
  0xfa   : > { %5161 = vmatprep.mubr.msk.bf16.mxu1 %vm6344_vm1, %v6343_v1 }
  0xfd   : > { %4964 = vmatmul.mubr.msk.bf16.gmra.mrb[16].mxu0 %vm270_vm3, %v6802_v0 }
  0xfe   : > { %4969 = vmatprep.mubr.msk.bf16.mxu0 %vm6344_vm1, %v6343_v1 }
 0x101   : > { %5162 = vmatmul.mubr.msk.bf16.gmra.mrb[16].mxu1 %vm270_vm3, %v6867_v27 }
 0x102   : > { %5167 = vmatprep.mubr.msk.bf16.mxu1 %vm6344_vm1, %v6343_v1 }
 0x105   : > { %4970 = vmatmul.mubr.msk.bf16.vlgmr.msra.gmra.mrb[0].mxu0 %vm270_vm3, %v6910_v57 }
 0x106   : > { %4990 = vmatpush3.bf16.msra.mxu0 %v6917_v60  ;;  %4973 = vmatprep.mubr.msk.bf16.mxu0 %vm6344_vm1, %v6343_v1 }
 0x107   : > { %5011 = vmatprep.subr.bf16.mxu0 %v6343_v1 }
 0x109   : > { %5168 = vmatmul.mubr.msk.bf16.vlgmr.msra.gmra.mrb[0].mxu1 %vm270_vm3, %v6933_v19 }
 0x10a   : > { %5188 = vmatpush3.bf16.msra.mxu1 %v6917_v60  ;;  %5171 = vmatprep.mubr.msk.bf16.mxu1 %vm6344_vm1, %v6343_v1 }
 0x10b   : > { %5209 = vmatprep.subr.bf16.mxu1 %v6343_v1 }
 0x10d   : > { %4974 = vmatmul.mubr.msk.bf16.gmra.mrb[4].mxu0 %vm270_vm3, %v6939_v33 }
 0x10e   : > { %4977 = vmatprep.mubr.msk.bf16.mxu0 %vm6344_vm1, %v6343_v1 }
 0x111   : > { %5172 = vmatmul.mubr.msk.bf16.gmra.mrb[4].mxu1 %vm270_vm3, %v6957_v47 }
 0x112   : > { %5175 = vmatprep.mubr.msk.bf16.mxu1 %vm6344_vm1, %v6343_v1 }
 0x115   : > { %4978 = vmatmul.mubr.msk.bf16.gmra.mrb[8].mxu0 %vm270_vm3, %v6963_v53 }
 0x116   : > { %4981 = vmatprep.mubr.msk.bf16.mxu0 %vm6344_vm1, %v6343_v1 }
 0x119   : > { %5176 = vmatmul.mubr.msk.bf16.gmra.mrb[8].mxu1 %vm270_vm3, %v6977_v13 }
 0x11a   : > { %5179 = vmatprep.mubr.msk.bf16.mxu1 %vm6344_vm1, %v6343_v1 }
 0x11d   : > { %4982 = vmatmul.mubr.msk.bf16.gmra.mrb[12].mxu0 %vm270_vm3, %v6980_v28 }
 0x11e   : > { %4985 = vmatprep.mubr.msk.bf16.mxu0 %vm6344_vm1, %v6343_v1 }
 0x121   : > { %5180 = vmatmul.mubr.msk.bf16.gmra.mrb[12].mxu1 %vm270_vm3, %v6994_v38 }
 0x122   : > { %5183 = vmatprep.mubr.msk.bf16.mxu1 %vm6344_vm1, %v6343_v1 }
 0x125   : > { %4986 = vmatmul.mubr.msk.bf16.gmra.mrb[16].mxu0 %vm270_vm3, %v6996_v39 }
 0x126   : > { %4991 = vmatprep.mubr.msk.bf16.mxu0 %vm6344_vm1, %v6343_v1 }
 0x129   : > { %5184 = vmatmul.mubr.msk.bf16.gmra.mrb[16].mxu1 %vm270_vm3, %v6986_v35 }
 0x12a   : > { %5189 = vmatprep.mubr.msk.bf16.mxu1 %vm6344_vm1, %v6343_v1 }
 0x12d   : > { %4992 = vmatmul.mubr.msk.bf16.vlgmr.msra.gmra.mrb[0].mxu0 %vm270_vm3, %v6933_v19 }
 0x12e   : > { %5012 = vmatpush3.bf16.msra.mxu0 %v7014_v49  ;;  %4995 = vmatprep.mubr.msk.bf16.mxu0 %vm6344_vm1, %v6343_v1 }
 0x12f   : > { %5231 = vmatprep.subr.bf16.mxu0 %v6343_v1 }
 0x131   : > { %5190 = vmatmul.mubr.msk.bf16.vlgmr.msra.gmra.mrb[0].mxu1 %vm270_vm3, %v7026_v17 }
 0x132   : > { %5210 = vmatpush3.bf16.msra.mxu1 %v7014_v49  ;;  %5193 = vmatprep.mubr.msk.bf16.mxu1 %vm6344_vm1, %v6343_v1 }
 0x133   : > { %5429 = vmatprep.subr.bf16.mxu1 %v6343_v1 }
 0x135   : > { %4996 = vmatmul.mubr.msk.bf16.gmra.mrb[4].mxu0 %vm270_vm3, %v6957_v47 }
 0x136   : > { %4999 = vmatprep.mubr.msk.bf16.mxu0 %vm6344_vm1, %v6343_v1 }
 0x139   : > { %5194 = vmatmul.mubr.msk.bf16.gmra.mrb[4].mxu1 %vm270_vm3, %v7040_v58 }
 0x13a   : > { %5197 = vmatprep.mubr.msk.bf16.mxu1 %vm6344_vm1, %v6343_v1 }
 0x13d   : > { %5000 = vmatmul.mubr.msk.bf16.gmra.mrb[8].mxu0 %vm270_vm3, %v6977_v13 }
 0x13e   : > { %5003 = vmatprep.mubr.msk.bf16.mxu0 %vm6344_vm1, %v6343_v1 }
 0x141   : > { %5198 = vmatmul.mubr.msk.bf16.gmra.mrb[8].mxu1 %vm270_vm3, %v7052_v59 }
 0x142   : > { %5201 = vmatprep.mubr.msk.bf16.mxu1 %vm6344_vm1, %v6343_v1 }
 0x145   : > { %5004 = vmatmul.mubr.msk.bf16.gmra.mrb[12].mxu0 %vm270_vm3, %v6994_v38 }
 0x146   : > { %5007 = vmatprep.mubr.msk.bf16.mxu0 %vm6344_vm1, %v6343_v1 }
 0x149   : > { %5202 = vmatmul.mubr.msk.bf16.gmra.mrb[12].mxu1 %vm270_vm3, %v7066_v18 }
 0x14a   : > { %5205 = vmatprep.mubr.msk.bf16.mxu1 %vm6344_vm1, %v6343_v1 }
 0x14d   : > { %5008 = vmatmul.mubr.msk.bf16.gmra.mrb[16].mxu0 %vm270_vm3, %v6986_v35 }
 0x14e   : > { %5013 = vmatprep.mubr.msk.bf16.mxu0 %vm6344_vm1, %v6343_v1 }
 0x151   : > { %5206 = vmatmul.mubr.msk.bf16.gmra.mrb[16].mxu1 %vm270_vm3, %v7058_v4 }
 0x152   : > { %5211 = vmatprep.mubr.msk.bf16.mxu1 %vm6344_vm1, %v6343_v1 }
 0x155   : > { %5014 = vmatmul.mubr.msk.bf16.vlgmr.msra.gmra.mrb[0].mxu0 %vm270_vm3, %v7026_v17 }
 0x156   : > { %5232 = vmatpush3.bf16.msra.mxu0 %v6383_v2  ;;  %5017 = vmatprep.mubr.msk.bf16.mxu0 %vm6344_vm1, %v6343_v1 }
 0x157   : > { %5253 = vmatprep.subr.bf16.mxu0 %v6343_v1 }
 0x159   : > { %5212 = vmatmul.mubr.msk.bf16.vlgmr.msra.gmra.mrb[0].mxu1 %vm270_vm3, %v7090_v29 }
 0x15a   : > { %5430 = vmatpush3.bf16.msra.mxu1 %v6383_v2  ;;  %5215 = vmatprep.mubr.msk.bf16.mxu1 %vm6344_vm1, %v6343_v1  ;;  %v2356_v2 = vrot.slane %v6936_v31, 2 }
 0x15b   : > { %5451 = vmatprep.subr.bf16.mxu1 %v6343_v1 }
 0x15c   : > { %v7116_v42 = vsel %vm688_vm7, %v2354_v34, %v2356_v2  ;;  %v7131_v31 = vsel %vm688_vm7, %v2356_v2, %v7123_v22 }
 0x15d   : > { %5018 = vmatmul.mubr.msk.bf16.gmra.mrb[4].mxu0 %vm270_vm3, %v7040_v58 }
 0x15e   : > { %5021 = vmatprep.mubr.msk.bf16.mxu0 %vm6344_vm1, %v6343_v1 }
 0x161   : > { %5216 = vmatmul.mubr.msk.bf16.gmra.mrb[4].mxu1 %vm270_vm3, %v7104_v16 }
 0x162   : > { %5219 = vmatprep.mubr.msk.bf16.mxu1 %vm6344_vm1, %v6343_v1 }
 0x165   : > { %5022 = vmatmul.mubr.msk.bf16.gmra.mrb[8].mxu0 %vm270_vm3, %v7052_v59 }
 0x166   : > { %5025 = vmatprep.mubr.msk.bf16.mxu0 %vm6344_vm1, %v6343_v1 }
 0x169   : > { %5220 = vmatmul.mubr.msk.bf16.gmra.mrb[8].mxu1 %vm270_vm3, %v7116_v42 }
 0x16a   : > { %5223 = vmatprep.mubr.msk.bf16.mxu1 %vm6344_vm1, %v6343_v1 }
 0x16d   : > { %5026 = vmatmul.mubr.msk.bf16.gmra.mrb[12].mxu0 %vm270_vm3, %v7066_v18 }
 0x16e   : > { %5029 = vmatprep.mubr.msk.bf16.mxu0 %vm6344_vm1, %v6343_v1 }
 0x171   : > { %5224 = vmatmul.mubr.msk.bf16.gmra.mrb[12].mxu1 %vm270_vm3, %v7131_v31 }
 0x172   : > { %5227 = vmatprep.mubr.msk.bf16.mxu1 %vm6344_vm1, %v6343_v1 }
 0x175   : > { %5030 = vmatmul.mubr.msk.bf16.gmra.mrb[16].mxu0 %vm270_vm3, %v7058_v4 }
 0x176   : > { %5233 = vmatprep.mubr.msk.bf16.mxu0 %vm6344_vm1, %v6343_v1 }
 0x179   : > { %5228 = vmatmul.mubr.msk.bf16.gmra.mrb[16].mxu1 %vm270_vm3, %v7123_v22 }
 0x17a   : > { %5431 = vmatprep.mubr.msk.bf16.mxu1 %vm6344_vm1, %v6343_v1 }
 0x17d   : > { %5234 = vmatmul.mubr.msk.bf16.vlgmr.msra.gmra.mrb[20].mxu0 %vm270_vm3, %v6675_v5 }
 0x17e   : > { %5254 = vmatpush3.bf16.msra.mxu0 %v6410_v10  ;;  %5237 = vmatprep.mubr.msk.bf16.mxu0 %vm6344_vm1, %v6343_v1 }
 0x17f   : > { %5275 = vmatprep.subr.bf16.mxu0 %v6343_v1 }
 0x181   : > { %5432 = vmatmul.mubr.msk.bf16.vlgmr.msra.gmra.mrb[20].mxu1 %vm270_vm3, %v6771_v41 }
 0x182   : > { %5452 = vmatpush3.bf16.msra.mxu1 %v6410_v10  ;;  %5435 = vmatprep.mubr.msk.bf16.mxu1 %vm6344_vm1, %v6343_v1  ;;  %v7340_v10 = vld [vmem:[%s7714_s0] ss:$0 sm:$0xff] }
 0x183   : > { %5473 = vmatprep.subr.bf16.mxu1 %v6343_v1 }
 0x185   : > { %5238 = vmatmul.mubr.msk.bf16.gmra.mrb[24].mxu0 %vm270_vm3, %v6698_v14 }
 0x186   : > { %5241 = vmatprep.mubr.msk.bf16.mxu0 %vm6344_vm1, %v6343_v1 }
 0x189   : > { %5436 = vmatmul.mubr.msk.bf16.gmra.mrb[24].mxu1 %vm270_vm3, %v6787_v52 }
 0x18a   : > { %5439 = vmatprep.mubr.msk.bf16.mxu1 %vm6344_vm1, %v6343_v1 }
 0x18d   : > { %5242 = vmatmul.mubr.msk.bf16.gmra.mrb[28].mxu0 %vm270_vm3, %v6719_v21 }
 0x18e   : > { %5245 = vmatprep.mubr.msk.bf16.mxu0 %vm6344_vm1, %v6343_v1 }
 0x191   : > { %5440 = vmatmul.mubr.msk.bf16.gmra.mrb[28].mxu1 %vm270_vm3, %v6798_v62 }
 0x192   : > { %5443 = vmatprep.mubr.msk.bf16.mxu1 %vm6344_vm1, %v6343_v1 }
 0x195   : > { %5246 = vmatmul.mubr.msk.bf16.gmra.mrb[32].mxu0 %vm270_vm3, %v6738_v12 }
 0x196   : > { %5249 = vmatprep.mubr.msk.bf16.mxu0 %vm6344_vm1, %v6343_v1 }
 0x199   : > { %5444 = vmatmul.mubr.msk.bf16.gmra.mrb[32].mxu1 %vm270_vm3, %v6812_v3 }
 0x19a   : > { %5447 = vmatprep.mubr.msk.bf16.mxu1 %vm6344_vm1, %v6343_v1 }
 0x19d   : > { %5250 = vmatmul.mubr.msk.bf16.gmra.mrb[36].mxu0 %vm270_vm3, %v6730_v25 }
 0x19e   : > { %5255 = vmatprep.mubr.msk.bf16.mxu0 %vm6344_vm1, %v6343_v1 }
 0x1a1   : > { %5448 = vmatmul.mubr.msk.bf16.gmra.mrb[36].mxu1 %vm270_vm3, %v6802_v0 }
 0x1a2   : > { %5453 = vmatprep.mubr.msk.bf16.mxu1 %vm6344_vm1, %v6343_v1 }
 0x1a5   : > { %5256 = vmatmul.mubr.msk.bf16.vlgmr.msra.gmra.mrb[20].mxu0 %vm270_vm3, %v6653_v61  ;;  %v7348_v61 = vld [vmem:[%s7715_s1] ss:$0 sm:$0xff] }
 0x1a6   : > { %5276 = vmatpush3.bf16.msra.mxu0 %v6517_v23  ;;  %5259 = vmatprep.mubr.msk.bf16.mxu0 %vm6344_vm1, %v6343_v1 }
 0x1a7   : > { %5297 = vmatprep.subr.bf16.mxu0 %v6343_v1 }
 0x1a9   : > { %5454 = vmatmul.mubr.msk.bf16.vlgmr.msra.gmra.mrb[20].mxu1 %vm270_vm3, %v6675_v5 }
 0x1aa   : > { %5474 = vmatpush3.bf16.msra.mxu1 %v6517_v23  ;;  %5457 = vmatprep.mubr.msk.bf16.mxu1 %vm6344_vm1, %v6343_v1 }
 0x1ab   : > { %5495 = vmatprep.subr.bf16.mxu1 %v6343_v1 }
 0x1ad   : > { %5260 = vmatmul.mubr.msk.bf16.gmra.mrb[24].mxu0 %vm270_vm3, %v6678_v6 }
 0x1ae   : > { %5263 = vmatprep.mubr.msk.bf16.mxu0 %vm6344_vm1, %v6343_v1 }
 0x1b1   : > { %5458 = vmatmul.mubr.msk.bf16.gmra.mrb[24].mxu1 %vm270_vm3, %v6698_v14 }
 0x1b2   : > { %5461 = vmatprep.mubr.msk.bf16.mxu1 %vm6344_vm1, %v6343_v1 }
 0x1b5   : > { %5264 = vmatmul.mubr.msk.bf16.gmra.mrb[28].mxu0 %vm270_vm3, %v6701_v15 }
 0x1b6   : > { %5267 = vmatprep.mubr.msk.bf16.mxu0 %vm6344_vm1, %v6343_v1 }
 0x1b9   : > { %5462 = vmatmul.mubr.msk.bf16.gmra.mrb[28].mxu1 %vm270_vm3, %v6719_v21 }
 0x1ba   : > { %5465 = vmatprep.mubr.msk.bf16.mxu1 %vm6344_vm1, %v6343_v1 }
 0x1bd   : > { %5268 = vmatmul.mubr.msk.bf16.gmra.mrb[32].mxu0 %vm270_vm3, %v6724_v24 }
 0x1be   : > { %5271 = vmatprep.mubr.msk.bf16.mxu0 %vm6344_vm1, %v6343_v1 }
 0x1c1   : > { %5466 = vmatmul.mubr.msk.bf16.gmra.mrb[32].mxu1 %vm270_vm3, %v6738_v12 }
 0x1c2   : > { %5469 = vmatprep.mubr.msk.bf16.mxu1 %vm6344_vm1, %v6343_v1 }
 0x1c5   : > { %5272 = vmatmul.mubr.msk.bf16.gmra.mrb[36].mxu0 %vm270_vm3, %v6716_v20 }
 0x1c6   : > { %5277 = vmatprep.mubr.msk.bf16.mxu0 %vm6344_vm1, %v6343_v1 }
 0x1c9   : > { %5470 = vmatmul.mubr.msk.bf16.gmra.mrb[36].mxu1 %vm270_vm3, %v6730_v25 }
 0x1ca   : > { %5475 = vmatprep.mubr.msk.bf16.mxu1 %vm6344_vm1, %v6343_v1 }
 0x1cd   : > { %5278 = vmatmul.mubr.msk.bf16.vlgmr.msra.gmra.mrb[20].mxu0 %vm270_vm3, %v6771_v41 }
 0x1ce   : > { %5298 = vmatpush3.bf16.msra.mxu0 %v6578_v43  ;;  %5281 = vmatprep.mubr.msk.bf16.mxu0 %vm6344_vm1, %v6343_v1 }
 0x1cf   : > { %5319 = vmatprep.subr.bf16.mxu0 %v6343_v1 }
 0x1d1   : > { %5476 = vmatmul.mubr.msk.bf16.vlgmr.msra.gmra.mrb[20].mxu1 %vm270_vm3, %v6581_v44 }
 0x1d2   : > { %5496 = vmatpush3.bf16.msra.mxu1 %v6578_v43  ;;  %5479 = vmatprep.mubr.msk.bf16.mxu1 %vm6344_vm1, %v6343_v1 }
 0x1d3   : > { %5517 = vmatprep.subr.bf16.mxu1 %v6343_v1 }
 0x1d5   : > { %5282 = vmatmul.mubr.msk.bf16.gmra.mrb[24].mxu0 %vm270_vm3, %v6787_v52 }
 0x1d6   : > { %5285 = vmatprep.mubr.msk.bf16.mxu0 %vm6344_vm1, %v6343_v1 }
 0x1d9   : > { %5480 = vmatmul.mubr.msk.bf16.gmra.mrb[24].mxu1 %vm270_vm3, %v6597_v51 }
 0x1da   : > { %5483 = vmatprep.mubr.msk.bf16.mxu1 %vm6344_vm1, %v6343_v1 }
 0x1dd   : > { %5286 = vmatmul.mubr.msk.bf16.gmra.mrb[28].mxu0 %vm270_vm3, %v6798_v62 }
 0x1de   : > { %5289 = vmatprep.mubr.msk.bf16.mxu0 %vm6344_vm1, %v6343_v1 }
 0x1e1   : > { %5484 = vmatmul.mubr.msk.bf16.gmra.mrb[28].mxu1 %vm270_vm3, %v6615_v56 }
 0x1e2   : > { %5487 = vmatprep.mubr.msk.bf16.mxu1 %vm6344_vm1, %v6343_v1 }
 0x1e5   : > { %5290 = vmatmul.mubr.msk.bf16.gmra.mrb[32].mxu0 %vm270_vm3, %v6812_v3 }
 0x1e6   : > { %5293 = vmatprep.mubr.msk.bf16.mxu0 %vm6344_vm1, %v6343_v1 }
 0x1e9   : > { %5488 = vmatmul.mubr.msk.bf16.gmra.mrb[32].mxu1 %vm270_vm3, %v6883_v32 }
 0x1ea   : > { %5491 = vmatprep.mubr.msk.bf16.mxu1 %vm6344_vm1, %v6343_v1 }
 0x1ed   : > { %5294 = vmatmul.mubr.msk.bf16.gmra.mrb[36].mxu0 %vm270_vm3, %v6802_v0 }
 0x1ee   : > { %5299 = vmatprep.mubr.msk.bf16.mxu0 %vm6344_vm1, %v6343_v1 }
 0x1f1   : > { %5492 = vmatmul.mubr.msk.bf16.gmra.mrb[36].mxu1 %vm270_vm3, %v6867_v27 }
 0x1f2   : > { %5497 = vmatprep.mubr.msk.bf16.mxu1 %vm6344_vm1, %v6343_v1 }
 0x1f5   : > { %5300 = vmatmul.mubr.msk.bf16.vlgmr.msra.gmra.mrb[20].mxu0 %vm270_vm3, %v6910_v57 }
 0x1f6   : > { %5320 = vmatpush3.bf16.msra.mxu0 %v6661_v63  ;;  %5303 = vmatprep.mubr.msk.bf16.mxu0 %vm6344_vm1, %v6343_v1 }
 0x1f7   : > { %5341 = vmatprep.subr.bf16.mxu0 %v6343_v1 }
 0x1f9   : > { %5498 = vmatmul.mubr.msk.bf16.vlgmr.msra.gmra.mrb[20].mxu1 %vm270_vm3, %v6933_v19 }
 0x1fa   : > { %5518 = vmatpush3.bf16.msra.mxu1 %v6661_v63  ;;  %5501 = vmatprep.mubr.msk.bf16.mxu1 %vm6344_vm1, %v6343_v1 }
 0x1fb   : > { %5539 = vmatprep.subr.bf16.mxu1 %v6343_v1 }
 0x1fd   : > { %5304 = vmatmul.mubr.msk.bf16.gmra.mrb[24].mxu0 %vm270_vm3, %v6939_v33 }
 0x1fe   : > { %5307 = vmatprep.mubr.msk.bf16.mxu0 %vm6344_vm1, %v6343_v1 }
 0x201   : > { %5502 = vmatmul.mubr.msk.bf16.gmra.mrb[24].mxu1 %vm270_vm3, %v6957_v47 }
 0x202   : > { %5505 = vmatprep.mubr.msk.bf16.mxu1 %vm6344_vm1, %v6343_v1 }
 0x205   : > { %5308 = vmatmul.mubr.msk.bf16.gmra.mrb[28].mxu0 %vm270_vm3, %v6963_v53 }
 0x206   : > { %5311 = vmatprep.mubr.msk.bf16.mxu0 %vm6344_vm1, %v6343_v1 }
 0x209   : > { %5506 = vmatmul.mubr.msk.bf16.gmra.mrb[28].mxu1 %vm270_vm3, %v6977_v13 }
 0x20a   : > { %5509 = vmatprep.mubr.msk.bf16.mxu1 %vm6344_vm1, %v6343_v1 }
 0x20d   : > { %5312 = vmatmul.mubr.msk.bf16.gmra.mrb[32].mxu0 %vm270_vm3, %v6980_v28 }
 0x20e   : > { %5315 = vmatprep.mubr.msk.bf16.mxu0 %vm6344_vm1, %v6343_v1 }
 0x211   : > { %5510 = vmatmul.mubr.msk.bf16.gmra.mrb[32].mxu1 %vm270_vm3, %v6994_v38 }
 0x212   : > { %5513 = vmatprep.mubr.msk.bf16.mxu1 %vm6344_vm1, %v6343_v1 }
 0x215   : > { %5316 = vmatmul.mubr.msk.bf16.gmra.mrb[36].mxu0 %vm270_vm3, %v6996_v39 }
 0x216   : > { %5321 = vmatprep.mubr.msk.bf16.mxu0 %vm6344_vm1, %v6343_v1 }
 0x219   : > { %5514 = vmatmul.mubr.msk.bf16.gmra.mrb[36].mxu1 %vm270_vm3, %v6986_v35 }
 0x21a   : > { %5519 = vmatprep.mubr.msk.bf16.mxu1 %vm6344_vm1, %v6343_v1 }
 0x21d   : > { %5322 = vmatmul.mubr.msk.bf16.vlgmr.msra.gmra.mrb[20].mxu0 %vm270_vm3, %v6933_v19 }
 0x21e   : > { %5342 = vmatpush3.bf16.msra.mxu0 %v6758_v36  ;;  %5325 = vmatprep.mubr.msk.bf16.mxu0 %vm6344_vm1, %v6343_v1 }
 0x21f   : > { %5363 = vmatprep.subr.bf16.mxu0 %v6343_v1 }
 0x221   : > { %5520 = vmatmul.mubr.msk.bf16.vlgmr.msra.gmra.mrb[20].mxu1 %vm270_vm3, %v7026_v17 }
 0x222   : > { %5540 = vmatpush3.bf16.msra.mxu1 %v6758_v36  ;;  %5523 = vmatprep.mubr.msk.bf16.mxu1 %vm6344_vm1, %v6343_v1 }
 0x223   : > { %5561 = vmatprep.subr.bf16.mxu1 %v6343_v1 }
 0x225   : > { %5326 = vmatmul.mubr.msk.bf16.gmra.mrb[24].mxu0 %vm270_vm3, %v6957_v47 }
 0x226   : > { %5329 = vmatprep.mubr.msk.bf16.mxu0 %vm6344_vm1, %v6343_v1 }
 0x228   : > { %v1516_v23 = vpop.f32.mrb[0].mxu0 }
 0x229   : > { %v5015_v43 = vpop.f32.mrb[1].mxu0  ;;  %v1563_v51 = vmul.f32 %v7340_v10, %v1516_v23  ;;  %5524 = vmatmul.mubr.msk.bf16.gmra.mrb[24].mxu1 %vm270_vm3, %v7040_v58 }
 0x22a   : > { %v1519_v44 = vpop.f32.mrb[2].mxu0  ;;  %5527 = vmatprep.mubr.msk.bf16.mxu1 %vm6344_vm1, %v6343_v1 }
 0x22b   : > { %v5016_v56 = vpop.f32.mrb[3].mxu0  ;;  %v1564_v63 = vmul.f32 %v7340_v10, %v1519_v44  ;;  %v1572_v6 = vadd.f32 %v7348_v61, %v1563_v51 }
 0x22c   : > { %v2409_v5 = vpop.f32.mrb[0].mxu1 }
 0x22d   : > { %5330 = vmatmul.mubr.msk.bf16.gmra.mrb[28].mxu0 %vm270_vm3, %v6977_v13  ;;  %v2456_v14 = vmul.f32 %v7340_v10, %v2409_v5  ;;  %v5213_v15 = vpop.f32.mrb[1].mxu1  ;;  %v1573_v24 = vadd.f32 %v7348_v61, %v1564_v63  ;;  %v1581_v62 = vmax.f32 %v1572_v6, 0.0 }
 0x22e   : > { %5333 = vmatprep.mubr.msk.bf16.mxu0 %vm6344_vm1, %v6343_v1  ;;  %v2412_v20 = vpop.f32.mrb[2].mxu1 }
 0x22f   : > { %v2465_v25 = vadd.f32 %v7348_v61, %v2456_v14  ;;  %v2457_v12 = vmul.f32 %v7340_v10, %v2412_v20  ;;  %v5214_v36 = vpop.f32.mrb[3].mxu1  ;;  %v1582_v57 = vmax.f32 %v1573_v24, 0.0 }
 0x230   : > { %v1524_v21 = vpop.f32.mrb[4].mxu0 }
 0x231   : > { %v5019_v41 = vpop.f32.mrb[5].mxu0  ;;  %v2474_v0 = vmax.f32 %v2465_v25, 0.0  ;;  %v2466_v3 = vadd.f32 %v7348_v61, %v2457_v12  ;;  %v1565_v27 = vmul.f32 %v7340_v10, %v1524_v21  ;;  %5528 = vmatmul.mubr.msk.bf16.gmra.mrb[28].mxu1 %vm270_vm3, %v7052_v59 }
 0x232   : > { %v1527_v52 = vpop.f32.mrb[6].mxu0  ;;  %5531 = vmatprep.mubr.msk.bf16.mxu1 %vm6344_vm1, %v6343_v1 }
 0x233   : > { %v5020_v32 = vpop.f32.mrb[7].mxu0  ;;  %v7368_v19 = vmax.f32 %v1581_v62, %v2474_v0  ;;  %v2475_v33 = vmax.f32 %v2466_v3, 0.0  ;;  %v1566_v47 = vmul.f32 %v7340_v10, %v1527_v52  ;;  %v1574_v13 = vadd.f32 %v7348_v61, %v1565_v27 }
 0x234   : > { %v2417_v26 = vpop.f32.mrb[4].mxu1 }
 0x235   : > { %5334 = vmatmul.mubr.msk.bf16.gmra.mrb[32].mxu0 %vm270_vm3, %v6994_v38  ;;  %v7375_v53 = vmax.f32 %v1582_v57, %v2475_v33  ;;  %v2458_v28 = vmul.f32 %v7340_v10, %v2417_v26  ;;  %v5217_v37 = vpop.f32.mrb[5].mxu1  ;;  %v1575_v55 = vadd.f32 %v7348_v61, %v1566_v47  ;;  %v1583_v48 = vmax.f32 %v1574_v13, 0.0 }
 0x236   : > { %5337 = vmatprep.mubr.msk.bf16.mxu0 %vm6344_vm1, %v6343_v1  ;;  %v2420_v39 = vpop.f32.mrb[6].mxu1 }
 0x237   : > { %v2467_v45 = vadd.f32 %v7348_v61, %v2458_v28  ;;  %v2459_v50 = vmul.f32 %v7340_v10, %v2420_v39  ;;  %v5218_v38 = vpop.f32.mrb[7].mxu1  ;;  %v1584_v34 = vmax.f32 %v1575_v55, 0.0 }
 0x238   : > { %v1532_v40 = vpop.f32.mrb[8].mxu0 }
 0x239   : > { %v5023_v54 = vpop.f32.mrb[9].mxu0  ;;  %v2476_v46 = vmax.f32 %v2467_v45, 0.0  ;;  %v2468_v8 = vadd.f32 %v7348_v61, %v2459_v50  ;;  %v1567_v9 = vmul.f32 %v7340_v10, %v1532_v40  ;;  %5532 = vmatmul.mubr.msk.bf16.gmra.mrb[32].mxu1 %vm270_vm3, %v7066_v18 }
 0x23a   : > { %v1535_v30 = vpop.f32.mrb[10].mxu0  ;;  %5535 = vmatprep.mubr.msk.bf16.mxu1 %vm6344_vm1, %v6343_v1 }
 0x23b   : > { %v5024_v11 = vpop.f32.mrb[11].mxu0  ;;  %v7388_v2 = vmax.f32 %v1583_v48, %v2476_v46  ;;  %v2477_v23 = vmax.f32 %v2468_v8, 0.0  ;;  %v1568_v43 = vmul.f32 %v7340_v10, %v1535_v30  ;;  %v1576_v56 = vadd.f32 %v7348_v61, %v1567_v9 }
 0x23c   : > { %v2425_v44 = vpop.f32.mrb[8].mxu1 }
 0x23d   : > { %5338 = vmatmul.mubr.msk.bf16.gmra.mrb[36].mxu0 %vm270_vm3, %v6986_v35  ;;  %v7395_v51 = vmax.f32 %v1584_v34, %v2477_v23  ;;  %v2460_v63 = vmul.f32 %v7340_v10, %v2425_v44  ;;  %v5221_v5 = vpop.f32.mrb[9].mxu1  ;;  %v1577_v15 = vadd.f32 %v7348_v61, %v1568_v43  ;;  %v1585_v12 = vmax.f32 %v1576_v56, 0.0 }
 0x23e   : > { %5343 = vmatprep.mubr.msk.bf16.mxu0 %vm6344_vm1, %v6343_v1  ;;  %v2428_v6 = vpop.f32.mrb[10].mxu1 }
 0x23f   : > { %v2469_v20 = vadd.f32 %v7348_v61, %v2460_v63  ;;  %v2461_v21 = vmul.f32 %v7340_v10, %v2428_v6  ;;  %v5222_v35 = vpop.f32.mrb[11].mxu1  ;;  %v1586_v0 = vmax.f32 %v1577_v15, 0.0  ;;  %v7455_v15 = vld [vmem:[%s6400_s22 + $0x60] sm:$0xf] }
 0x240   : > { %v1540_v14 = vpop.f32.mrb[12].mxu0  ;;  %v7467_v35 = vld [vmem:[%s6400_s22 + $0x8c] sm:$0xf] }
 0x241   : > { %v5027_v24 = vpop.f32.mrb[13].mxu0  ;;  %v2478_v36 = vmax.f32 %v2469_v20, 0.0  ;;  %v2470_v41 = vadd.f32 %v7348_v61, %v2461_v21  ;;  %v1569_v52 = vmul.f32 %v7340_v10, %v1540_v14  ;;  %5536 = vmatmul.mubr.msk.bf16.gmra.mrb[36].mxu1 %vm270_vm3, %v7058_v4  ;;  %v2960_v14 = vld [vmem:[%s6400_s22 + $0x5c] sm:$0xc]  ;;  %v7459_v21 = vld [vmem:[%s6400_s22 + $0x64] sm:$0xff]  }
 0x242   : > { %v1543_v25 = vpop.f32.mrb[14].mxu0  ;;  %5541 = vmatprep.mubr.msk.bf16.mxu1 %vm6344_vm1, %v6343_v1  ;;  %v4500_v20 = vcombine.low %v2960_v14, %v7455_v15  ;;  %v7475_v24 = vld [vmem:[%s6400_s22 + $0x94] sm:$0xf] }
 0x243   : > { %v5028_v62 = vpop.f32.mrb[15].mxu0  ;;  %v7408_v3 = vmax.f32 %v1585_v12, %v2478_v36  ;;  %v2479_v27 = vmax.f32 %v2470_v41, 0.0  ;;  %v1570_v32 = vmul.f32 %v7340_v10, %v1543_v25  ;;  %v1578_v47 = vadd.f32 %v7348_v61, %v1569_v52 }
 0x244   : > { %v2433_v57 = vpop.f32.mrb[12].mxu1  ;;  %v2996_v25 = vshrl.u32 %v4500_v20, 16  ;;  %v2999_v12 = vshll.u32 %v4500_v20, 16  ;;  %v3007_v36 = vshll.u32 %v7459_v21, 16 }
 0x245   : > { %5344 = vmatmul.mubr.msk.bf16.vlgmr.msra.gmra.mrb[20].mxu0 %vm270_vm3, %v7026_v17  ;;  %v7416_v33 = vmax.f32 %v1586_v0, %v2479_v27  ;;  %v2462_v26 = vmul.f32 %v7340_v10, %v2433_v57  ;;  %v5225_v13 = vpop.f32.mrb[13].mxu1  ;;  %v1579_v39 = vadd.f32 %v7348_v61, %v1570_v32  ;;  %v1587_v38 = vmax.f32 %v1578_v47, 0.0  ;;  %v7485_v32 = vld [vmem:[%s6400_s22 + $0x6c] sm:$0xff]  }
 0x246   : > { %5364 = vmatpush3.bf16.msra.mxu0 %v6828_v7  ;;  %5347 = vmatprep.mubr.msk.bf16.mxu0 %vm6344_vm1, %v6343_v1  ;;  %v2436_v28 = vpop.f32.mrb[14].mxu1  ;;  %v2998_v52 = vrot.slane %v2996_v25, 2  ;;  %v3001_v62 = vrot.slane %v2999_v12, 3  ;;  %v3009_v27 = vrot.slane %v3007_v36, 3  ;;  %v7531_v12 = vld [vmem:[%s6400_s22 + $0x7c] sm:$0x7f]  }
 0x247   : > { %5385 = vmatprep.subr.bf16.mxu0 %v6343_v1  ;;  %v2471_v17 = vadd.f32 %v7348_v61, %v2462_v26  ;;  %v2463_v40 = vmul.f32 %v7340_v10, %v2436_v28  ;;  %v5226_v55 = vpop.f32.mrb[15].mxu1  ;;  %v1588_v8 = vmax.f32 %v1579_v39, 0.0  ;;  %v7494_v28 = vld [vmem:[%s6400_s22 + $0x98] sm:$0xf] }
 0x248   : > { %v1548_v37 = vpop.f32.mrb[16].mxu0  ;;  %v3002_v39 = vor.u32 %v3001_v62, %v2998_v52  ;;  %v7542_v52 = vld [vmem:[%s6400_s22 + $0xac] sm:$0xf] }
 0x249   : > { %v5031_v45 = vpop.f32.mrb[17].mxu0  ;;  %v2480_v54 = vmax.f32 %v2471_v17, 0.0  ;;  %v2472_v30 = vadd.f32 %v7348_v61, %v2463_v40  ;;  %v1571_v48 = vmul.f32 %v7340_v10, %v1548_v37  ;;  %5542 = vmatmul.mubr.msk.bf16.vlgmr.msra.gmra.mrb[20].mxu1 %vm270_vm3, %v7090_v29  ;;  %v7497_v37 = vld [vmem:[%s6400_s22 + $0x9c] sm:$0xf]  ;;  %v3013_v17 = vshrl.u32 %v7485_v32, 16 }
 0x24a   : > { %v1551_v50 = vpop.f32.mrb[18].mxu0  ;;  %5562 = vmatpush3.bf16.msra.mxu1 %v6828_v7  ;;  %5545 = vmatprep.mubr.msk.bf16.mxu1 %vm6344_vm1, %v6343_v1  ;;  %v3016_v40 = vshll.u32 %v7485_v32, 16 }
 0x24b   : > { %v5032_v46 = vpop.f32.mrb[19].mxu0  ;;  %v7431_v9 = vmax.f32 %v1587_v38, %v2480_v54  ;;  %v2481_v11 = vmax.f32 %v2472_v30, 0.0  ;;  %5583 = vmatprep.subr.bf16.mxu1 %v6343_v1  ;;  %v1580_v7 = vadd.f32 %v7348_v61, %v1571_v48  ;;  %v4512_v38 = vcombine.low %v7494_v28, %v7497_v37 }
 0x24c   : > { %v2441_v34 = vpop.f32.mrb[16].mxu1  ;;  %v3015_v30 = vrot.slane %v3013_v17, 2  ;;  %v3018_v48 = vrot.slane %v3016_v40, 3  ;;  %v7507_v46 = vld [vmem:[%s6400_s22 + $0x74] sm:$0xff]  }
 0x24d   : > { %5348 = vmatmul.mubr.msk.bf16.gmra.mrb[24].mxu0 %vm270_vm3, %v7040_v58  ;;  %v7438_v29 = vmax.f32 %v1588_v8, %v2481_v11  ;;  %v2464_v23 = vmul.f32 %v7340_v10, %v2441_v34  ;;  %v5229_v43 = vpop.f32.mrb[17].mxu1  ;;  %v1589_v63 = vmax.f32 %v1580_v7, 0.0  ;;  %v3188_v34 = vshrl.u32 %v4512_v38, 16 }
 0x24e   : > { %5351 = vmatprep.mubr.msk.bf16.mxu0 %vm6344_vm1, %v6343_v1  ;;  %v2444_v44 = vpop.f32.mrb[18].mxu1  ;;  %v3191_v7 = vshll.u32 %v4512_v38, 16  ;;  %v7518_v43 = vld [vmem:[%s6400_s22 + $0xa4] sm:$0xf] }
 0x24f   : > { %v2473_v58 = vadd.f32 %v7348_v61, %v2464_v23  ;;  %v5230_v56 = vpop.f32.mrb[19].mxu1  ;;  %v7515_v23 = vld [vmem:[%s6400_s22 + $0xa0] sm:$0xf]  ;;  %v3022_v44 = vshrl.u32 %v7507_v46, 16 }
 0x250   : > { %v4513_v14 = vcombine.low %v7515_v23, %v7518_v43 }
 0x251   : > { %v2482_v5 = vmax.f32 %v2473_v58, 0.0  ;;  %5546 = vmatmul.mubr.msk.bf16.gmra.mrb[24].mxu1 %vm270_vm3, %v7104_v16  ;;  %v3135_v16 = vld [vmem:[%s6400_s22 + $0x88] sm:$0x8]  ;;  %v3025_v58 = vshll.u32 %v7507_v46, 16 }
 0x252   : > { %5549 = vmatprep.mubr.msk.bf16.mxu1 %vm6344_vm1, %v6343_v1  ;;  %v4510_v41 = vcombine.low %v3135_v16, %v7467_v35  ;;  %v3024_v16 = vrot.slane %v3022_v44, 2  ;;  %v3197_v36 = vshrl.u32 %v4513_v14, 16  ;;  %v3319_v44 = vrot.slane %v7507_v46, 3 }
 0x253   : > { %v7447_v6 = vmax.f32 %v1589_v63, %v2482_v5  ;;  %v3190_v63 = vrot.slane %v3188_v34, 3  ;;  %v3193_v5 = vrot.slane %v3191_v7, 4  ;;  %v3027_v25 = vrot.slane %v3025_v58, 3 }
 0x254   : > { %v3171_v57 = vshrl.u32 %v4510_v41, 16  ;;  %v3174_v47 = vshll.u32 %v4510_v41, 16  ;;  %v3200_v41 = vshll.u32 %v4513_v14, 16  ;;  %v3315_v7 = vrot.slane %v7459_v21, 3 }
 0x255   : > { %5352 = vmatmul.mubr.msk.bf16.gmra.mrb[28].mxu0 %vm270_vm3, %v7052_v59  ;;  %v7472_v59 = vld [vmem:[%s6400_s22 + $0x90] sm:$0xf]  ;;  %v3028_v62 = vor.u32 %v3027_v25, %v3024_v16 }
 0x256   : > { %5355 = vmatprep.mubr.msk.bf16.mxu0 %vm6344_vm1, %v6343_v1  ;;  %v3173_v55 = vrot.slane %v3171_v57, 3  ;;  %v3176_v45 = vrot.slane %v3174_v47, 4  ;;  %v3199_v57 = vrot.slane %v3197_v36, 3  ;;  %v3202_v47 = vrot.slane %v3200_v41, 4 }
 0x257   : > { %v4566_v58 = vcombine.low %v7467_v35, %v7472_v59  ;;  %v4568_v35 = vcombine.low %v7497_v37, %v7515_v23 }
 0x258   : > { %v3177_v8 = vor.u32 %v3176_v45, %v3173_v55  ;;  %v3203_v17 = vor.u32 %v3202_v47, %v3199_v57 }
 0x259   : > { %5550 = vmatmul.mubr.msk.bf16.gmra.mrb[28].mxu1 %vm270_vm3, %v7116_v42  ;;  %v3004_v42 = vshrl.u32 %v7459_v21, 16 }
 0x25a   : > { %5553 = vmatprep.mubr.msk.bf16.mxu1 %vm6344_vm1, %v6343_v1 }
 0x25b   : > { %v3006_v0 = vrot.slane %v3004_v42, 2  ;;  %v3194_v42 = vor.u32 %v3193_v5, %v3190_v63 }
 0x25d   : > { %5356 = vmatmul.mubr.msk.bf16.gmra.mrb[32].mxu0 %vm270_vm3, %v7066_v18  ;;  %v4511_v18 = vcombine.low %v7472_v59, %v7475_v24 }
 0x25e   : > { %5359 = vmatprep.mubr.msk.bf16.mxu0 %vm6344_vm1, %v6343_v1 }
 0x25f   : > { %v3179_v26 = vshrl.u32 %v4511_v18, 16  ;;  %v3182_v13 = vshll.u32 %v4511_v18, 16  ;;  %v7539_v18 = vld [vmem:[%s6400_s22 + $0xa8] sm:$0xf] }
 0x260   : > { %v4569_v59 = vcombine.low %v7518_v43, %v7539_v18 }
 0x261   : > { %5554 = vmatmul.mubr.msk.bf16.gmra.mrb[32].mxu1 %vm270_vm3, %v7131_v31  ;;  %v3010_v31 = vor.u32 %v3009_v27, %v3006_v0  ;;  %v3181_v50 = vrot.slane %v3179_v26, 3  ;;  %v3034_v0 = vshll.u32 %v7531_v12, 16  ;;  %v4514_v26 = vcombine.low %v7539_v18, %v7542_v52 }
 0x262   : > { %5557 = vmatprep.mubr.msk.bf16.mxu1 %vm6344_vm1, %v6343_v1 }
 0x263   : > { %v3011_v54 = vsel %vm949_vm9, %v3002_v39, %v3010_v31  ;;  %v3206_v40 = vshrl.u32 %v4514_v26, 16  ;;  %v3209_v55 = vshll.u32 %v4514_v26, 16 }
 0x265   : > { %5360 = vmatmul.mubr.msk.bf16.gmra.mrb[36].mxu0 %vm270_vm3, %v7058_v4  ;;  %v3184_v4 = vrot.slane %v3182_v13, 4  ;;  %v3211_v38 = vrot.slane %v3209_v55, 4 }
 0x266   : > { %5365 = vmatprep.mubr.msk.bf16.mxu0 %vm6344_vm1, %v6343_v1 }
 0x267   : > { %v3185_v11 = vor.u32 %v3184_v4, %v3181_v50  ;;  %v3204_v50 = vsel %vm2044_vm6, %v3194_v42, %v3203_v17  ;;  %v3208_v4 = vrot.slane %v3206_v40, 3 }
 0x269   : > { %5558 = vmatmul.mubr.msk.bf16.gmra.mrb[36].mxu1 %vm270_vm3, %v7123_v22  ;;  %v3019_v22 = vor.u32 %v3018_v48, %v3015_v30  ;;  %v3186_v56 = vsel %vm2044_vm6, %v3177_v8, %v3185_v11  ;;  %v3195_v27 = vsel %vm2044_vm6, %v3185_v11, %v3194_v42  ;;  %v3212_v30 = vor.u32 %v3211_v38, %v3208_v4  ;;  %v3310_v8 = vld [vmem:[%s6400_s22 + $0x5c] sm:$0x8]  ;;  %s7675_s22 = scalar_lea.vmem %s7718_s4, %s6268_s19 }
 0x26a   : > { %5563 = vmatprep.mubr.msk.bf16.mxu1 %vm6344_vm1, %v6343_v1  ;;  %v4520_v11 = vcombine.low %v3310_v8, %v7455_v15  ;;  %v3317_v15 = vrot.slane %v7485_v32, 3  ;;  %v3321_v32 = vrot.slane %v7531_v12, 3 }
 0x26b   : > { %v3020_v20 = vsel %vm949_vm9, %v3010_v31, %v3019_v22  ;;  %v3029_v13 = vsel %vm949_vm9, %v3019_v22, %v3028_v62  ;;  %v3036_v31 = vrot.slane %v3034_v0, 3  ;;  %v3213_v48 = vsel %vm2044_vm6, %v3203_v17, %v3212_v30 }
 0x26c   : > { %v3314_v34 = vrot.slane %v4520_v11, 3  ;;  %v3318_v21 = vsel %vm834_vm8, %v3315_v7, %v3317_v15  ;;  %v3322_v46 = vsel %vm834_vm8, %v3319_v44, %v3321_v32 }
 0x26d   : > { %5366 = vmatmul.mubr.msk.bf16.vlgmr.msra.gmra.mrb[20].mxu0 %vm270_vm3, %v3011_v54 }
 0x26e   : > { %5386 = vmatpush3.bf16.msra.mxu0 %v6917_v60  ;;  %5369 = vmatprep.mubr.msk.bf16.mxu0 %vm6344_vm1, %v6343_v1  ;;  %v3316_v22 = vsel %vm834_vm8, %v3314_v34, %v3315_v7 }
 0x26f   : > { %5407 = vmatprep.subr.bf16.mxu0 %v6343_v1 }
 0x271   : > { %5564 = vmatmul.mubr.msk.bf16.vlgmr.msra.gmra.mrb[20].mxu1 %vm270_vm3, %v3186_v56 }
 0x272   : > { %5584 = vmatpush3.bf16.msra.mxu1 %v6917_v60  ;;  %5567 = vmatprep.mubr.msk.bf16.mxu1 %vm6344_vm1, %v6343_v1  ;;  %v3031_v60 = vshrl.u32 %v7531_v12, 16 }
 0x273   : > { %5605 = vmatprep.subr.bf16.mxu1 %v6343_v1 }
 0x274   : > { %v3033_v39 = vrot.slane %v3031_v60, 2 }
 0x275   : > { %5370 = vmatmul.mubr.msk.bf16.gmra.mrb[24].mxu0 %vm270_vm3, %v3020_v20 }
 0x276   : > { %5373 = vmatprep.mubr.msk.bf16.mxu0 %vm6344_vm1, %v6343_v1  ;;  %v3037_v45 = vor.u32 %v3036_v31, %v3033_v39 }
 0x278   : > { %v3038_v54 = vsel %vm949_vm9, %v3028_v62, %v3037_v45 }
 0x279   : > { %5568 = vmatmul.mubr.msk.bf16.gmra.mrb[24].mxu1 %vm270_vm3, %v3195_v27 }
 0x27a   : > { %5571 = vmatprep.mubr.msk.bf16.mxu1 %vm6344_vm1, %v6343_v1 }
 0x27d   : > { %5374 = vmatmul.mubr.msk.bf16.gmra.mrb[28].mxu0 %vm270_vm3, %v3029_v13 }
 0x27e   : > { %5377 = vmatprep.mubr.msk.bf16.mxu0 %vm6344_vm1, %v6343_v1 }
 0x281   : > { %5572 = vmatmul.mubr.msk.bf16.gmra.mrb[28].mxu1 %vm270_vm3, %v3204_v50 }
 0x282   : > { %5575 = vmatprep.mubr.msk.bf16.mxu1 %vm6344_vm1, %v6343_v1 }
 0x285   : > { %5378 = vmatmul.mubr.msk.bf16.gmra.mrb[32].mxu0 %vm270_vm3, %v3038_v54 }
 0x286   : > { %5381 = vmatprep.mubr.msk.bf16.mxu0 %vm6344_vm1, %v6343_v1 }
 0x289   : > { %5576 = vmatmul.mubr.msk.bf16.gmra.mrb[32].mxu1 %vm270_vm3, %v3213_v48 }
 0x28a   : > { %5579 = vmatprep.mubr.msk.bf16.mxu1 %vm6344_vm1, %v6343_v1 }
 0x28d   : > { %5382 = vmatmul.mubr.msk.bf16.gmra.mrb[36].mxu0 %vm270_vm3, %v3037_v45 }
 0x28e   : > { %5387 = vmatprep.mubr.msk.bf16.mxu0 %vm6344_vm1, %v6343_v1 }
 0x291   : > { %5580 = vmatmul.mubr.msk.bf16.gmra.mrb[36].mxu1 %vm270_vm3, %v3212_v30 }
 0x292   : > { %5585 = vmatprep.mubr.msk.bf16.mxu1 %vm6344_vm1, %v6343_v1 }
 0x295   : > { %5388 = vmatmul.mubr.msk.bf16.vlgmr.msra.gmra.mrb[20].mxu0 %vm270_vm3, %v3186_v56  ;;  %v4567_v56 = vcombine.low %v7475_v24, %v7494_v28  ;;  %v4570_v24 = vcombine.low %v7542_v52, %v7542_v52 }
 0x296   : > { %5408 = vmatpush3.bf16.msra.mxu0 %v7014_v49  ;;  %5391 = vmatprep.mubr.msk.bf16.mxu0 %vm6344_vm1, %v6343_v1 }
 0x299   : > { %5586 = vmatmul.mubr.msk.bf16.vlgmr.msra.gmra.mrb[20].mxu1 %vm270_vm3, %v3316_v22 }
 0x29a   : > { %5606 = vmatpush3.bf16.msra.mxu1 %v7014_v49  ;;  %5589 = vmatprep.mubr.msk.bf16.mxu1 %vm6344_vm1, %v6343_v1  ;;  %v3320_v49 = vsel %vm834_vm8, %v3317_v15, %v3319_v44 }
 0x29d   : > { %5392 = vmatmul.mubr.msk.bf16.gmra.mrb[24].mxu0 %vm270_vm3, %v3195_v27 }
 0x29e   : > { %5395 = vmatprep.mubr.msk.bf16.mxu0 %vm6344_vm1, %v6343_v1 }
 0x2a1   : > { %5590 = vmatmul.mubr.msk.bf16.gmra.mrb[24].mxu1 %vm270_vm3, %v3318_v21 }
 0x2a2   : > { %5593 = vmatprep.mubr.msk.bf16.mxu1 %vm6344_vm1, %v6343_v1 }
 0x2a5   : > { %5396 = vmatmul.mubr.msk.bf16.gmra.mrb[28].mxu0 %vm270_vm3, %v3204_v50 }
 0x2a6   : > { %5399 = vmatprep.mubr.msk.bf16.mxu0 %vm6344_vm1, %v6343_v1 }
 0x2a9   : > { %5594 = vmatmul.mubr.msk.bf16.gmra.mrb[28].mxu1 %vm270_vm3, %v3320_v49 }
 0x2aa   : > { %5597 = vmatprep.mubr.msk.bf16.mxu1 %vm6344_vm1, %v6343_v1 }
 0x2ad   : > { %5400 = vmatmul.mubr.msk.bf16.gmra.mrb[32].mxu0 %vm270_vm3, %v3213_v48 }
 0x2ae   : > { %5403 = vmatprep.mubr.msk.bf16.mxu0 %vm6344_vm1, %v6343_v1 }
 0x2b1   : > { %5598 = vmatmul.mubr.msk.bf16.gmra.mrb[32].mxu1 %vm270_vm3, %v3322_v46 }
 0x2b2   : > { %5601 = vmatprep.mubr.msk.bf16.mxu1 %vm6344_vm1, %v6343_v1 }
 0x2b5   : > { %5404 = vmatmul.mubr.msk.bf16.gmra.mrb[36].mxu0 %vm270_vm3, %v3212_v30 }
 0x2b6   : > { %5409 = vmatprep.mubr.msk.bf16.mxu0 %vm6344_vm1, %v6343_v1 }
 0x2b9   : > { %5602 = vmatmul.mubr.msk.bf16.gmra.mrb[36].mxu1 %vm270_vm3, %v3321_v32 }
 0x2ba   : > { %5607 = vmatprep.mubr.msk.bf16.mxu1 %vm6344_vm1, %v6343_v1 }
 0x2bd   : > { %5410 = vmatmul.mubr.msk.bf16.vlgmr.msra.gmra.mrb[20].mxu0 %vm270_vm3, %v3316_v22 }
 0x2be   : > { %5413 = vmatprep.mubr.msk.bf16.mxu0 %vm6344_vm1, %v6343_v1 }
 0x2c1   : > { %5608 = vmatmul.mubr.msk.bf16.vlgmr.msra.gmra.mrb[20].mxu1 %vm270_vm3, %v4566_v58 }
 0x2c2   : > { %5611 = vmatprep.mubr.msk.bf16.mxu1 %vm6344_vm1, %v6343_v1 }
 0x2c5   : > { %5414 = vmatmul.mubr.msk.bf16.gmra.mrb[24].mxu0 %vm270_vm3, %v3318_v21 }
 0x2c6   : > { %5417 = vmatprep.mubr.msk.bf16.mxu0 %vm6344_vm1, %v6343_v1 }
 0x2c9   : > { %5612 = vmatmul.mubr.msk.bf16.gmra.mrb[24].mxu1 %vm270_vm3, %v4567_v56 }
 0x2ca   : > { %5615 = vmatprep.mubr.msk.bf16.mxu1 %vm6344_vm1, %v6343_v1 }
 0x2cd   : > { %5418 = vmatmul.mubr.msk.bf16.gmra.mrb[28].mxu0 %vm270_vm3, %v3320_v49 }
 0x2ce   : > { %5421 = vmatprep.mubr.msk.bf16.mxu0 %vm6344_vm1, %v6343_v1 }
 0x2d1   : > { %5616 = vmatmul.mubr.msk.bf16.gmra.mrb[28].mxu1 %vm270_vm3, %v4568_v35 }
 0x2d2   : > { %5619 = vmatprep.mubr.msk.bf16.mxu1 %vm6344_vm1, %v6343_v1 }
 0x2d5   : > { %5422 = vmatmul.mubr.msk.bf16.gmra.mrb[32].mxu0 %vm270_vm3, %v3322_v46 }
 0x2d6   : > { %5425 = vmatprep.mubr.msk.bf16.mxu0 %vm6344_vm1, %v6343_v1 }
 0x2d9   : > { %5620 = vmatmul.mubr.msk.bf16.gmra.mrb[32].mxu1 %vm270_vm3, %v4569_v59 }
 0x2da   : > { %5623 = vmatprep.mubr.msk.bf16.mxu1 %vm6344_vm1, %v6343_v1 }
 0x2dd   : > { %5426 = vmatmul.mubr.msk.bf16.gmra.mrb[36].mxu0 %vm270_vm3, %v3321_v32 }
 0x2e1   : > { %5624 = vmatmul.mubr.msk.bf16.gmra.mrb[36].mxu1 %vm270_vm3, %v4570_v24 }
 0x390   : > { %v3372_v28 = vpop.f32.mrb[20].mxu0 }
 0x391   : > { %v3419_v37 = vmul.f32 %v7340_v10, %v3372_v28  ;;  %v5411_v23 = vpop.f32.mrb[21].mxu0 }
 0x392   : > { %v3375_v63 = vpop.f32.mrb[22].mxu0 }
 0x393   : > { %v3428_v5 = vadd.f32 %v7348_v61, %v3419_v37  ;;  %v3420_v43 = vmul.f32 %v7340_v10, %v3375_v63  ;;  %v5412_v14 = vpop.f32.mrb[23].mxu0 }
 0x394   : > { %v4139_v16 = vpop.f32.mrb[20].mxu1 }
 0x395   : > { %v3437_v20 = vmax.f32 %v3428_v5, 0.0  ;;  %v3429_v1 = vadd.f32 %v7348_v61, %v3420_v43  ;;  %v4186_v42 = vmul.f32 %v7340_v10, %v4139_v16  ;;  %v5609_v36 = vpop.f32.mrb[21].mxu1 }
 0x396   : > { %v4142_v41 = vpop.f32.mrb[22].mxu1 }
 0x397   : > { %v3446_v25 = vmax.f32 %v7368_v19, %v3437_v20  ;;  %v3438_v12 = vmax.f32 %v3429_v1, 0.0  ;;  %v4195_v62 = vadd.f32 %v7348_v61, %v4186_v42  ;;  %v4187_v60 = vmul.f32 %v7340_v10, %v4142_v41  ;;  %v5610_v0 = vpop.f32.mrb[23].mxu1 }
 0x398   : > { %v3380_v18 = vpop.f32.mrb[24].mxu0 }
 0x399   : > { %v3447_v52 = vmax.f32 %v7375_v53, %v3438_v12  ;;  %v3421_v27 = vmul.f32 %v7340_v10, %v3380_v18  ;;  %v5415_v57 = vpop.f32.mrb[25].mxu0  ;;  %v4204_v26 = vmax.f32 %v4195_v62, 0.0  ;;  %v4196_v19 = vadd.f32 %v7348_v61, %v4187_v60 }
 0x39a   : > { %v3383_v47 = vpop.f32.mrb[26].mxu0 }
 0x39b   : > { %v3430_v13 = vadd.f32 %v7348_v61, %v3421_v27  ;;  %v3422_v39 = vmul.f32 %v7340_v10, %v3383_v47  ;;  %v5416_v31 = vpop.f32.mrb[27].mxu0  ;;  %v4213_v17 = vmax.f32 %v3446_v25, %v4204_v26  ;;  %v4205_v53 = vmax.f32 %v4196_v19, 0.0 }
 0x39c   : > { %v4147_v45 = vpop.f32.mrb[24].mxu1 }
 0x39d   : > { %v3439_v40 = vmax.f32 %v3430_v13, 0.0  ;;  %v3431_v55 = vadd.f32 %v7348_v61, %v3422_v39  ;;  %v4214_v50 = vmax.f32 %v3447_v52, %v4205_v53  ;;  %v4188_v54 = vmul.f32 %v7340_v10, %v4147_v45  ;;  %v5613_v30 = vpop.f32.mrb[25].mxu1 }
 0x39e   : > { %v4150_v48 = vpop.f32.mrb[26].mxu1 }
 0x39f   : > { %v3448_v4 = vmax.f32 %v7388_v2, %v3439_v40  ;;  %v3440_v38 = vmax.f32 %v3431_v55, 0.0  ;;  %v4599_v11 = vpack.c.bf16 %v4214_v50, %v4213_v17  ;;  %v4197_v7 = vadd.f32 %v7348_v61, %v4188_v54  ;;  %v5614_v2 = vpop.f32.mrb[27].mxu1 }
 0x3a0   : > { %v3388_v8 = vpop.f32.mrb[28].mxu0  ;;  %v4189_v22 = vmul.f32 %v7340_v10, %v4150_v48 }
 0x3a1   : > { %v3449_v34 = vmax.f32 %v7395_v51, %v3440_v38  ;;  %v5419_v15 = vpop.f32.mrb[29].mxu0  ;;  %v3423_v21 = vmul.f32 %v7340_v10, %v3388_v8  ;;  %4600 = vst [vmem:[%s7675_s22] sm:$0xff] %v4599_v11   ;;  %v4206_v49 = vmax.f32 %v4197_v7, 0.0 }
 0x3a2   : > { %v3391_v44 = vpop.f32.mrb[30].mxu0  ;;  %v4198_v32 = vadd.f32 %v7348_v61, %v4189_v22 }
 0x3a3   : > { %v3424_v46 = vmul.f32 %v7340_v10, %v3391_v44  ;;  %v5420_v58 = vpop.f32.mrb[31].mxu0  ;;  %v3432_v56 = vadd.f32 %v7348_v61, %v3423_v21  ;;  %v4215_v35 = vmax.f32 %v3448_v4, %v4206_v49 }
 0x3a4   : > { %v4207_v51 = vmax.f32 %v4198_v32, 0.0  ;;  %v4155_v28 = vpop.f32.mrb[28].mxu1 }
 0x3a5   : > { %v3433_v59 = vadd.f32 %v7348_v61, %v3424_v46  ;;  %v3441_v24 = vmax.f32 %v3432_v56, 0.0  ;;  %v4190_v63 = vmul.f32 %v7340_v10, %v4155_v28  ;;  %v5617_v5 = vpop.f32.mrb[29].mxu1 }
 0x3a6   : > { %v4216_v37 = vmax.f32 %v3449_v34, %v4207_v51  ;;  %v4158_v14 = vpop.f32.mrb[30].mxu1 }
 0x3a7   : > { %v3442_v23 = vmax.f32 %v3433_v59, 0.0  ;;  %v3450_v43 = vmax.f32 %v7408_v3, %v3441_v24  ;;  %v4199_v25 = vadd.f32 %v7348_v61, %v4190_v63  ;;  %v4191_v12 = vmul.f32 %v7340_v10, %v4158_v14  ;;  %v5618_v42 = vpop.f32.mrb[31].mxu1 }
 0x3a8   : > { %v3396_v20 = vpop.f32.mrb[32].mxu0  ;;  %v4604_v1 = vpack.c.bf16 %v4216_v37, %v4215_v35 }
 0x3a9   : > { %v3451_v16 = vmax.f32 %v7416_v33, %v3442_v23  ;;  %v5423_v36 = vpop.f32.mrb[33].mxu0  ;;  %v3425_v41 = vmul.f32 %v7340_v10, %v3396_v20  ;;  %v4208_v52 = vmax.f32 %v4199_v25, 0.0  ;;  %v4200_v62 = vadd.f32 %v7348_v61, %v4191_v12 }
 0x3aa   : > { %v3399_v18 = vpop.f32.mrb[34].mxu0  ;;  %4616 = vst [vmem:[%s7675_s22 + $0x8] sm:$0xff] %v4604_v1  }
 0x3ab   : > { %v3426_v3 = vmul.f32 %v7340_v10, %v3399_v18  ;;  %v5424_v60 = vpop.f32.mrb[35].mxu0  ;;  %v3434_v0 = vadd.f32 %v7348_v61, %v3425_v41  ;;  %v4217_v27 = vmax.f32 %v3450_v43, %v4208_v52  ;;  %v4209_v33 = vmax.f32 %v4200_v62, 0.0 }
 0x3ac   : > { %v4163_v26 = vpop.f32.mrb[32].mxu1 }
 0x3ad   : > { %v3435_v57 = vadd.f32 %v7348_v61, %v3426_v3  ;;  %v3443_v47 = vmax.f32 %v3434_v0, 0.0  ;;  %v4218_v19 = vmax.f32 %v3451_v16, %v4209_v33  ;;  %v4192_v39 = vmul.f32 %v7340_v10, %v4163_v26  ;;  %v5621_v31 = vpop.f32.mrb[33].mxu1 }
 0x3ae   : > { %v4166_v53 = vpop.f32.mrb[34].mxu1 }
 0x3af   : > { %v3444_v13 = vmax.f32 %v3435_v57, 0.0  ;;  %v3452_v17 = vmax.f32 %v7431_v9, %v3443_v47  ;;  %v4609_v55 = vpack.c.bf16 %v4218_v19, %v4217_v27  ;;  %v4201_v50 = vadd.f32 %v7348_v61, %v4192_v39  ;;  %v5622_v38 = vpop.f32.mrb[35].mxu1 }
 0x3b0   : > { %v3404_v40 = vpop.f32.mrb[36].mxu0  ;;  %v4193_v4 = vmul.f32 %v7340_v10, %v4166_v53 }
 0x3b1   : > { %v3453_v45 = vmax.f32 %v7438_v29, %v3444_v13  ;;  %v5427_v54 = vpop.f32.mrb[37].mxu0  ;;  %v3427_v30 = vmul.f32 %v7340_v10, %v3404_v40  ;;  %4617 = vst [vmem:[%s7675_s22 + $0x10] sm:$0xff] %v4609_v55   ;;  %v4210_v8 = vmax.f32 %v4201_v50, 0.0 }
 0x3b2   : > { %v3407_v48 = vpop.f32.mrb[38].mxu0  ;;  %v4202_v11 = vadd.f32 %v7348_v61, %v4193_v4 }
 0x3b3   : > { %v5428_v9 = vpop.f32.mrb[39].mxu0  ;;  %v3436_v34 = vadd.f32 %v7348_v61, %v3427_v30  ;;  %v4219_v7 = vmax.f32 %v3452_v17, %v4210_v8 }
 0x3b4   : > { %v4211_v29 = vmax.f32 %v4202_v11, 0.0  ;;  %v4171_v2 = vpop.f32.mrb[36].mxu1 }
 0x3b5   : > { %v3445_v22 = vmax.f32 %v3436_v34, 0.0  ;;  %v4194_v21 = vmul.f32 %v7340_v10, %v4171_v2  ;;  %v5625_v44 = vpop.f32.mrb[37].mxu1 }
 0x3b6   : > { %v4220_v15 = vmax.f32 %v3453_v45, %v4211_v29  ;;  %v4174_v32 = vpop.f32.mrb[38].mxu1 }
 0x3b7   : > { %v3454_v49 = vmax.f32 %v7447_v6, %v3445_v22  ;;  %v4203_v58 = vadd.f32 %v7348_v61, %v4194_v21  ;;  %v5626_v56 = vpop.f32.mrb[39].mxu1 }
 0x3b8   : > { %v4614_v46 = vpack.c.bf16 %v4220_v15, %v4219_v7 }
 0x3b9   : > { %v4212_v35 = vmax.f32 %v4203_v58, 0.0 }
 0x3ba   : > { %4618 = vst [vmem:[%s7675_s22 + $0x18] sm:$0xff] %v4614_v46  }
 0x3bb   : > { %v4221_v51 = vmax.f32 %v3454_v49, %v4212_v35 }
 0x3bd   : > { %v4595_v59 = vpack.c.bf16 %v4221_v51, %v4221_v51 }
 0x3bf   : > { %4267 = vst [vmem:[%s7675_s22 + $0x20] sm:$0xf] %v4595_v59 }
 0x3c0 PF: > { %s14_s15 = sadd.s32 1, %s6341_s15  }
 0x3c1   : > { %p11_p4 = scmp.ge.s32.totalorder %s14_s15, 4  }
 0x3c3   :  { %13 = sbr.rel (!%p11_p4) target bundleno = 1 (0x1), region = 74 }

</bundles_post_ra>
